<compile_context>
chip_gen: v6e
topology: v6e:2x2x1
jax: 0.10.0
libtpu: 0.0.40
codegen_flags: <defaults>
</compile_context>

<pallas_src>
import functools

import jax
import jax.numpy as jnp
from jax.experimental import pallas as pl
from jax.experimental.pallas import tpu as pltpu


def _eeg_depth_attention_kernel(x_ref, taps_ref, o_ref, *, C):
    """Process one (TN, D*C, TW) block.

    x_ref / o_ref: (TN, D*C, TW) in x's native dtype.
    taps_ref:      SMEM (k,) f32 conv taps pre-scaled by 1/C (fuses the channel mean).

    Edge blocks (N % TN != 0 or W % TW != 0) contain uninitialized padded rows/cols.
    Every stage here (channel mean, depth conv, softmax over D, multiply) is pointwise
    in (n, w), so garbage stays confined to padded rows/cols and their out-of-bounds
    stores are dropped by Pallas.  Do NOT add cross-(n,w) reductions without masking.
    """
    tn, dc, tw = x_ref.shape
    d_depth = dc // C
    k = taps_ref.shape[0]
    pad = k // 2

    # 1) Channel sum per depth group (the 1/C of the mean lives in the taps).
    #    Small static loop over D; each piece is a sublane reduction over C rows.
    pools = [
        jnp.sum(x_ref[:, d * C:(d + 1) * C, :].astype(jnp.float32),
                axis=1, keepdims=True)
        for d in range(d_depth)
    ]                                                         # D x (TN, 1, TW) f32

    # 2) Depth conv (cross-correlation, zero padding) as k shifted multiply-adds on
    #    the small (TN, D, TW) f32 intermediate.  The conv bias is omitted: a constant
    #    shift along the softmax axis is mathematically a no-op.
    pieces = pools
    if pad > 0:
        zpad = jnp.zeros((tn, pad, tw), jnp.float32)
        pieces = [zpad] + pools + [zpad]
    pool_p = jnp.concatenate(pieces, axis=1)                  # (TN, D + 2*pad, TW)
    y = taps_ref[0] * pool_p[:, 0:d_depth, :]
    for t in range(1, k):
        y = y + taps_ref[t] * pool_p[:, t:t + d_depth, :]     # (TN, D, TW) f32

    # 3) Softmax over depth; the "* C" output scale folds into the normalizer.
    y = y - jnp.max(y, axis=1, keepdims=True)
    e = jnp.exp(y)
    s = (e * (float(C) / jnp.sum(e, axis=1, keepdims=True))).astype(x_ref.dtype)

    # 4) Apply each depth weight to its C channels with sliced, lane-dense stores
    #    (no full-block broadcast/reshape temporary; stores start streaming early).
    for d in range(d_depth):
        lo, hi = d * C, (d + 1) * C
        o_ref[:, lo:hi, :] = x_ref[:, lo:hi, :] * s[:, d:d + 1, :]


def _tpu_vmem_and_cores():
    """Returns (scoped VMEM budget to request, #TensorCores sharing the parallel axis)."""
    try:
        vmem_cap = int(pltpu.get_tpu_info().vmem_capacity_bytes)
    except Exception:
        vmem_cap = 64 * 1024 * 1024                 # conservative (v7x-sized) fallback
    # v7x: 64 MiB VMEM per TC and 2 TCs/chip; v5e/v6e: 128 MiB VMEM, single TC.
    if vmem_cap <= 64 * 1024 * 1024:
        return 40 * 1024 * 1024, 2
    return 96 * 1024 * 1024, 1


def eeg_depth_attention(x, conv_weight, conv_bias, k):
    """x: (N, D, C, W); conv_weight: (1, 1, k, 1); conv_bias: (1,) (no-op under softmax)."""
    N, D, C, W = x.shape
    if k % 2 != 1:
        # Conv2d(..., padding=(k//2, 0)) only preserves the depth size for odd k.
        raise ValueError("EEGDepthAttention kernel requires an odd kernel size k")
    del conv_bias  # constant shift before the depth softmax: exact no-op.

    DC = D * C
    x3 = x.reshape(N, DC, W)                         # free row-major merge of (D, C)
    # Fold the 1/C channel mean into the conv taps (the pool feeds the conv linearly).
    taps = (conv_weight.reshape(k) / float(C)).astype(jnp.float32)

    itemsize = jnp.dtype(x.dtype).itemsize
    vmem_limit, num_tc = _tpu_vmem_and_cores()

    # --- W tiling: lane-dense 128-multiple tiles; full W when it is small. ---
    if W % 128 == 0:
        tw = min(W, 512)
    elif W > 512:
        tw = 512      # ragged last block -> masked tail stores only; bulk stays dense
    else:
        tw = W        # full-dim block is exempt from the 128-multiple rule
    nw = pl.cdiv(W, tw)

    # --- TN: batch examples per step for large DMA slabs, bounded by VMEM. ---
    per_n = DC * tw * itemsize                       # one example's slab at this W tile
    # ~6x per slab: double-buffered input + output blocks plus the f32 intermediates.
    budget = (vmem_limit * 3) // 4
    tn = max(1, min(N, budget // (6 * per_n)))
    # Keep per-step slabs <= ~8 MiB so the pipeline has enough steps to hide DMA.
    tn = max(1, min(tn, max(1, (8 * 1024 * 1024) // per_n)))
    if num_tc > 1 and N > 1:
        # v7x: best-effort even step count on the leading "parallel" axis so both
        # TensorCores get balanced work.
        steps = pl.cdiv(N, tn)
        if steps % 2 == 1:
            tn = pl.cdiv(N, steps + 1)
    grid = (pl.cdiv(N, tn), nw)

    cost = pl.CostEstimate(
        flops=int(2 * N * DC * W + (2 * k + 6) * N * D * W),
        transcendentals=int(N * D * W),
        bytes_accessed=int(2 * N * DC * W * itemsize),
    )

    kernel = functools.partial(_eeg_depth_attention_kernel, C=C)
    out3 = pl.pallas_call(
        kernel,
        out_shape=jax.ShapeDtypeStruct((N, DC, W), x.dtype),
        grid=grid,
        in_specs=[
            pl.BlockSpec((tn, DC, tw), lambda n, w: (n, 0, w)),
            pl.BlockSpec(memory_space=pltpu.MemorySpace.SMEM),
        ],
        out_specs=pl.BlockSpec((tn, DC, tw), lambda n, w: (n, 0, w)),
        compiler_params=pltpu.CompilerParams(
            dimension_semantics=("parallel", "parallel"),
            vmem_limit_bytes=int(vmem_limit),
        ),
        cost_estimate=cost,
    )(x3, taps)
    return out3.reshape(N, D, C, W)


def _reference(x, conv_weight, conv_bias, k):
    """Pure-JAX reference mirroring the PyTorch forward (bias included)."""
    N, D, C, W = x.shape
    pad = k // 2
    taps = conv_weight.reshape(k)
    pool = jnp.mean(x, axis=2)                                    # (N, D, W)
    pool_p = jnp.pad(pool, ((0, 0), (pad, pad), (0, 0)))
    y = sum(taps[t] * pool_p[:, t:t + D, :] for t in range(k)) + conv_bias.reshape(())
    s = jax.nn.softmax(y, axis=1)                                 # softmax over depth
    return s[:, :, None, :] * C * x


if __name__ == "__main__":
    # Small shapes consistent with the module: batch=8, depth=8, EEG channels=4,
    # time samples=1024 (exercises both the TN batching and the W-tiling grid axis), k=7.
    N, D, C, W, k = 8, 8, 4, 1024, 7

    key = jax.random.PRNGKey(0)
    kx, kw, kb = jax.random.split(key, 3)
    x = jax.random.normal(kx, (N, D, C, W), dtype=jnp.float32)
    conv_weight = 0.3 * jax.random.normal(kw, (1, 1, k, 1), dtype=jnp.float32)
    conv_bias = 0.1 * jax.random.normal(kb, (1,), dtype=jnp.float32)

    out = jax.block_until_ready(eeg_depth_attention(x, conv_weight, conv_bias, k))
    ref = _reference(x, conv_weight, conv_bias, k)

    assert out.shape == (N, D, C, W)
    # Exact softmax normalization inside the kernel -> tight tolerance.
    assert jnp.allclose(out, ref, atol=1e-4, rtol=1e-4), "mismatch vs reference"

    print("KERNEL_OK")
</pallas_src>

<mosaic_0001>
module attributes {stable_mosaic.version = 11 : i64} {
  func.func @_eeg_depth_attention_kernel(%arg0: i32, %arg1: i32, %arg2: memref<4x32x512xf32, #tpu.memory_space<vmem>>, %arg3: memref<7xf32, #tpu.memory_space<smem>>, %arg4: memref<4x32x512xf32, #tpu.memory_space<vmem>>) attributes {dimension_semantics = [#tpu.dimension_semantics<parallel>, #tpu.dimension_semantics<parallel>], iteration_bounds = array<i64: 2, 2>, scalar_prefetch = 0 : i64, scratch_operands = 0 : i64, tpu.core_type = #tpu.core_type<tc>, window_params = [{transform_indices = @transform_0, window_bounds = array<i64: 4, 32, 512>}, {transform_indices = @transform_1, window_bounds = array<i64: 7>}, {transform_indices = @transform_2, window_bounds = array<i64: 4, 32, 512>}]} {
    %c0 = arith.constant 0 : index
    %c0_0 = arith.constant 0 : index
    %c0_1 = arith.constant 0 : index
    %0 = vector.load %arg2[%c0, %c0_0, %c0_1] : memref<4x32x512xf32, #tpu.memory_space<vmem>>, vector<4x4x512xf32>
    %cst = arith.constant dense<0.000000e+00> : vector<4x512xf32>
    %1 = vector.multi_reduction <add>, %0, %cst [1] : vector<4x4x512xf32> to vector<4x512xf32>
    %2 = vector.shape_cast %1 : vector<4x512xf32> to vector<4x1x512xf32>
    %c0_2 = arith.constant 0 : index
    %c4 = arith.constant 4 : index
    %c0_3 = arith.constant 0 : index
    %3 = vector.load %arg2[%c0_2, %c4, %c0_3] : memref<4x32x512xf32, #tpu.memory_space<vmem>>, vector<4x4x512xf32>
    %cst_4 = arith.constant dense<0.000000e+00> : vector<4x512xf32>
    %4 = vector.multi_reduction <add>, %3, %cst_4 [1] : vector<4x4x512xf32> to vector<4x512xf32>
    %5 = vector.shape_cast %4 : vector<4x512xf32> to vector<4x1x512xf32>
    %c0_5 = arith.constant 0 : index
    %c8 = arith.constant 8 : index
    %c0_6 = arith.constant 0 : index
    %6 = vector.load %arg2[%c0_5, %c8, %c0_6] : memref<4x32x512xf32, #tpu.memory_space<vmem>>, vector<4x4x512xf32>
    %cst_7 = arith.constant dense<0.000000e+00> : vector<4x512xf32>
    %7 = vector.multi_reduction <add>, %6, %cst_7 [1] : vector<4x4x512xf32> to vector<4x512xf32>
    %8 = vector.shape_cast %7 : vector<4x512xf32> to vector<4x1x512xf32>
    %c0_8 = arith.constant 0 : index
    %c12 = arith.constant 12 : index
    %c0_9 = arith.constant 0 : index
    %9 = vector.load %arg2[%c0_8, %c12, %c0_9] : memref<4x32x512xf32, #tpu.memory_space<vmem>>, vector<4x4x512xf32>
    %cst_10 = arith.constant dense<0.000000e+00> : vector<4x512xf32>
    %10 = vector.multi_reduction <add>, %9, %cst_10 [1] : vector<4x4x512xf32> to vector<4x512xf32>
    %11 = vector.shape_cast %10 : vector<4x512xf32> to vector<4x1x512xf32>
    %c0_11 = arith.constant 0 : index
    %c16 = arith.constant 16 : index
    %c0_12 = arith.constant 0 : index
    %12 = vector.load %arg2[%c0_11, %c16, %c0_12] : memref<4x32x512xf32, #tpu.memory_space<vmem>>, vector<4x4x512xf32>
    %cst_13 = arith.constant dense<0.000000e+00> : vector<4x512xf32>
    %13 = vector.multi_reduction <add>, %12, %cst_13 [1] : vector<4x4x512xf32> to vector<4x512xf32>
    %14 = vector.shape_cast %13 : vector<4x512xf32> to vector<4x1x512xf32>
    %c0_14 = arith.constant 0 : index
    %c20 = arith.constant 20 : index
    %c0_15 = arith.constant 0 : index
    %15 = vector.load %arg2[%c0_14, %c20, %c0_15] : memref<4x32x512xf32, #tpu.memory_space<vmem>>, vector<4x4x512xf32>
    %cst_16 = arith.constant dense<0.000000e+00> : vector<4x512xf32>
    %16 = vector.multi_reduction <add>, %15, %cst_16 [1] : vector<4x4x512xf32> to vector<4x512xf32>
    %17 = vector.shape_cast %16 : vector<4x512xf32> to vector<4x1x512xf32>
    %c0_17 = arith.constant 0 : index
    %c24 = arith.constant 24 : index
    %c0_18 = arith.constant 0 : index
    %18 = vector.load %arg2[%c0_17, %c24, %c0_18] : memref<4x32x512xf32, #tpu.memory_space<vmem>>, vector<4x4x512xf32>
    %cst_19 = arith.constant dense<0.000000e+00> : vector<4x512xf32>
    %19 = vector.multi_reduction <add>, %18, %cst_19 [1] : vector<4x4x512xf32> to vector<4x512xf32>
    %20 = vector.shape_cast %19 : vector<4x512xf32> to vector<4x1x512xf32>
    %c0_20 = arith.constant 0 : index
    %c28 = arith.constant 28 : index
    %c0_21 = arith.constant 0 : index
    %21 = vector.load %arg2[%c0_20, %c28, %c0_21] : memref<4x32x512xf32, #tpu.memory_space<vmem>>, vector<4x4x512xf32>
    %cst_22 = arith.constant dense<0.000000e+00> : vector<4x512xf32>
    %22 = vector.multi_reduction <add>, %21, %cst_22 [1] : vector<4x4x512xf32> to vector<4x512xf32>
    %23 = vector.shape_cast %22 : vector<4x512xf32> to vector<4x1x512xf32>
    %cst_23 = arith.constant 0.000000e+00 : f32
    %24 = vector.broadcast %cst_23 : f32 to vector<4x3x512xf32>
    %25 = tpu.concatenate %24, %2, %5, %8, %11, %14, %17, %20, %23, %24 in 1 : vector<4x3x512xf32>, vector<4x1x512xf32>, vector<4x1x512xf32>, vector<4x1x512xf32>, vector<4x1x512xf32>, vector<4x1x512xf32>, vector<4x1x512xf32>, vector<4x1x512xf32>, vector<4x1x512xf32>, vector<4x3x512xf32> -> vector<4x14x512xf32>
    %c0_24 = arith.constant 0 : index
    %26 = memref.load %arg3[%c0_24] : memref<7xf32, #tpu.memory_space<smem>>
    %27 = vector.extract_strided_slice %25 {offsets = [0, 0, 0], sizes = [4, 8, 512], strides = [1, 1, 1]} : vector<4x14x512xf32> to vector<4x8x512xf32>
    %28 = vector.broadcast %26 : f32 to vector<4x8x512xf32>
    %29 = arith.mulf %28, %27 : vector<4x8x512xf32>
    %c1 = arith.constant 1 : index
    %30 = memref.load %arg3[%c1] : memref<7xf32, #tpu.memory_space<smem>>
    %31 = vector.extract_strided_slice %25 {offsets = [0, 1, 0], sizes = [4, 8, 512], strides = [1, 1, 1]} : vector<4x14x512xf32> to vector<4x8x512xf32>
    %32 = vector.broadcast %30 : f32 to vector<4x8x512xf32>
    %33 = arith.mulf %32, %31 : vector<4x8x512xf32>
    %34 = arith.addf %29, %33 : vector<4x8x512xf32>
    %c2 = arith.constant 2 : index
    %35 = memref.load %arg3[%c2] : memref<7xf32, #tpu.memory_space<smem>>
    %36 = vector.extract_strided_slice %25 {offsets = [0, 2, 0], sizes = [4, 8, 512], strides = [1, 1, 1]} : vector<4x14x512xf32> to vector<4x8x512xf32>
    %37 = vector.broadcast %35 : f32 to vector<4x8x512xf32>
    %38 = arith.mulf %37, %36 : vector<4x8x512xf32>
    %39 = arith.addf %34, %38 : vector<4x8x512xf32>
    %c3 = arith.constant 3 : index
    %40 = memref.load %arg3[%c3] : memref<7xf32, #tpu.memory_space<smem>>
    %41 = vector.extract_strided_slice %25 {offsets = [0, 3, 0], sizes = [4, 8, 512], strides = [1, 1, 1]} : vector<4x14x512xf32> to vector<4x8x512xf32>
    %42 = vector.broadcast %40 : f32 to vector<4x8x512xf32>
    %43 = arith.mulf %42, %41 : vector<4x8x512xf32>
    %44 = arith.addf %39, %43 : vector<4x8x512xf32>
    %c4_25 = arith.constant 4 : index
    %45 = memref.load %arg3[%c4_25] : memref<7xf32, #tpu.memory_space<smem>>
    %46 = vector.extract_strided_slice %25 {offsets = [0, 4, 0], sizes = [4, 8, 512], strides = [1, 1, 1]} : vector<4x14x512xf32> to vector<4x8x512xf32>
    %47 = vector.broadcast %45 : f32 to vector<4x8x512xf32>
    %48 = arith.mulf %47, %46 : vector<4x8x512xf32>
    %49 = arith.addf %44, %48 : vector<4x8x512xf32>
    %c5 = arith.constant 5 : index
    %50 = memref.load %arg3[%c5] : memref<7xf32, #tpu.memory_space<smem>>
    %51 = vector.extract_strided_slice %25 {offsets = [0, 5, 0], sizes = [4, 8, 512], strides = [1, 1, 1]} : vector<4x14x512xf32> to vector<4x8x512xf32>
    %52 = vector.broadcast %50 : f32 to vector<4x8x512xf32>
    %53 = arith.mulf %52, %51 : vector<4x8x512xf32>
    %54 = arith.addf %49, %53 : vector<4x8x512xf32>
    %c6 = arith.constant 6 : index
    %55 = memref.load %arg3[%c6] : memref<7xf32, #tpu.memory_space<smem>>
    %56 = vector.extract_strided_slice %25 {offsets = [0, 6, 0], sizes = [4, 8, 512], strides = [1, 1, 1]} : vector<4x14x512xf32> to vector<4x8x512xf32>
    %57 = vector.broadcast %55 : f32 to vector<4x8x512xf32>
    %58 = arith.mulf %57, %56 : vector<4x8x512xf32>
    %59 = arith.addf %54, %58 : vector<4x8x512xf32>
    %cst_26 = arith.constant dense<0xFF800000> : vector<4x512xf32>
    %60 = vector.multi_reduction <maximumf>, %59, %cst_26 [1] : vector<4x8x512xf32> to vector<4x512xf32>
    %61 = vector.shape_cast %60 : vector<4x512xf32> to vector<4x1x512xf32>
    %62 = vector.broadcast %61 : vector<4x1x512xf32> to vector<4x8x512xf32>
    %63 = arith.subf %59, %62 : vector<4x8x512xf32>
    %64 = math.exp %63 : vector<4x8x512xf32>
    %cst_27 = arith.constant dense<0.000000e+00> : vector<4x512xf32>
    %65 = vector.multi_reduction <add>, %64, %cst_27 [1] : vector<4x8x512xf32> to vector<4x512xf32>
    %66 = vector.shape_cast %65 : vector<4x512xf32> to vector<4x1x512xf32>
    %cst_28 = arith.constant 4.000000e+00 : f32
    %67 = vector.broadcast %cst_28 : f32 to vector<4x1x512xf32>
    %68 = arith.divf %67, %66 : vector<4x1x512xf32>
    %69 = vector.broadcast %68 : vector<4x1x512xf32> to vector<4x8x512xf32>
    %70 = arith.mulf %64, %69 : vector<4x8x512xf32>
    %c0_29 = arith.constant 0 : index
    %c0_30 = arith.constant 0 : index
    %c0_31 = arith.constant 0 : index
    %71 = vector.load %arg2[%c0_29, %c0_30, %c0_31] : memref<4x32x512xf32, #tpu.memory_space<vmem>>, vector<4x4x512xf32>
    %72 = vector.extract_strided_slice %70 {offsets = [0, 0, 0], sizes = [4, 1, 512], strides = [1, 1, 1]} : vector<4x8x512xf32> to vector<4x1x512xf32>
    %73 = vector.broadcast %72 : vector<4x1x512xf32> to vector<4x4x512xf32>
    %74 = arith.mulf %71, %73 : vector<4x4x512xf32>
    %c0_32 = arith.constant 0 : index
    %c0_33 = arith.constant 0 : index
    %c0_34 = arith.constant 0 : index
    %75 = vector.load %arg4[%c0_32, %c0_33, %c0_34] : memref<4x32x512xf32, #tpu.memory_space<vmem>>, vector<4x4x512xf32>
    tpu.vector_store %arg4[%c0_32, %c0_33, %c0_34], %74 {strides = array<i32>} : memref<4x32x512xf32, #tpu.memory_space<vmem>>, vector<4x4x512xf32>,
    %c0_35 = arith.constant 0 : index
    %c4_36 = arith.constant 4 : index
    %c0_37 = arith.constant 0 : index
    %76 = vector.load %arg2[%c0_35, %c4_36, %c0_37] : memref<4x32x512xf32, #tpu.memory_space<vmem>>, vector<4x4x512xf32>
    %77 = vector.extract_strided_slice %70 {offsets = [0, 1, 0], sizes = [4, 1, 512], strides = [1, 1, 1]} : vector<4x8x512xf32> to vector<4x1x512xf32>
    %78 = vector.broadcast %77 : vector<4x1x512xf32> to vector<4x4x512xf32>
    %79 = arith.mulf %76, %78 : vector<4x4x512xf32>
    %c0_38 = arith.constant 0 : index
    %c4_39 = arith.constant 4 : index
    %c0_40 = arith.constant 0 : index
    %80 = vector.load %arg4[%c0_38, %c4_39, %c0_40] : memref<4x32x512xf32, #tpu.memory_space<vmem>>, vector<4x4x512xf32>
    tpu.vector_store %arg4[%c0_38, %c4_39, %c0_40], %79 {strides = array<i32>} : memref<4x32x512xf32, #tpu.memory_space<vmem>>, vector<4x4x512xf32>,
    %c0_41 = arith.constant 0 : index
    %c8_42 = arith.constant 8 : index
    %c0_43 = arith.constant 0 : index
    %81 = vector.load %arg2[%c0_41, %c8_42, %c0_43] : memref<4x32x512xf32, #tpu.memory_space<vmem>>, vector<4x4x512xf32>
    %82 = vector.extract_strided_slice %70 {offsets = [0, 2, 0], sizes = [4, 1, 512], strides = [1, 1, 1]} : vector<4x8x512xf32> to vector<4x1x512xf32>
    %83 = vector.broadcast %82 : vector<4x1x512xf32> to vector<4x4x512xf32>
    %84 = arith.mulf %81, %83 : vector<4x4x512xf32>
    %c0_44 = arith.constant 0 : index
    %c8_45 = arith.constant 8 : index
    %c0_46 = arith.constant 0 : index
    %85 = vector.load %arg4[%c0_44, %c8_45, %c0_46] : memref<4x32x512xf32, #tpu.memory_space<vmem>>, vector<4x4x512xf32>
    tpu.vector_store %arg4[%c0_44, %c8_45, %c0_46], %84 {strides = array<i32>} : memref<4x32x512xf32, #tpu.memory_space<vmem>>, vector<4x4x512xf32>,
    %c0_47 = arith.constant 0 : index
    %c12_48 = arith.constant 12 : index
    %c0_49 = arith.constant 0 : index
    %86 = vector.load %arg2[%c0_47, %c12_48, %c0_49] : memref<4x32x512xf32, #tpu.memory_space<vmem>>, vector<4x4x512xf32>
    %87 = vector.extract_strided_slice %70 {offsets = [0, 3, 0], sizes = [4, 1, 512], strides = [1, 1, 1]} : vector<4x8x512xf32> to vector<4x1x512xf32>
    %88 = vector.broadcast %87 : vector<4x1x512xf32> to vector<4x4x512xf32>
    %89 = arith.mulf %86, %88 : vector<4x4x512xf32>
    %c0_50 = arith.constant 0 : index
    %c12_51 = arith.constant 12 : index
    %c0_52 = arith.constant 0 : index
    %90 = vector.load %arg4[%c0_50, %c12_51, %c0_52] : memref<4x32x512xf32, #tpu.memory_space<vmem>>, vector<4x4x512xf32>
    tpu.vector_store %arg4[%c0_50, %c12_51, %c0_52], %89 {strides = array<i32>} : memref<4x32x512xf32, #tpu.memory_space<vmem>>, vector<4x4x512xf32>,
    %c0_53 = arith.constant 0 : index
    %c16_54 = arith.constant 16 : index
    %c0_55 = arith.constant 0 : index
    %91 = vector.load %arg2[%c0_53, %c16_54, %c0_55] : memref<4x32x512xf32, #tpu.memory_space<vmem>>, vector<4x4x512xf32>
    %92 = vector.extract_strided_slice %70 {offsets = [0, 4, 0], sizes = [4, 1, 512], strides = [1, 1, 1]} : vector<4x8x512xf32> to vector<4x1x512xf32>
    %93 = vector.broadcast %92 : vector<4x1x512xf32> to vector<4x4x512xf32>
    %94 = arith.mulf %91, %93 : vector<4x4x512xf32>
    %c0_56 = arith.constant 0 : index
    %c16_57 = arith.constant 16 : index
    %c0_58 = arith.constant 0 : index
    %95 = vector.load %arg4[%c0_56, %c16_57, %c0_58] : memref<4x32x512xf32, #tpu.memory_space<vmem>>, vector<4x4x512xf32>
    tpu.vector_store %arg4[%c0_56, %c16_57, %c0_58], %94 {strides = array<i32>} : memref<4x32x512xf32, #tpu.memory_space<vmem>>, vector<4x4x512xf32>,
    %c0_59 = arith.constant 0 : index
    %c20_60 = arith.constant 20 : index
    %c0_61 = arith.constant 0 : index
    %96 = vector.load %arg2[%c0_59, %c20_60, %c0_61] : memref<4x32x512xf32, #tpu.memory_space<vmem>>, vector<4x4x512xf32>
    %97 = vector.extract_strided_slice %70 {offsets = [0, 5, 0], sizes = [4, 1, 512], strides = [1, 1, 1]} : vector<4x8x512xf32> to vector<4x1x512xf32>
    %98 = vector.broadcast %97 : vector<4x1x512xf32> to vector<4x4x512xf32>
    %99 = arith.mulf %96, %98 : vector<4x4x512xf32>
    %c0_62 = arith.constant 0 : index
    %c20_63 = arith.constant 20 : index
    %c0_64 = arith.constant 0 : index
    %100 = vector.load %arg4[%c0_62, %c20_63, %c0_64] : memref<4x32x512xf32, #tpu.memory_space<vmem>>, vector<4x4x512xf32>
    tpu.vector_store %arg4[%c0_62, %c20_63, %c0_64], %99 {strides = array<i32>} : memref<4x32x512xf32, #tpu.memory_space<vmem>>, vector<4x4x512xf32>,
    %c0_65 = arith.constant 0 : index
    %c24_66 = arith.constant 24 : index
    %c0_67 = arith.constant 0 : index
    %101 = vector.load %arg2[%c0_65, %c24_66, %c0_67] : memref<4x32x512xf32, #tpu.memory_space<vmem>>, vector<4x4x512xf32>
    %102 = vector.extract_strided_slice %70 {offsets = [0, 6, 0], sizes = [4, 1, 512], strides = [1, 1, 1]} : vector<4x8x512xf32> to vector<4x1x512xf32>
    %103 = vector.broadcast %102 : vector<4x1x512xf32> to vector<4x4x512xf32>
    %104 = arith.mulf %101, %103 : vector<4x4x512xf32>
    %c0_68 = arith.constant 0 : index
    %c24_69 = arith.constant 24 : index
    %c0_70 = arith.constant 0 : index
    %105 = vector.load %arg4[%c0_68, %c24_69, %c0_70] : memref<4x32x512xf32, #tpu.memory_space<vmem>>, vector<4x4x512xf32>
    tpu.vector_store %arg4[%c0_68, %c24_69, %c0_70], %104 {strides = array<i32>} : memref<4x32x512xf32, #tpu.memory_space<vmem>>, vector<4x4x512xf32>,
    %c0_71 = arith.constant 0 : index
    %c28_72 = arith.constant 28 : index
    %c0_73 = arith.constant 0 : index
    %106 = vector.load %arg2[%c0_71, %c28_72, %c0_73] : memref<4x32x512xf32, #tpu.memory_space<vmem>>, vector<4x4x512xf32>
    %107 = vector.extract_strided_slice %70 {offsets = [0, 7, 0], sizes = [4, 1, 512], strides = [1, 1, 1]} : vector<4x8x512xf32> to vector<4x1x512xf32>
    %108 = vector.broadcast %107 : vector<4x1x512xf32> to vector<4x4x512xf32>
    %109 = arith.mulf %106, %108 : vector<4x4x512xf32>
    %c0_74 = arith.constant 0 : index
    %c28_75 = arith.constant 28 : index
    %c0_76 = arith.constant 0 : index
    %110 = vector.load %arg4[%c0_74, %c28_75, %c0_76] : memref<4x32x512xf32, #tpu.memory_space<vmem>>, vector<4x4x512xf32>
    tpu.vector_store %arg4[%c0_74, %c28_75, %c0_76], %109 {strides = array<i32>} : memref<4x32x512xf32, #tpu.memory_space<vmem>>, vector<4x4x512xf32>,
    return
  }
  func.func @transform_0(%arg0: i32, %arg1: i32) -> (i32, i32, i32) {
    %c0_i32 = arith.constant 0 : i32
    %c0_i32_0 = arith.constant 0 : i32
    return %arg0, %c0_i32, %arg1 : i32, i32, i32
  }
  func.func @transform_1(%arg0: i32, %arg1: i32) -> i32 {
    %c0_i32 = arith.constant 0 : i32
    %c0_i32_0 = arith.constant 0 : i32
    return %c0_i32 : i32
  }
  func.func @transform_2(%arg0: i32, %arg1: i32) -> (i32, i32, i32) {
    %c0_i32 = arith.constant 0 : i32
    %c0_i32_0 = arith.constant 0 : i32
    return %arg0, %c0_i32, %arg1 : i32, i32, i32
  }
}

</mosaic_0001>

<bundles_post_ra>
// kernel: tpu_custom_call.1
= control target key start
LH: loop header
LB: loop body
LE: loop exit
PB: predicated region body
PF: predicated region fallthrough
CT: control target
= control target key end

     0   :  { %s5796_s0 = inlined_call_operand.hbm [shape: f32[8,32,1024], index: 0, kind: input, shape index: {}]   ;;  %s5797_s1 = inlined_call_operand.vmem [shape: f32[7], index: 1, kind: input, shape index: {}]   ;;  %s5798_s2 = inlined_call_operand.hbm [shape: f32[8,32,1024], index: 2, kind: output, shape index: {}]  }
   0x1   :  { %5808 = sst [smem:[#allocation16_spill]] %s5797_s1 }
   0x2   :  { %7 = vsyncpa [#allocation3], 0 }
   0x3   :  { %9 = vsyncpa [#allocation3 + $0x1], 0 }
   0x4   :  { %10 = vsyncpa [#allocation5], 0 }
   0x5   :  { %11 = vsyncpa [#allocation4], 0 }
   0x6   :  { %13 = vsyncpa [#allocation4 + $0x1], 0  ;;  %s4102_s9 = smov 0   ;;  %s4104_s10 = smov 0  }
   0x7   :  { %s4106_s11 = smov 0   ;;  %s4108_s12 = smov 0  }
   0x8   :  { %s4110_s13 = smov 0   ;;  %s4112_s14 = smov 0  }
   0x9   :  { %s4114_s15 = smov 0   ;;  %s4116_s16 = smov 0  }
   0xa LB: > { %5809 = sst [smem:[#allocation11_spill]] %s4048_s9  ;;  %s3731_s17 = sadd.s32 4294967295, %s4076_s16   ;;  %s4076_s16 = sphi %s4116_s16, %s19_s16   ;;  %s4072_s15 = sphi %s4114_s15, %s5836_s15   ;;  %s4068_s14 = sphi %s4112_s14, %s5835_s14   ;;  %s4064_s13 = sphi %s4110_s13, %s5834_s13   ;;  %s4060_s12 = sphi %s4108_s12, %s5829_s12   ;;  %s4056_s11 = sphi %s4106_s11, %s5833_s11   ;;  %s4052_s10 = sphi %s4104_s10, %s5832_s10   ;;  %s4048_s9 = sphi %s4102_s9, %s5831_s9  }
   0xb   : > { %5810 = sst [smem:[#allocation12_spill]] %s4068_s14  ;;  %s3732_s18 = sadd.s32 4294967294, %s4076_s16  }
   0xc   : > { %5811 = sst [smem:[#allocation13_spill]] %s4076_s16  ;;  %p47_p0 = scmp.ne.s32.totalorder %s4056_s11, %s4052_s10 }
   0xd   : > { %p48_p1 = scmp.eq.s32.totalorder %s4076_s16, 0  ;;  %p53_p2 = scmp.ne.s32.totalorder %s4052_s10, %s4048_s9 }
   0xe   : > { %p4150_p3 = scmp.eq.s32.totalorder %s3731_s17, 0  ;;  %p100_p4 = scmp.eq.s32.totalorder %s3731_s17, 3 }
   0xf   : > { %p49_p5 = por %p48_p1, %p47_p0  ;;  %p106_p6 = scmp.eq.s32.totalorder %s3732_s18, 3 }
  0x10   : > { %p4156_p7 = por %p4150_p3, %p53_p2  ;;  %p4160_p8 = por %p100_p4, %p47_p0 }
  0x11   : > { %p4164_p9 = por %p106_p6, %p53_p2  ;;  %p3733_p10 = scmp.ge.s32.totalorder %s4076_s16, 1 }
  0x12   : > { %s5813_s21 = scalar_select %p4156_p7, 1, 0 }
  0x13   : > { %s5814_s22 = scalar_select %p4160_p8, 1, 0 }
  0x14   : > { %s5815_s23 = scalar_select %p4164_p9, 1, 0 }
  0x15   : > { %p113_p11 = scmp.lt.s32.totalorder %s4076_s16, 5  ;;  %s5817_s1 = sld [smem:[#allocation16_spill]] }
  0x16   : > { %5816 = sst [smem:[#allocation14_spill]] %s5815_s23  ;;  %p3781_p13 = scmp.lt.s32.totalorder %s4076_s16, 4 }
  0x17   : > { %p4173_p12 = pnand %p3733_p10, %p113_p11  ;;  %s28_s29 = sadd.s32 1, %s4068_s14 }
  0x18   : > { %p4180_p1 = pnand %p3781_p13, %p49_p5 }
  0x19   : > { %s5818_s27 = scalar_select %p4173_p12, 1, 0 }
  0x1a   : > { %p3768_p0 = pneg %p4173_p12 }
  0x1b   : > { %s126_s26 = sshll.u32 %s5817_s1, 4  ;;  %s127_s26 = int_to_ptr.vmem [resolvable:$true] %s126_s26 }
  0x1c   : > { %p3769_p2 = pnand %p3768_p0, %p4150_p3  ;;  %s3933_s30 = scalar_lea.vmem %s127_s26, 16 }
  0x1d   : > { %p3934_p4 = scmp.ne.s32.totalorder %s127_s26, %s3933_s30  ;;  %p3941_p11 = scmp.lt.s32.totalorder %s127_s26, %s127_s26 }
  0x1e   : > { %p3935_p6 = pneg %p3769_p2  ;;  %p3942_p8 = scmp.lt.s32.totalorder %s3933_s30, %s3933_s30 }
  0x20   : > { %p3936_p9 = pnand %p3935_p6, %p3934_p4  ;;  %p3943_p7 = por %p3942_p8, %p3941_p11 }
  0x22   : > { %p3937_p10 = pneg %p3936_p9 }
  0x24   : > { %p3944_p12 = pnand %p3943_p7, %p3937_p10 }
  0x26   : > { %3947 = shalt.err (!%p3944_p12)
}
  0x27   : > { %s4078_s3 = smov [#allocation6]   ;;  %p29_p5 = scmp.ge.s32.totalorder %s28_s29, 2 }
  0x28   : > { %3771 = dma.vmem_to_smem (!%p3769_p2), %s127_s26, 16, %s4078_s3, [#allocation5]  }
  0x29   : > { %s31_s4 = sadd.s32 1, %s4072_s15  ;;  %s137_s5 = sand.u32 1, %s4056_s11  }
  0x2a   : > { %s3738_s6 = sshll.u32 %s4068_s14, 2  ;;  %s5838_s29 = smov (%p29_p5, %s28_s29), 0 }
  0x2b   : > { %5820 = sst [smem:[#allocation15_spill]] %s5838_s29  ;;  %s5840_s4 = smov (!%p29_p5, %s31_s4), %s4072_s15 }
  0x2c   : > { %s36_s7 = ssub.s32 %s4068_s14, %s5838_s29  ;;  %p33_p7 = scmp.ge.s32.totalorder %s5840_s4, 2 }
  0x2d   : > { %s3736_s8 = sshll.u32 %s137_s5, 9  ;;  %s3758_s17 = sshll.u32 %s4072_s15, 7 }
  0x2e   : > { %s5842_s4 = smov (%p33_p7, %s5840_s4), 0  ;;  %s148_s18 = sadd.s32 %s3758_s17, %s3738_s6 }
  0x2f   : > { %s141_s24 = scalar_lea.vmem [#allocation2], %s3736_s8  ;;  %s35_s26 = ssub.s32 %s4072_s15, %s5842_s4 }
  0x30   : > { %s151_s25 = sshll.u32 %s141_s24, 4  ;;  %s3740_s30 = sshll.u32 %s148_s18, 7  ;;  %s152_s25 = int_to_ptr.vmem [resolvable:$true] %s151_s25 }
  0x31   : > { %s37_s3 = sor.u32 %s36_s7, %s35_s26  ;;  %s150_s23 = scalar_lea.hbm %s5796_s0, %s3740_s30 }
  0x32   : > { %p38_p8 = scmp.eq.s32.totalorder %s37_s3, 0  ;;  %s5821_s29 = sadd.s32 1, %s4056_s11 }
  0x33   : > { %s138_s9 = scalar_lea.sflag [#allocation3], %s137_s5  ;;  %p3950_p9 = pneg %p4180_p1 }
  0x34   : > { %s4206_s14 = scalar_select %p38_p8, %s4056_s11, %s5821_s29  }
  0x35   : > { %s3961_s16 = scalar_lea.vmem %s152_s25, 8192  ;;  %s4079_s6 = smov [#allocation2]  }
  0x36   : > { %p3962_p12 = scmp.ne.s32.totalorder %s152_s25, %s3961_s16  ;;  %s3966_s8 = sshll.u32 %s4079_s6, 4  ;;  %s3967_s8 = int_to_ptr.vmem [resolvable:$false] %s3966_s8 }
  0x37   : > { %s3968_s7 = scalar_lea.vmem %s3967_s8, 16384  ;;  %p3969_p2 = scmp.lt.s32.totalorder %s152_s25, %s3967_s8 }
  0x38   : > { %p3964_p13 = pnand %p3962_p12, %p3950_p9  ;;  %p3970_p4 = scmp.lt.s32.totalorder %s3968_s7, %s3961_s16 }
  0x3a   : > { %p3965_p0 = pneg %p3964_p13  ;;  %p3971_p6 = por %p3970_p4, %p3969_p2 }
  0x3c   : > { %p3972_p10 = pnand %p3971_p6, %p3965_p0 }
  0x3e   : > { %3975 = shalt.err (!%p3972_p10)
}
  0x3f   : > { %s4080_s1 = smov 1024   ;;  %s4081_s19 = smov 512  }
  0x40   : > { %s4082_s29 = smov 32   ;;  %p5822_p11 = scmp.ne.s32.totalorder %s5818_s27, 0 }
  0x41   : > { %3775 = dma.hbm_to_vmem [thread:$0]  (!%p4180_p1), %s150_s23, 8192, %s152_s25, %s138_s9, %s4080_s1, %s4081_s19, %s4082_s29  }
  0x42   : > { %163 = sbr.rel (%p5822_p11) target bundleno = 676 (0x2a4), region = 28  ;;  %s4215_s5 = sand.u32 (!%p5822_p11), 1, %s4052_s10  }
  0x43   : > { %s3742_s16 = sshll.u32 (!%p5822_p11), %s4215_s5, 9  ;;  %s166_s17 = scalar_lea.sflag (!%p5822_p11), [#allocation3], %s4215_s5 }
  0x44   : > { %s4221_s18 = scalar_lea.vmem (!%p5822_p11), [#allocation2], %s3742_s16  ;;  %p5823_p5 = scmp.ne.s32.totalorder (!%p5822_p11), %s5813_s21, 0 }
  0x47   : > { %4035 = dma.done.wait (%p5823_p5), %s166_s17, 8192  }
  0x48   : > { %4037 = vsyncadd (%p5823_p5), %s166_s17, 4294959104 }
  0x49   : > { %4039 = dma.done.wait (%p4150_p3), [#allocation5], 16  }
  0x4a   : > { %4041 = vsyncadd (%p4150_p3), [#allocation5], 4294967280 }
  0x4b   : > { %178 = sfence }
  0x4c   : > { %v4232_v0 = vld [vmem:[%s4221_s18] sm:$0xf]  ;;  %vm215_vm0 = vcmask 1043456   ;;  %v328_v1 = vld [vmem:[%s4221_s18] sm:$0xf0]  ;;  %v2732_v10 = vlaneseq  ;;  %vm1416_vm1 = vcmask 1042432  }
  0x4d   : > { %v216_v2 = vsel %vm215_vm0, %v4232_v0, 0.0  ;;  %v360_v3 = vrot.slane %v328_v1, 4  ;;  %v504_v4 = vld [vmem:[%s4221_s18 + $0x20] sm:$0xf]  ;;  %v632_v5 = vld [vmem:[%s4221_s18 + $0x20] sm:$0xf0] }
  0x4e   : > { %v217_v6 = vrot.slane %v216_v2, 4  ;;  %v520_v7 = vsel %vm215_vm0, %v504_v4, 0.0  ;;  %v664_v8 = vrot.slane %v632_v5, 4  ;;  %v808_v9 = vld [vmem:[%s4221_s18 + $0x40] sm:$0xf]  ;;  %vm1449_vm2 = vcmask 1044480  }
  0x4f   : > { %v392_v11 = vsel %vm215_vm0, %v360_v3, 0.0  ;;  %v521_v12 = vrot.slane %v520_v7, 4  ;;  %v824_v13 = vsel %vm215_vm0, %v808_v9, 0.0  ;;  %v936_v14 = vld [vmem:[%s4221_s18 + $0x40] sm:$0xf0]  ;;  %s4249_s9 = sld [smem:[#allocation6]] }
  0x50   : > { %v218_v15 = vadd.f32 %v217_v6, %v216_v2  ;;  %v393_v16 = vrot.slane %v392_v11, 4  ;;  %v696_v17 = vsel %vm215_vm0, %v664_v8, 0.0  ;;  %v825_v18 = vrot.slane %v824_v13, 4  ;;  %v1112_v19 = vld [vmem:[%s4221_s18 + $0x60] sm:$0xf]  ;;  %s4252_s20 = sld [smem:[#allocation6 + $0x1]] }
  0x51   : > { %v522_v20 = vadd.f32 %v521_v12, %v520_v7  ;;  %v697_v21 = vrot.slane %v696_v17, 4  ;;  %v968_v22 = vrot.slane %v936_v14, 4  ;;  %v1128_v23 = vsel %vm215_vm0, %v1112_v19, 0.0  ;;  %v1240_v24 = vld [vmem:[%s4221_s18 + $0x60] sm:$0xf0]  ;;  %s4254_s21 = sld [smem:[#allocation6 + $0x2]] }
  0x52   : > { %v219_v25 = vrot.slane %v218_v15, 2  ;;  %v394_v26 = vadd.f32 %v393_v16, %v392_v11  ;;  %v826_v27 = vadd.f32 %v825_v18, %v824_v13  ;;  %v1129_v28 = vrot.slane %v1128_v23, 4  ;;  %s4256_s23 = sld [smem:[#allocation6 + $0x3]]  ;;  %s4455_s25 = scalar_lea.vmem [#allocation7], %s3742_s16 }
  0x53   : > { %v523_v29 = vrot.slane %v522_v20, 2  ;;  %v698_v30 = vadd.f32 %v697_v21, %v696_v17  ;;  %v1000_v31 = vsel %vm215_vm0, %v968_v22, 0.0  ;;  %v1272_v32 = vrot.slane %v1240_v24, 4  ;;  %s4258_s27 = sld [smem:[#allocation6 + $0x4]]  ;;  %s3753_s26 = sshll.u32 %s4060_s12, 2 }
  0x54   : > { %v220_v33 = vadd.f32 %v219_v25, %v218_v15  ;;  %v395_v34 = vrot.slane %v394_v26, 2  ;;  %v827_v35 = vrot.slane %v826_v27, 2  ;;  %v1001_v36 = vrot.slane %v1000_v31, 4  ;;  %s4260_s28 = sld [smem:[#allocation6 + $0x5]]  ;;  %s3759_s30 = sshll.u32 %s4064_s13, 7 }
  0x55   : > { %v524_v37 = vadd.f32 %v523_v29, %v522_v20  ;;  %v699_v38 = vrot.slane %v698_v30, 2  ;;  %v1130_v39 = vadd.f32 %v1129_v28, %v1128_v23  ;;  %v1304_v40 = vsel %vm215_vm0, %v1272_v32, 0.0  ;;  %s4263_s24 = sld [smem:[#allocation6 + $0x6]]  ;;  %s3626_s3 = sadd.s32 %s3759_s30, %s3753_s26 }
  0x56   : > { %v221_v41 = vrot.slane %v220_v33, 1  ;;  %v396_v42 = vadd.f32 %v395_v34, %v394_v26  ;;  %v828_v43 = vadd.f32 %v827_v35, %v826_v27  ;;  %v1002_v44 = vadd.f32 %v1001_v36, %v1000_v31  ;;  %s3755_s6 = sshll.u32 %s3626_s3, 7  ;;  %s3629_s8 = sshll.u32 %s4455_s25, 4  ;;  %s5729_s8 = int_to_ptr.vmem [resolvable:$true] %s3629_s8 }
  0x57   : > { %v525_v45 = vrot.slane %v524_v37, 1  ;;  %v700_v46 = vadd.f32 %v699_v38, %v698_v30  ;;  %v1131_v47 = vrot.slane %v1130_v39, 2  ;;  %v1305_v48 = vrot.slane %v1304_v40, 4  ;;  %s5735_s7 = scalar_lea.hbm %s5798_s2, %s3755_s6  ;;  %s3613_s1 = scalar_lea.sflag [#allocation4], %s4215_s5 }
  0x58   : > { %v222_v49 = vadd.f32 %v221_v41, %v220_v33  ;;  %v397_v50 = vrot.slane %v396_v42, 1  ;;  %v829_v51 = vrot.slane %v828_v43, 1  ;;  %v1003_v52 = vrot.slane %v1002_v44, 2  ;;  %s3976_s19 = scalar_lea.vmem %s5729_s8, 8192  ;;  %p5824_p1 = scmp.ne.s32.totalorder %s5814_s22, 0 }
  0x59   : > { %v526_v53 = vadd.f32 %v525_v45, %v524_v37  ;;  %v701_v54 = vrot.slane %v700_v46, 1  ;;  %v1132_v55 = vadd.f32 %v1131_v47, %v1130_v39  ;;  %v1306_v56 = vadd.f32 %v1305_v48, %v1304_v40  ;;  %v4308_v39 = vld [vmem:[%s4221_s18 + $0x8] sm:$0xf]  ;;  %p3977_p3 = scmp.ne.s32.totalorder %s5729_s8, %s3976_s19  ;;  %s4083_s29 = smov [#allocation7]  }
  0x5a   : > { %v398_v57 = vadd.f32 %v397_v50, %v396_v42  ;;  %v830_v58 = vadd.f32 %v829_v51, %v828_v43  ;;  %v1004_v59 = vadd.f32 %v1003_v52, %v1002_v44  ;;  %v1417_v60 = vsel %vm1416_vm1, 0.0, %v222_v49  ;;  %v505_v44 = vld [vmem:[%s4221_s18 + $0x28] sm:$0xf]  ;;  %v633_v49 = vld [vmem:[%s4221_s18 + $0x28] sm:$0xf0]  ;;  %s3980_s16 = sshll.u32 %s4083_s29, 4  ;;  %s3981_s16 = int_to_ptr.vmem [resolvable:$false] %s3980_s16 }
  0x5b   : > { %v702_v61 = vadd.f32 %v701_v54, %v700_v46  ;;  %v1133_v62 = vrot.slane %v1132_v55, 1  ;;  %v1307_v63 = vrot.slane %v1306_v56, 2  ;;  %vm1466_vm3 = vcmask 1045504   ;;  %v809_v54 = vld [vmem:[%s4221_s18 + $0x48] sm:$0xf]  ;;  %p3978_p7 = pnand %p3977_p3, %p5824_p1  ;;  %s3982_s17 = scalar_lea.vmem %s3981_s16, 16384 }
  0x5c   : > { %v1005_v1 = vrot.slane %v1004_v59, 1  ;;  %v1433_v2 = vsel %vm215_vm0, %v1417_v60, %v398_v57  ;;  %vm1483_vm4 = vcmask 1046528   ;;  %vm1500_vm5 = vcmask 1040384   ;;  %p3983_p9 = scmp.lt.s32.totalorder %s5729_s8, %s3981_s16  ;;  %p3984_p12 = scmp.lt.s32.totalorder %s3982_s17, %s3976_s19 }
  0x5d   : > { %v1134_v3 = vadd.f32 %v1133_v62, %v1132_v55  ;;  %v1308_v4 = vadd.f32 %v1307_v63, %v1306_v56  ;;  %v1450_v5 = vsel %vm1449_vm2, %v1433_v2, %v526_v53  ;;  %vm1517_vm6 = vcmask 1041408   ;;  %v937_v63 = vld [vmem:[%s4221_s18 + $0x48] sm:$0xf0]  ;;  %p3979_p8 = pneg %p3978_p7 }
  0x5e   : > { %v1006_v6 = vadd.f32 %v1005_v1, %v1004_v59  ;;  %v1467_v7 = vsel %vm1466_vm3, %v1450_v5, %v702_v61  ;;  %v4269_v8 = vstv %s4249_s9  ;;  %v4272_v9 = vstv %s4252_s20  ;;  %v1113_v1 = vld [vmem:[%s4221_s18 + $0x68] sm:$0xf]  ;;  %p3985_p13 = por %p3984_p12, %p3983_p9 }
  0x5f   : > { %v1309_v11 = vrot.slane %v1308_v4, 1  ;;  %v1484_v12 = vsel %vm1483_vm4, %v1467_v7, %v830_v58  ;;  %v4276_v13 = vstv %s4254_s21  ;;  %v4279_v14 = vstv %s4256_s23 }
  0x60   : > { %v1501_v15 = vsel %vm1500_vm5, %v1006_v6, %v1134_v3  ;;  %v1552_v16 = vmul.f32 %v4269_v8, %v1484_v12  ;;  %v1570_v17 = vmul.f32 %v4272_v9, %v1484_v12  ;;  %v1716_v18 = vmul.f32 %v4276_v13, %v1484_v12  ;;  %p3986_p0 = pnand %p3985_p13, %p3979_p8 }
  0x61   : > { %v1310_v19 = vadd.f32 %v1309_v11, %v1308_v4  ;;  %v1862_v20 = vmul.f32 %v4279_v14, %v1484_v12  ;;  %v4287_v21 = vstv %s4258_s27  ;;  %v4290_v22 = vstv %s4260_s28 }
  0x62   : > { %v1634_v23 = vrot.slane %v1570_v17, 1  ;;  %v1780_v24 = vrot.slane %v1716_v18, 2  ;;  %v2008_v25 = vmul.f32 %v4287_v21, %v1484_v12  ;;  %v2154_v26 = vmul.f32 %v4290_v22, %v1484_v12 }
  0x63   : > { %v1518_v27 = vsel %vm1517_vm6, %v1501_v15, %v1310_v19  ;;  %v1926_v28 = vrot.slane %v1862_v20, 3  ;;  %v4296_v29 = vstv %s4263_s24  ;;  %v4299_v30 = vshrl.u32 %v2732_v10, 7  ;;  %v329_v10 = vld [vmem:[%s4221_s18 + $0x8] sm:$0xf0] }
  0x64   : > { %v1534_v31 = vsel %vm1416_vm1, %v1518_v27, 0.0  ;;  %v2072_v32 = vrot.slane %v2008_v25, 4  ;;  %v2218_v33 = vrot.slane %v2154_v26, 5  ;;  %v2300_v34 = vmul.f32 %v4296_v29, %v1484_v12 }
  0x65   : > { %v1574_v35 = vmul.f32 %v4272_v9, %v1534_v31  ;;  %v1720_v36 = vmul.f32 %v4276_v13, %v1534_v31  ;;  %v1866_v37 = vmul.f32 %v4279_v14, %v1534_v31  ;;  %v2012_v38 = vmul.f32 %v4287_v21, %v1534_v31 }
  0x66   : > { %v2158_v40 = vmul.f32 %v4290_v22, %v1534_v31  ;;  %v2304_v41 = vmul.f32 %v4296_v29, %v1534_v31  ;;  %v2364_v42 = vrot.slane %v2300_v34, 6  ;;  %v4314_v43 = vsub.s32 0, %v4299_v30 }
  0x67   : > { %v1635_v45 = vrot.slane %v1574_v35, 1  ;;  %v1781_v46 = vrot.slane %v1720_v36, 2  ;;  %v1927_v47 = vrot.slane %v1866_v37, 3  ;;  %v2073_v48 = vrot.slane %v2012_v38, 4 }
  0x68   : > { %v2219_v50 = vrot.slane %v2158_v40, 5  ;;  %v2365_v51 = vrot.slane %v2304_v41, 6  ;;  %v223_v52 = vsel %vm215_vm0, %v4308_v39, 0.0  ;;  %v361_v53 = vrot.slane %v329_v10, 4 }
  0x69   : > { %v1636_v55 = vsel %vm1483_vm4, %v1634_v23, %v1635_v45  ;;  %v1782_v56 = vsel %vm1466_vm3, %v1780_v24, %v1781_v46  ;;  %v1928_v57 = vsel %vm1449_vm2, %v1926_v28, %v1927_v47  ;;  %v2074_v58 = vsel %vm215_vm0, %v2072_v32, %v2073_v48  ;;  %v1241_v48 = vld [vmem:[%s4221_s18 + $0x68] sm:$0xf0] }
  0x6a   : > { %v1698_v59 = vadd.f32 %v1636_v55, %v1552_v16  ;;  %v2220_v60 = vsel %vm1416_vm1, %v2218_v33, %v2219_v50  ;;  %v2366_v61 = vsel %vm1517_vm6, %v2364_v42, %v2365_v51  ;;  %v224_v62 = vrot.slane %v223_v52, 4 }
  0x6b   : > { %v399_v2 = vsel %vm215_vm0, %v361_v53, 0.0  ;;  %v527_v3 = vsel %vm215_vm0, %v505_v44, 0.0  ;;  %v665_v4 = vrot.slane %v633_v49, 4  ;;  %v831_v5 = vsel %vm215_vm0, %v809_v54, 0.0 }
  0x6c   : > { %v1844_v6 = vadd.f32 %v1782_v56, %v1698_v59  ;;  %v225_v7 = vadd.f32 %v224_v62, %v223_v52  ;;  %v400_v11 = vrot.slane %v399_v2, 4  ;;  %v528_v12 = vrot.slane %v527_v3, 4 }
  0x6d   : > { %v703_v15 = vsel %vm215_vm0, %v665_v4, 0.0  ;;  %v832_v16 = vrot.slane %v831_v5, 4  ;;  %v969_v17 = vrot.slane %v937_v63, 4  ;;  %v1135_v18 = vsel %vm215_vm0, %v1113_v1, 0.0 }
  0x6e   : > { %v1990_v19 = vadd.f32 %v1928_v57, %v1844_v6  ;;  %v226_v20 = vrot.slane %v225_v7, 2  ;;  %v401_v23 = vadd.f32 %v400_v11, %v399_v2  ;;  %v529_v24 = vadd.f32 %v528_v12, %v527_v3  ;;  %v201_v57 = vld [vmem:[%s4221_s18 + $0x10] sm:$0xf]  ;;  %v330_v3 = vld [vmem:[%s4221_s18 + $0x10] sm:$0xf0] }
  0x6f   : > { %v704_v25 = vrot.slane %v703_v15, 4  ;;  %v833_v26 = vadd.f32 %v832_v16, %v831_v5  ;;  %v1007_v27 = vsel %vm215_vm0, %v969_v17, 0.0  ;;  %v1136_v28 = vrot.slane %v1135_v18, 4  ;;  %v506_v11 = vld [vmem:[%s4221_s18 + $0x30] sm:$0xf] }
  0x70   : > { %v2136_v31 = vadd.f32 %v2074_v58, %v1990_v19  ;;  %v227_v32 = vadd.f32 %v226_v20, %v225_v7  ;;  %v402_v33 = vrot.slane %v401_v23, 2  ;;  %v530_v34 = vrot.slane %v529_v24, 2 }
  0x71   : > { %v705_v35 = vadd.f32 %v704_v25, %v703_v15  ;;  %v834_v36 = vrot.slane %v833_v26, 2  ;;  %v1008_v37 = vrot.slane %v1007_v27, 4  ;;  %v1137_v38 = vadd.f32 %v1136_v28, %v1135_v18 }
  0x72   : > { %v2282_v10 = vadd.f32 %v2220_v60, %v2136_v31  ;;  %v228_v40 = vrot.slane %v227_v32, 1  ;;  %v403_v41 = vadd.f32 %v402_v33, %v401_v23  ;;  %v531_v42 = vadd.f32 %v530_v34, %v529_v24 }
  0x73   : > { %v706_v44 = vrot.slane %v705_v35, 2  ;;  %v835_v45 = vadd.f32 %v834_v36, %v833_v26  ;;  %v1009_v46 = vadd.f32 %v1008_v37, %v1007_v27  ;;  %v1138_v47 = vrot.slane %v1137_v38, 2 }
  0x74   : > { %v4336_v49 = vadd.f32 %v2366_v61, %v2282_v10  ;;  %v229_v50 = vadd.f32 %v228_v40, %v227_v32  ;;  %v404_v51 = vrot.slane %v403_v41, 1  ;;  %v532_v52 = vrot.slane %v531_v42, 1 }
  0x75   : > { %v707_v53 = vadd.f32 %v706_v44, %v705_v35  ;;  %v836_v54 = vrot.slane %v835_v45, 1  ;;  %v1010_v55 = vrot.slane %v1009_v46, 2  ;;  %v1139_v56 = vadd.f32 %v1138_v47, %v1137_v38 }
  0x76   : > { %v2444_v58 = vrot.slane %v4336_v49, 4  ;;  %v405_v59 = vadd.f32 %v404_v51, %v403_v41  ;;  %v533_v60 = vadd.f32 %v532_v52, %v531_v42  ;;  %v1273_v62 = vrot.slane %v1241_v48, 4  ;;  %v634_v52 = vld [vmem:[%s4221_s18 + $0x30] sm:$0xf0] }
  0x77   : > { %v708_v63 = vrot.slane %v707_v53, 1  ;;  %v837_v1 = vadd.f32 %v836_v54, %v835_v45  ;;  %v1011_v2 = vadd.f32 %v1010_v55, %v1009_v46  ;;  %v1140_v61 = vrot.slane %v1139_v56, 1 }
  0x78   : > { %v2445_v4 = vmax.f32 %v4336_v49, %v2444_v58  ;;  %v1311_v5 = vsel %vm215_vm0, %v1273_v62, 0.0  ;;  %v1418_v6 = vsel %vm1416_vm1, 0.0, %v229_v50  ;;  %v230_v7 = vsel %vm215_vm0, %v201_v57, 0.0 }
  0x79   : > { %v709_v12 = vadd.f32 %v708_v63, %v707_v53  ;;  %v1012_v15 = vrot.slane %v1011_v2, 1  ;;  %v1141_v16 = vadd.f32 %v1140_v61, %v1139_v56  ;;  %v1312_v17 = vrot.slane %v1311_v5, 4  ;;  %v810_v53 = vld [vmem:[%s4221_s18 + $0x50] sm:$0xf]  ;;  %v938_v63 = vld [vmem:[%s4221_s18 + $0x50] sm:$0xf0] }
  0x7a   : > { %v2446_v18 = vrot.slane %v2445_v4, 2  ;;  %v1434_v19 = vsel %vm215_vm0, %v1418_v6, %v405_v59  ;;  %v231_v20 = vrot.slane %v230_v7, 4  ;;  %v362_v23 = vrot.slane %v330_v3, 4 }
  0x7b   : > { %v1013_v24 = vadd.f32 %v1012_v15, %v1011_v2  ;;  %v1313_v25 = vadd.f32 %v1312_v17, %v1311_v5  ;;  %v1451_v26 = vsel %vm1449_vm2, %v1434_v19, %v533_v60  ;;  %v534_v27 = vsel %vm215_vm0, %v506_v11, 0.0 }
  0x7c   : > { %v2447_v28 = vmax.f32 %v2445_v4, %v2446_v18  ;;  %v1468_v31 = vsel %vm1466_vm3, %v1451_v26, %v709_v12  ;;  %v232_v32 = vadd.f32 %v231_v20, %v230_v7  ;;  %v406_v33 = vsel %vm215_vm0, %v362_v23, 0.0 }
  0x7d   : > { %v1314_v34 = vrot.slane %v1313_v25, 2  ;;  %v1485_v35 = vsel %vm1483_vm4, %v1468_v31, %v837_v1  ;;  %v1502_v36 = vsel %vm1500_vm5, %v1013_v24, %v1141_v16  ;;  %v407_v37 = vrot.slane %v406_v33, 4 }
  0x7e   : > { %v2448_v38 = vrot.slane %v2447_v28, 1  ;;  %v1553_v10 = vmul.f32 %v4269_v8, %v1485_v35  ;;  %v1571_v40 = vmul.f32 %v4272_v9, %v1485_v35  ;;  %v1717_v41 = vmul.f32 %v4276_v13, %v1485_v35 }
  0x7f   : > { %v1315_v42 = vadd.f32 %v1314_v34, %v1313_v25  ;;  %v1863_v44 = vmul.f32 %v4279_v14, %v1485_v35  ;;  %v2009_v45 = vmul.f32 %v4287_v21, %v1485_v35  ;;  %v2155_v46 = vmul.f32 %v4290_v22, %v1485_v35 }
  0x80   : > { %v2449_v47 = vmax.f32 %v2447_v28, %v2448_v38  ;;  %v1637_v48 = vrot.slane %v1571_v40, 1  ;;  %v1783_v50 = vrot.slane %v1717_v41, 2  ;;  %v2301_v51 = vmul.f32 %v4296_v29, %v1485_v35  ;;  %v1114_v40 = vld [vmem:[%s4221_s18 + $0x70] sm:$0xf] }
  0x81   : > { %v1316_v54 = vrot.slane %v1315_v42, 1  ;;  %v1929_v55 = vrot.slane %v1863_v44, 3  ;;  %v2075_v56 = vrot.slane %v2009_v45, 4  ;;  %v2221_v57 = vrot.slane %v2155_v46, 5 }
  0x82   : > { %v2540_v58 = vsub.f32 %v4336_v49, %v2449_v47  ;;  %v2367_v59 = vrot.slane %v2301_v51, 6  ;;  %v233_v60 = vrot.slane %v232_v32, 2  ;;  %v408_v62 = vadd.f32 %v407_v37, %v406_v33 }
  0x83   : > { %v1317_v1 = vadd.f32 %v1316_v54, %v1315_v42  ;;  %v535_v2 = vrot.slane %v534_v27, 4  ;;  %v666_v61 = vrot.slane %v634_v52, 4  ;;  %v838_v3 = vsel %vm215_vm0, %v810_v53, 0.0  ;;  %v1242_v53 = vld [vmem:[%s4221_s18 + $0x70] sm:$0xf0] }
  0x84   : > { %v2556_v4 = vmul.f32 1.442695, %v2540_v58  ;;  %v234_v5 = vadd.f32 %v233_v60, %v232_v32  ;;  %v409_v6 = vrot.slane %v408_v62, 2  ;;  %v839_v7 = vrot.slane %v838_v3, 4 }
  0x85   : > { %v1519_v11 = vsel %vm1517_vm6, %v1502_v36, %v1317_v1  ;;  %v536_v12 = vadd.f32 %v535_v2, %v534_v27  ;;  %v710_v15 = vsel %vm215_vm0, %v666_v61, 0.0  ;;  %v970_v16 = vrot.slane %v938_v63, 4 }
  0x86   : > { %3855 = vpow2.f32 %v2556_v4  ;;  %v1535_v49 = vsel %vm1416_vm1, %v1519_v11, 0.0  ;;  %v235_v17 = vrot.slane %v234_v5, 1  ;;  %v410_v18 = vadd.f32 %v409_v6, %v408_v62 }
  0x87   : > { %v1575_v19 = vmul.f32 %v4272_v9, %v1535_v49  ;;  %v1721_v20 = vmul.f32 %v4276_v13, %v1535_v49  ;;  %v1867_v23 = vmul.f32 %v4279_v14, %v1535_v49  ;;  %v2013_v24 = vmul.f32 %v4287_v21, %v1535_v49 }
  0x88   : > { %v2159_v25 = vmul.f32 %v4290_v22, %v1535_v49  ;;  %v2305_v26 = vmul.f32 %v4296_v29, %v1535_v49  ;;  %v236_v27 = vadd.f32 %v235_v17, %v234_v5  ;;  %v411_v28 = vrot.slane %v410_v18, 1  ;;  %v202_v5 = vld [vmem:[%s4221_s18 + $0x18] sm:$0xf] }
  0x89   : > { %v1638_v31 = vrot.slane %v1575_v19, 1  ;;  %v1784_v32 = vrot.slane %v1721_v20, 2  ;;  %v1930_v33 = vrot.slane %v1867_v23, 3  ;;  %v2076_v34 = vrot.slane %v2013_v24, 4 }
  0x8a   : > { %v2222_v35 = vrot.slane %v2159_v25, 5  ;;  %v2368_v36 = vrot.slane %v2305_v26, 6  ;;  %v412_v37 = vadd.f32 %v411_v28, %v410_v18  ;;  %v537_v38 = vrot.slane %v536_v12, 2  ;;  %v331_v28 = vld [vmem:[%s4221_s18 + $0x18] sm:$0xf0] }
  0x8b   : > { %v1639_v41 = vsel %vm1483_vm4, %v1637_v48, %v1638_v31  ;;  %v1785_v42 = vsel %vm1466_vm3, %v1783_v50, %v1784_v32  ;;  %v1931_v44 = vsel %vm1449_vm2, %v1929_v55, %v1930_v33  ;;  %v2077_v45 = vsel %vm215_vm0, %v2075_v56, %v2076_v34 }
  0x8c   : > { %v1699_v46 = vadd.f32 %v1639_v41, %v1553_v10  ;;  %v2223_v47 = vsel %vm1416_vm1, %v2221_v57, %v2222_v35  ;;  %v2369_v51 = vsel %vm1517_vm6, %v2367_v59, %v2368_v36  ;;  %v538_v52 = vadd.f32 %v537_v38, %v536_v12 }
  0x8d   : > { %v711_v54 = vrot.slane %v710_v15, 4  ;;  %v840_v58 = vadd.f32 %v839_v7, %v838_v3  ;;  %v1014_v60 = vsel %vm215_vm0, %v970_v16, 0.0  ;;  %v1142_v48 = vsel %vm215_vm0, %v1114_v40, 0.0 }
  0x8e   : > { %v1845_v62 = vadd.f32 %v1785_v42, %v1699_v46  ;;  %v539_v50 = vrot.slane %v538_v52, 1  ;;  %v1015_v63 = vrot.slane %v1014_v60, 4  ;;  %v1143_v55 = vrot.slane %v1142_v48, 4 }
  0x8f   : > { %v712_v1 = vadd.f32 %v711_v54, %v710_v15  ;;  %v841_v56 = vrot.slane %v840_v58, 2  ;;  %v1274_v10 = vrot.slane %v1242_v53, 4  ;;  %v1419_v57 = vsel %vm1416_vm1, 0.0, %v236_v27 }
  0x90   : > { %v1991_v2 = vadd.f32 %v1931_v44, %v1845_v62  ;;  %v540_v59 = vadd.f32 %v539_v50, %v538_v52  ;;  %v1016_v61 = vadd.f32 %v1015_v63, %v1014_v60  ;;  %v1144_v4 = vadd.f32 %v1143_v55, %v1142_v48 }
  0x91   : > { %v713_v6 = vrot.slane %v712_v1, 2  ;;  %v842_v3 = vadd.f32 %v841_v56, %v840_v58  ;;  %v1318_v7 = vsel %vm215_vm0, %v1274_v10, 0.0  ;;  %v1435_v11 = vsel %vm215_vm0, %v1419_v57, %v412_v37 }
  0x92   : > { %v2137_v12 = vadd.f32 %v2077_v45, %v1991_v2  ;;  %v1017_v16 = vrot.slane %v1016_v61, 2  ;;  %v1145_v49 = vrot.slane %v1144_v4, 2  ;;  %v1319_v15 = vrot.slane %v1318_v7, 4 }
  0x93   : > { %v4388_v17 = vpop.eup %3855  ;;  %v714_v18 = vadd.f32 %v713_v6, %v712_v1  ;;  %v843_v19 = vrot.slane %v842_v3, 1  ;;  %v1452_v20 = vsel %vm1449_vm2, %v1435_v11, %v540_v59  ;;  %v237_v23 = vsel %vm215_vm0, %v202_v5, 0.0 }
  0x94   : > { %v2588_v24 = vrot.slane %v4388_v17, 4  ;;  %v2283_v25 = vadd.f32 %v2223_v47, %v2137_v12  ;;  %v1018_v26 = vadd.f32 %v1017_v16, %v1016_v61  ;;  %v1146_v27 = vadd.f32 %v1145_v49, %v1144_v4 }
  0x95   : > { %v715_v31 = vrot.slane %v714_v18, 1  ;;  %v844_v32 = vadd.f32 %v843_v19, %v842_v3  ;;  %v1320_v33 = vadd.f32 %v1319_v15, %v1318_v7  ;;  %v238_v34 = vrot.slane %v237_v23, 4 }
  0x96   : > { %v2589_v35 = vadd.f32 %v4388_v17, %v2588_v24  ;;  %v4395_v36 = vadd.f32 %v2369_v51, %v2283_v25  ;;  %v1019_v37 = vrot.slane %v1018_v26, 1  ;;  %v1147_v38 = vrot.slane %v1146_v27, 1 }
  0x97   : > { %v716_v40 = vadd.f32 %v715_v31, %v714_v18  ;;  %v1321_v41 = vrot.slane %v1320_v33, 2  ;;  %v239_v42 = vadd.f32 %v238_v34, %v237_v23  ;;  %v363_v44 = vrot.slane %v331_v28, 4 }
  0x98   : > { %v2590_v45 = vrot.slane %v2589_v35, 2  ;;  %v2450_v46 = vrot.slane %v4395_v36, 4  ;;  %v1020_v47 = vadd.f32 %v1019_v37, %v1018_v26  ;;  %v1148_v52 = vadd.f32 %v1147_v38, %v1146_v27 }
  0x99   : > { %v1322_v53 = vadd.f32 %v1321_v41, %v1320_v33  ;;  %v1469_v54 = vsel %vm1466_vm3, %v1452_v20, %v716_v40  ;;  %v240_v58 = vrot.slane %v239_v42, 2  ;;  %v413_v60 = vsel %vm215_vm0, %v363_v44, 0.0  ;;  %v507_v40 = vld [vmem:[%s4221_s18 + $0x38] sm:$0xf] }
  0x9a   : > { %v2591_v48 = vadd.f32 %v2590_v45, %v2589_v35  ;;  %v2451_v51 = vmax.f32 %v4395_v36, %v2450_v46  ;;  %v1486_v62 = vsel %vm1483_vm4, %v1469_v54, %v844_v32  ;;  %v1503_v50 = vsel %vm1500_vm5, %v1020_v47, %v1148_v52  ;;  %v635_v46 = vld [vmem:[%s4221_s18 + $0x38] sm:$0xf0] }
  0x9b   : > { %v1323_v63 = vrot.slane %v1322_v53, 1  ;;  %v1554_v55 = vmul.f32 %v4269_v8, %v1486_v62  ;;  %v1572_v1 = vmul.f32 %v4272_v9, %v1486_v62  ;;  %v1718_v56 = vmul.f32 %v4276_v13, %v1486_v62 }
  0x9c   : > { %v2592_v10 = vrot.slane %v2591_v48, 1  ;;  %v2452_v57 = vrot.slane %v2451_v51, 2  ;;  %v1864_v2 = vmul.f32 %v4279_v14, %v1486_v62  ;;  %v2010_v59 = vmul.f32 %v4287_v21, %v1486_v62 }
  0x9d   : > { %v1324_v61 = vadd.f32 %v1323_v63, %v1322_v53  ;;  %v1640_v4 = vrot.slane %v1572_v1, 1  ;;  %v1786_v5 = vrot.slane %v1718_v56, 2  ;;  %v2156_v6 = vmul.f32 %v4290_v22, %v1486_v62 }
  0x9e   : > { %v2593_v3 = vadd.f32 %v2592_v10, %v2591_v48  ;;  %v2453_v7 = vmax.f32 %v2451_v51, %v2452_v57  ;;  %v1932_v11 = vrot.slane %v1864_v2, 3  ;;  %v2078_v12 = vrot.slane %v2010_v59, 4  ;;  %v1115_v57 = vld [vmem:[%s4221_s18 + $0x78] sm:$0xf] }
  0x9f   : > { %v1520_v16 = vsel %vm1517_vm6, %v1503_v50, %v1324_v61  ;;  %v2224_v49 = vrot.slane %v2156_v6, 5  ;;  %v2302_v15 = vmul.f32 %v4296_v29, %v1486_v62  ;;  %v241_v18 = vadd.f32 %v240_v58, %v239_v42  ;;  %v811_v58 = vld [vmem:[%s4221_s18 + $0x58] sm:$0xf]  ;;  %v939_v50 = vld [vmem:[%s4221_s18 + $0x58] sm:$0xf0] }
  0xa0   : > { %3857 = vrcp.f32 %v2593_v3  ;;  %v2454_v19 = vrot.slane %v2453_v7, 1  ;;  %v1536_v20 = vsel %vm1416_vm1, %v1520_v16, 0.0  ;;  %v414_v23 = vrot.slane %v413_v60, 4 }
  0xa1   : > { %v1576_v24 = vmul.f32 %v4272_v9, %v1536_v20  ;;  %v1722_v25 = vmul.f32 %v4276_v13, %v1536_v20  ;;  %v1868_v26 = vmul.f32 %v4279_v14, %v1536_v20  ;;  %v2014_v27 = vmul.f32 %v4287_v21, %v1536_v20 }
  0xa2   : > { %v2455_v28 = vmax.f32 %v2453_v7, %v2454_v19  ;;  %v2160_v31 = vmul.f32 %v4290_v22, %v1536_v20  ;;  %v2306_v32 = vmul.f32 %v4296_v29, %v1536_v20  ;;  %v2370_v33 = vrot.slane %v2302_v15, 6 }
  0xa3   : > { %v1641_v34 = vrot.slane %v1576_v24, 1  ;;  %v1787_v35 = vrot.slane %v1722_v25, 2  ;;  %v1933_v37 = vrot.slane %v1868_v26, 3  ;;  %v2079_v38 = vrot.slane %v2014_v27, 4 }
  0xa4   : > { %v2541_v41 = vsub.f32 %v4395_v36, %v2455_v28  ;;  %v2225_v42 = vrot.slane %v2160_v31, 5  ;;  %v2371_v44 = vrot.slane %v2306_v32, 6  ;;  %v242_v45 = vrot.slane %v241_v18, 1 }
  0xa5   : > { %v1642_v47 = vsel %vm1483_vm4, %v1640_v4, %v1641_v34  ;;  %v1788_v52 = vsel %vm1466_vm3, %v1786_v5, %v1787_v35  ;;  %v1934_v53 = vsel %vm1449_vm2, %v1932_v11, %v1933_v37  ;;  %v2080_v54 = vsel %vm215_vm0, %v2078_v12, %v2079_v38  ;;  %v1243_v12 = vld [vmem:[%s4221_s18 + $0x78] sm:$0xf0] }
  0xa6   : > { %v2558_v48 = vmul.f32 1.442695, %v2541_v41  ;;  %v1700_v51 = vadd.f32 %v1642_v47, %v1554_v55  ;;  %v2226_v62 = vsel %vm1416_vm1, %v2224_v49, %v2225_v42  ;;  %v2372_v36 = vsel %vm1517_vm6, %v2370_v33, %v2371_v44 }
  0xa7   : > { %v243_v63 = vadd.f32 %v242_v45, %v241_v18  ;;  %v415_v1 = vadd.f32 %v414_v23, %v413_v60  ;;  %v541_v56 = vsel %vm215_vm0, %v507_v40, 0.0  ;;  %v667_v10 = vrot.slane %v635_v46, 4 }
  0xa8   : > { %3859 = vpow2.f32 %v2558_v48  ;;  %v1846_v2 = vadd.f32 %v1788_v52, %v1700_v51  ;;  %v542_v59 = vrot.slane %v541_v56, 4  ;;  %v845_v61 = vsel %vm215_vm0, %v811_v58, 0.0 }
  0xa9   : > { %v416_v4 = vrot.slane %v415_v1, 2  ;;  %v717_v55 = vsel %vm215_vm0, %v667_v10, 0.0  ;;  %v846_v5 = vrot.slane %v845_v61, 4  ;;  %v971_v6 = vrot.slane %v939_v50, 4 }
  0xaa   : > { %v1992_v3 = vadd.f32 %v1934_v53, %v1846_v2  ;;  %v543_v7 = vadd.f32 %v542_v59, %v541_v56  ;;  %v718_v11 = vrot.slane %v717_v55, 4  ;;  %v1149_v60 = vsel %vm215_vm0, %v1115_v57, 0.0  ;;  %v203_v56 = vld [vmem:[%s4221_s18 + $0x80] sm:$0xf] }
  0xab   : > { %v417_v16 = vadd.f32 %v416_v4, %v415_v1  ;;  %v847_v49 = vadd.f32 %v846_v5, %v845_v61  ;;  %v1021_v15 = vsel %vm215_vm0, %v971_v6, 0.0  ;;  %v1150_v18 = vrot.slane %v1149_v60, 4 }
  0xac   : > { %v2138_v19 = vadd.f32 %v2080_v54, %v1992_v3  ;;  %v544_v20 = vrot.slane %v543_v7, 2  ;;  %v719_v23 = vadd.f32 %v718_v11, %v717_v55  ;;  %v1022_v24 = vrot.slane %v1021_v15, 4  ;;  %v332_v3 = vld [vmem:[%s4221_s18 + $0x80] sm:$0xf0] }
  0xad   : > { %v3858_v25 = vpop.eup %3857  ;;  %v418_v26 = vrot.slane %v417_v16, 1  ;;  %v848_v27 = vrot.slane %v847_v49, 2  ;;  %v1151_v28 = vadd.f32 %v1150_v18, %v1149_v60  ;;  %v1275_v31 = vrot.slane %v1243_v12, 4 }
  0xae   : > { %v2685_v32 = vmul.f32 4.0, %v3858_v25  ;;  %v2284_v33 = vadd.f32 %v2226_v62, %v2138_v19  ;;  %v545_v34 = vadd.f32 %v544_v20, %v543_v7  ;;  %v720_v35 = vrot.slane %v719_v23, 2 }
  0xaf   : > { %v419_v37 = vadd.f32 %v418_v26, %v417_v16  ;;  %v849_v38 = vadd.f32 %v848_v27, %v847_v49  ;;  %v1023_v40 = vadd.f32 %v1022_v24, %v1021_v15  ;;  %v1152_v41 = vrot.slane %v1151_v28, 2 }
  0xb0   : > { %v4437_v42 = vmul.f32 %v4388_v17, %v2685_v32  ;;  %v4439_v44 = vadd.f32 %v2372_v36, %v2284_v33  ;;  %v546_v45 = vrot.slane %v545_v34, 1  ;;  %v721_v46 = vadd.f32 %v720_v35, %v719_v23 }
  0xb1   : > { %v850_v47 = vrot.slane %v849_v38, 1  ;;  %v1024_v52 = vrot.slane %v1023_v40, 2  ;;  %v1153_v53 = vadd.f32 %v1152_v41, %v1151_v28  ;;  %v1325_v54 = vsel %vm215_vm0, %v1275_v31, 0.0 }
  0xb2   : > { %v2735_v58 = vrot.slane %v4437_v42, %v4314_v43  ;;  %v2456_v48 = vrot.slane %v4439_v44, 4  ;;  %v547_v51 = vadd.f32 %v546_v45, %v545_v34  ;;  %v722_v62 = vrot.slane %v721_v46, 1 }
  0xb3   : > { %v851_v17 = vadd.f32 %v850_v47, %v849_v38  ;;  %v1025_v50 = vadd.f32 %v1024_v52, %v1023_v40  ;;  %v1154_v36 = vrot.slane %v1153_v53, 1  ;;  %v1326_v1 = vrot.slane %v1325_v54, 4 }
  0xb4   : > { %v2796_v10 = vmul.f32 %v2735_v58, %v4232_v0  ;;  %v2457_v57 = vmax.f32 %v4439_v44, %v2456_v48  ;;  %v723_v2 = vadd.f32 %v722_v62, %v721_v46  ;;  %v1420_v59 = vsel %vm1416_vm1, 0.0, %v243_v63  ;;  %v508_v46 = vld [vmem:[%s4221_s18 + $0xa0] sm:$0xf] }
  0xb5   : > { %v4449_v61 = vpop.eup %3859  ;;  %v1026_v4 = vrot.slane %v1025_v50, 1  ;;  %v1155_v55 = vadd.f32 %v1154_v36, %v1153_v53  ;;  %v1327_v5 = vadd.f32 %v1326_v1, %v1325_v54  ;;  %v1436_v6 = vsel %vm215_vm0, %v1420_v59, %v419_v37 }
  0xb6   : > { %2812 = vst [vmem:[%s4455_s25] sm:$0xf] %v2796_v10  ;;  %v2594_v0 = vrot.slane %v4449_v61, 4  ;;  %v2458_v7 = vrot.slane %v2457_v57, 2  ;;  %v1453_v11 = vsel %vm1449_vm2, %v1436_v6, %v547_v51  ;;  %v244_v63 = vsel %vm215_vm0, %v203_v56, 0.0 }
  0xb7   : > { %v1027_v60 = vadd.f32 %v1026_v4, %v1025_v50  ;;  %v1328_v12 = vrot.slane %v1327_v5, 2  ;;  %v1470_v16 = vsel %vm1466_vm3, %v1453_v11, %v723_v2  ;;  %v245_v49 = vrot.slane %v244_v63, 4 }
  0xb8   : > { %v2595_v15 = vadd.f32 %v4449_v61, %v2594_v0  ;;  %v2459_v18 = vmax.f32 %v2457_v57, %v2458_v7  ;;  %v1487_v19 = vsel %vm1483_vm4, %v1470_v16, %v851_v17  ;;  %v364_v20 = vrot.slane %v332_v3, 4 }
  0xb9   : > { %v1329_v23 = vadd.f32 %v1328_v12, %v1327_v5  ;;  %v1504_v24 = vsel %vm1500_vm5, %v1027_v60, %v1155_v55  ;;  %v1555_v25 = vmul.f32 %v4269_v8, %v1487_v19  ;;  %v1573_v26 = vmul.f32 %v4272_v9, %v1487_v19 }
  0xba   : > { %v2596_v27 = vrot.slane %v2595_v15, 2  ;;  %v2460_v28 = vrot.slane %v2459_v18, 1  ;;  %v1719_v31 = vmul.f32 %v4276_v13, %v1487_v19  ;;  %v1865_v32 = vmul.f32 %v4279_v14, %v1487_v19 }
  0xbb   : > { %v1330_v33 = vrot.slane %v1329_v23, 1  ;;  %v1643_v34 = vrot.slane %v1573_v26, 1  ;;  %v2011_v35 = vmul.f32 %v4287_v21, %v1487_v19  ;;  %v2157_v37 = vmul.f32 %v4290_v22, %v1487_v19  ;;  %v1116_v26 = vld [vmem:[%s4221_s18 + $0xe0] sm:$0xf] }
  0xbc   : > { %v2597_v38 = vadd.f32 %v2596_v27, %v2595_v15  ;;  %v2461_v40 = vmax.f32 %v2459_v18, %v2460_v28  ;;  %v1789_v41 = vrot.slane %v1719_v31, 2  ;;  %v1935_v45 = vrot.slane %v1865_v32, 3 }
  0xbd   : > { %v1331_v47 = vadd.f32 %v1330_v33, %v1329_v23  ;;  %v2081_v52 = vrot.slane %v2011_v35, 4  ;;  %v2227_v53 = vrot.slane %v2157_v37, 5  ;;  %v2303_v54 = vmul.f32 %v4296_v29, %v1487_v19  ;;  %v812_v23 = vld [vmem:[%s4221_s18 + $0xc0] sm:$0xf] }
  0xbe   : > { %v2598_v58 = vrot.slane %v2597_v38, 1  ;;  %v2542_v48 = vsub.f32 %v4439_v44, %v2461_v40  ;;  %v246_v51 = vadd.f32 %v245_v49, %v244_v63  ;;  %v420_v62 = vsel %vm215_vm0, %v364_v20, 0.0  ;;  %v636_v49 = vld [vmem:[%s4221_s18 + $0xa0] sm:$0xf0] }
  0xbf   : > { %v1521_v17 = vsel %vm1517_vm6, %v1504_v24, %v1331_v47  ;;  %v2373_v50 = vrot.slane %v2303_v54, 6  ;;  %v421_v36 = vrot.slane %v420_v62, 4  ;;  %v548_v1 = vsel %vm215_vm0, %v508_v46, 0.0  ;;  %v940_v24 = vld [vmem:[%s4221_s18 + $0xc0] sm:$0xf0] }
  0xc0   : > { %v2599_v56 = vadd.f32 %v2598_v58, %v2597_v38  ;;  %v2560_v10 = vmul.f32 1.442695, %v2542_v48  ;;  %v1537_v57 = vsel %vm1416_vm1, %v1521_v17, 0.0  ;;  %v247_v2 = vrot.slane %v246_v51, 2  ;;  %v1244_v54 = vld [vmem:[%s4221_s18 + $0xe0] sm:$0xf0] }
  0xc1   : > { %v1577_v59 = vmul.f32 %v4272_v9, %v1537_v57  ;;  %v1723_v4 = vmul.f32 %v4276_v13, %v1537_v57  ;;  %v1869_v44 = vmul.f32 %v4279_v14, %v1537_v57  ;;  %v2015_v55 = vmul.f32 %v4287_v21, %v1537_v57 }
  0xc2   : > { %3861 = vrcp.f32 %v2599_v56  ;;  %v2161_v5 = vmul.f32 %v4290_v22, %v1537_v57  ;;  %v2307_v6 = vmul.f32 %v4296_v29, %v1537_v57  ;;  %v248_v3 = vadd.f32 %v247_v2, %v246_v51 }
  0xc3   : > { %3863 = vpow2.f32 %v2560_v10  ;;  %v1644_v0 = vrot.slane %v1577_v59, 1  ;;  %v1790_v7 = vrot.slane %v1723_v4, 2  ;;  %v1936_v11 = vrot.slane %v1869_v44, 3 }
  0xc4   : > { %v2082_v63 = vrot.slane %v2015_v55, 4  ;;  %v2228_v60 = vrot.slane %v2161_v5, 5  ;;  %v2374_v12 = vrot.slane %v2307_v6, 6  ;;  %v249_v16 = vrot.slane %v248_v3, 1 }
  0xc5   : > { %v1645_v15 = vsel %vm1483_vm4, %v1643_v34, %v1644_v0  ;;  %v1791_v18 = vsel %vm1466_vm3, %v1789_v41, %v1790_v7  ;;  %v1937_v19 = vsel %vm1449_vm2, %v1935_v45, %v1936_v11  ;;  %v422_v20 = vadd.f32 %v421_v36, %v420_v62 }
  0xc6   : > { %v1701_v27 = vadd.f32 %v1645_v15, %v1555_v25  ;;  %v2083_v28 = vsel %vm215_vm0, %v2081_v52, %v2082_v63  ;;  %v2229_v31 = vsel %vm1416_vm1, %v2227_v53, %v2228_v60  ;;  %v2375_v32 = vsel %vm1517_vm6, %v2373_v50, %v2374_v12 }
  0xc7   : > { %v4494_v33 = vadd.f32 %v249_v16, %v248_v3  ;;  %v423_v35 = vrot.slane %v422_v20, 2  ;;  %v549_v34 = vrot.slane %v548_v1, 4  ;;  %v668_v37 = vrot.slane %v636_v49, 4 }
  0xc8   : > { %v1847_v38 = vadd.f32 %v1791_v18, %v1701_v27  ;;  %v852_v40 = vsel %vm215_vm0, %v812_v23, 0.0  ;;  %v972_v41 = vrot.slane %v940_v24, 4  ;;  %v1156_v45 = vsel %vm215_vm0, %v1116_v26, 0.0 }
  0xc9   : > { %v424_v46 = vadd.f32 %v423_v35, %v422_v20  ;;  %v550_v25 = vadd.f32 %v549_v34, %v548_v1  ;;  %v724_v47 = vsel %vm215_vm0, %v668_v37, 0.0  ;;  %v853_v52 = vrot.slane %v852_v40, 4 }
  0xca   : > { %v1993_v53 = vadd.f32 %v1937_v19, %v1847_v38  ;;  %v725_v58 = vrot.slane %v724_v47, 4  ;;  %v1028_v48 = vsel %vm215_vm0, %v972_v41, 0.0  ;;  %v1157_v51 = vrot.slane %v1156_v45, 4  ;;  %v204_v38 = vld [vmem:[%s4221_s18 + $0x88] sm:$0xf] }
  0xcb   : > { %v425_v62 = vrot.slane %v424_v46, 1  ;;  %v551_v17 = vrot.slane %v550_v25, 2  ;;  %v854_v50 = vadd.f32 %v853_v52, %v852_v40  ;;  %v1029_v36 = vrot.slane %v1028_v48, 4 }
  0xcc   : > { %v2139_v56 = vadd.f32 %v2083_v28, %v1993_v53  ;;  %v726_v10 = vadd.f32 %v725_v58, %v724_v47  ;;  %v1158_v57 = vadd.f32 %v1157_v51, %v1156_v45  ;;  %v1276_v2 = vrot.slane %v1244_v54, 4  ;;  %v4519_v54 = vld [vmem:[%s4221_s18 + $0x88] sm:$0xf0] }
  0xcd   : > { %v426_v59 = vadd.f32 %v425_v62, %v424_v46  ;;  %v552_v4 = vadd.f32 %v551_v17, %v550_v25  ;;  %v855_v1 = vrot.slane %v854_v50, 2  ;;  %v1030_v44 = vadd.f32 %v1029_v36, %v1028_v48  ;;  %v509_v62 = vld [vmem:[%s4221_s18 + $0xa8] sm:$0xf] }
  0xce   : > { %v2285_v55 = vadd.f32 %v2229_v31, %v2139_v56  ;;  %v727_v5 = vrot.slane %v726_v10, 2  ;;  %v1159_v6 = vrot.slane %v1158_v57, 2  ;;  %v1332_v3 = vsel %vm215_vm0, %v1276_v2, 0.0 }
  0xcf   : > { %v3862_v0 = vpop.eup %3861  ;;  %v553_v7 = vrot.slane %v552_v4, 1  ;;  %v856_v11 = vadd.f32 %v855_v1, %v854_v50  ;;  %v1031_v63 = vrot.slane %v1030_v44, 2  ;;  %v1333_v60 = vrot.slane %v1332_v3, 4 }
  0xd0   : > { %v4502_v12 = vpop.eup %3863  ;;  %v2687_v16 = vmul.f32 4.0, %v3862_v0  ;;  %v4504_v49 = vadd.f32 %v2375_v32, %v2285_v55  ;;  %v728_v15 = vadd.f32 %v727_v5, %v726_v10  ;;  %v1160_v18 = vadd.f32 %v1159_v6, %v1158_v57 }
  0xd1   : > { %v2600_v19 = vrot.slane %v4502_v12, 4  ;;  %v554_v20 = vadd.f32 %v553_v7, %v552_v4  ;;  %v857_v23 = vrot.slane %v856_v11, 1  ;;  %v1032_v24 = vadd.f32 %v1031_v63, %v1030_v44 }
  0xd2   : > { %v4508_v26 = vmul.f32 %v4449_v61, %v2687_v16  ;;  %v2462_v27 = vrot.slane %v4504_v49, 4  ;;  %v729_v28 = vrot.slane %v728_v15, 1  ;;  %v1161_v31 = vrot.slane %v1160_v18, 1 }
  0xd3   : > { %v2601_v35 = vadd.f32 %v4502_v12, %v2600_v19  ;;  %v858_v34 = vadd.f32 %v857_v23, %v856_v11  ;;  %v1033_v32 = vrot.slane %v1032_v24, 1  ;;  %v1334_v37 = vadd.f32 %v1333_v60, %v1332_v3 }
  0xd4   : > { %v2739_v40 = vrot.slane %v4508_v26, %v4314_v43  ;;  %v2463_v41 = vmax.f32 %v4504_v49, %v2462_v27  ;;  %v730_v45 = vadd.f32 %v729_v28, %v728_v15  ;;  %v1162_v61 = vadd.f32 %v1161_v31, %v1160_v18 }
  0xd5   : > { %v2602_v46 = vrot.slane %v2601_v35, 2  ;;  %v1034_v25 = vadd.f32 %v1033_v32, %v1032_v24  ;;  %v1335_v47 = vrot.slane %v1334_v37, 2  ;;  %v1421_v52 = vsel %vm1416_vm1, 0.0, %v4494_v33 }
  0xd6   : > { %v2797_v53 = vmul.f32 %v2739_v40, %v4308_v39  ;;  %v2464_v58 = vrot.slane %v2463_v41, 2  ;;  %v1437_v48 = vsel %vm215_vm0, %v1421_v52, %v426_v59  ;;  %v251_v51 = vsel %vm215_vm0, %v204_v38, 0.0 }
  0xd7   : > { %v2603_v17 = vadd.f32 %v2602_v46, %v2601_v35  ;;  %v1336_v50 = vadd.f32 %v1335_v47, %v1334_v37  ;;  %v1454_v36 = vsel %vm1449_vm2, %v1437_v48, %v554_v20  ;;  %v1505_v56 = vsel %vm1500_vm5, %v1034_v25, %v1162_v61 }
  0xd8   : > { %2813 = vst [vmem:[%s4455_s25 + $0x8] sm:$0xf] %v2797_v53  ;;  %v2465_v10 = vmax.f32 %v2463_v41, %v2464_v58  ;;  %v1471_v33 = vsel %vm1466_vm3, %v1454_v36, %v730_v45  ;;  %v252_v57 = vrot.slane %v251_v51, 4  ;;  %v365_v2 = vrot.slane %v4519_v54, 4  ;;  %v637_v54 = vld [vmem:[%s4221_s18 + $0xa8] sm:$0xf0] }
  0xd9   : > { %v2604_v39 = vrot.slane %v2603_v17, 1  ;;  %v1337_v4 = vrot.slane %v1336_v50, 1  ;;  %v1488_v59 = vsel %vm1483_vm4, %v1471_v33, %v858_v34  ;;  %v555_v1 = vsel %vm215_vm0, %v509_v62, 0.0  ;;  %v813_v53 = vld [vmem:[%s4221_s18 + $0xc8] sm:$0xf] }
  0xda   : > { %v2466_v44 = vrot.slane %v2465_v10, 1  ;;  %v1556_v55 = vmul.f32 %v4269_v8, %v1488_v59  ;;  %v1578_v5 = vmul.f32 %v4272_v9, %v1488_v59  ;;  %v1724_v6 = vmul.f32 %v4276_v13, %v1488_v59  ;;  %v941_v33 = vld [vmem:[%s4221_s18 + $0xc8] sm:$0xf0] }
  0xdb   : > { %v2605_v3 = vadd.f32 %v2604_v39, %v2603_v17  ;;  %v1338_v0 = vadd.f32 %v1337_v4, %v1336_v50  ;;  %v1870_v7 = vmul.f32 %v4279_v14, %v1488_v59  ;;  %v2016_v11 = vmul.f32 %v4287_v21, %v1488_v59  ;;  %v1117_v39 = vld [vmem:[%s4221_s18 + $0xe8] sm:$0xf] }
  0xdc   : > { %v2467_v63 = vmax.f32 %v2465_v10, %v2466_v44  ;;  %v1646_v60 = vrot.slane %v1578_v5, 1  ;;  %v1792_v16 = vrot.slane %v1724_v6, 2  ;;  %v2162_v15 = vmul.f32 %v4290_v22, %v1488_v59 }
  0xdd   : > { %3865 = vrcp.f32 %v2605_v3  ;;  %v1522_v18 = vsel %vm1517_vm6, %v1505_v56, %v1338_v0  ;;  %v1938_v19 = vrot.slane %v1870_v7, 3  ;;  %v2084_v20 = vrot.slane %v2016_v11, 4 }
  0xde   : > { %v2543_v23 = vsub.f32 %v4504_v49, %v2467_v63  ;;  %v1538_v24 = vsel %vm1416_vm1, %v1522_v18, 0.0  ;;  %v2230_v27 = vrot.slane %v2162_v15, 5  ;;  %v2308_v28 = vmul.f32 %v4296_v29, %v1488_v59 }
  0xdf   : > { %v1582_v31 = vmul.f32 %v4272_v9, %v1538_v24  ;;  %v1728_v35 = vmul.f32 %v4276_v13, %v1538_v24  ;;  %v1874_v34 = vmul.f32 %v4279_v14, %v1538_v24  ;;  %v2020_v32 = vmul.f32 %v4287_v21, %v1538_v24 }
  0xe0   : > { %v2562_v37 = vmul.f32 1.442695, %v2543_v23  ;;  %v2166_v38 = vmul.f32 %v4290_v22, %v1538_v24  ;;  %v2312_v49 = vmul.f32 %v4296_v29, %v1538_v24  ;;  %v2376_v40 = vrot.slane %v2308_v28, 6 }
  0xe1   : > { %v1647_v41 = vrot.slane %v1582_v31, 1  ;;  %v1793_v45 = vrot.slane %v1728_v35, 2  ;;  %v1939_v61 = vrot.slane %v1874_v34, 3  ;;  %v2085_v46 = vrot.slane %v2020_v32, 4 }
  0xe2   : > { %3867 = vpow2.f32 %v2562_v37  ;;  %v2231_v25 = vrot.slane %v2166_v38, 5  ;;  %v2377_v47 = vrot.slane %v2312_v49, 6  ;;  %v253_v52 = vadd.f32 %v252_v57, %v251_v51 }
  0xe3   : > { %v1648_v58 = vsel %vm1483_vm4, %v1646_v60, %v1647_v41  ;;  %v1794_v48 = vsel %vm1466_vm3, %v1792_v16, %v1793_v45  ;;  %v1940_v62 = vsel %vm1449_vm2, %v1938_v19, %v1939_v61  ;;  %v2086_v17 = vsel %vm215_vm0, %v2084_v20, %v2085_v46 }
  0xe4   : > { %v1702_v50 = vadd.f32 %v1648_v58, %v1556_v55  ;;  %v2232_v36 = vsel %vm1416_vm1, %v2230_v27, %v2231_v25  ;;  %v2378_v56 = vsel %vm1517_vm6, %v2376_v40, %v2377_v47  ;;  %v254_v10 = vrot.slane %v253_v52, 2 }
  0xe5   : > { %v427_v51 = vsel %vm215_vm0, %v365_v2, 0.0  ;;  %v556_v57 = vrot.slane %v555_v1, 4  ;;  %v669_v4 = vrot.slane %v637_v54, 4  ;;  %v859_v59 = vsel %vm215_vm0, %v813_v53, 0.0 }
  0xe6   : > { %v1848_v44 = vadd.f32 %v1794_v48, %v1702_v50  ;;  %v255_v5 = vadd.f32 %v254_v10, %v253_v52  ;;  %v428_v6 = vrot.slane %v427_v51, 4  ;;  %v860_v3 = vrot.slane %v859_v59, 4 }
  0xe7   : > { %v557_v0 = vadd.f32 %v556_v57, %v555_v1  ;;  %v731_v55 = vsel %vm215_vm0, %v669_v4, 0.0  ;;  %v973_v7 = vrot.slane %v941_v33, 4  ;;  %v1163_v11 = vsel %vm215_vm0, %v1117_v39, 0.0  ;;  %v205_v33 = vld [vmem:[%s4221_s18 + $0x90] sm:$0xf] }
  0xe8   : > { %v1994_v63 = vadd.f32 %v1940_v62, %v1848_v44  ;;  %v256_v60 = vrot.slane %v255_v5, 1  ;;  %v429_v16 = vadd.f32 %v428_v6, %v427_v51  ;;  %v732_v15 = vrot.slane %v731_v55, 4  ;;  %v3919_v39 = vld [vmem:[%s4221_s18 + $0x10] sm:$0xf] }
  0xe9   : > { %v558_v18 = vrot.slane %v557_v0, 2  ;;  %v861_v2 = vadd.f32 %v860_v3, %v859_v59  ;;  %v1035_v19 = vsel %vm215_vm0, %v973_v7, 0.0  ;;  %v1164_v20 = vrot.slane %v1163_v11, 4 }
  0xea   : > { %v3866_v23 = vpop.eup %3865  ;;  %v2140_v24 = vadd.f32 %v2086_v17, %v1994_v63  ;;  %v257_v27 = vadd.f32 %v256_v60, %v255_v5  ;;  %v430_v28 = vrot.slane %v429_v16, 2  ;;  %v733_v31 = vadd.f32 %v732_v15, %v731_v55 }
  0xeb   : > { %v2689_v1 = vmul.f32 4.0, %v3866_v23  ;;  %v559_v35 = vadd.f32 %v558_v18, %v557_v0  ;;  %v862_v34 = vrot.slane %v861_v2, 2  ;;  %v1036_v32 = vrot.slane %v1035_v19, 4  ;;  %v334_v18 = vld [vmem:[%s4221_s18 + $0x90] sm:$0xf0] }
  0xec   : > { %v2286_v37 = vadd.f32 %v2232_v36, %v2140_v24  ;;  %v431_v38 = vadd.f32 %v430_v28, %v429_v16  ;;  %v734_v49 = vrot.slane %v733_v31, 2  ;;  %v1165_v40 = vadd.f32 %v1164_v20, %v1163_v11 }
  0xed   : > { %v4564_v41 = vmul.f32 %v4502_v12, %v2689_v1  ;;  %v560_v45 = vrot.slane %v559_v35, 1  ;;  %v863_v61 = vadd.f32 %v862_v34, %v861_v2  ;;  %v1037_v46 = vadd.f32 %v1036_v32, %v1035_v19  ;;  %v1245_v12 = vld [vmem:[%s4221_s18 + $0xe8] sm:$0xf0] }
  0xee   : > { %v4566_v25 = vadd.f32 %v2378_v56, %v2286_v37  ;;  %v432_v47 = vrot.slane %v431_v38, 1  ;;  %v735_v52 = vadd.f32 %v734_v49, %v733_v31  ;;  %v1166_v54 = vrot.slane %v1165_v40, 2 }
  0xef   : > { %v4568_v53 = vpop.eup %3867  ;;  %v2743_v58 = vrot.slane %v4564_v41, %v4314_v43  ;;  %v561_v48 = vadd.f32 %v560_v45, %v559_v35  ;;  %v864_v62 = vrot.slane %v863_v61, 1  ;;  %v1038_v17 = vrot.slane %v1037_v46, 2 }
  0xf0   : > { %v2606_v50 = vrot.slane %v4568_v53, 4  ;;  %v2468_v36 = vrot.slane %v4566_v25, 4  ;;  %v433_v10 = vadd.f32 %v432_v47, %v431_v38  ;;  %v736_v56 = vrot.slane %v735_v52, 1 }
  0xf1   : > { %v2798_v51 = vmul.f32 %v3919_v39, %v2743_v58  ;;  %v865_v57 = vadd.f32 %v864_v62, %v863_v61  ;;  %v1039_v4 = vadd.f32 %v1038_v17, %v1037_v46  ;;  %v1167_v59 = vadd.f32 %v1166_v54, %v1165_v40  ;;  %v510_v62 = vld [vmem:[%s4221_s18 + $0xb0] sm:$0xf]  ;;  %v638_v39 = vld [vmem:[%s4221_s18 + $0xb0] sm:$0xf0] }
  0xf2   : > { %v2607_v44 = vadd.f32 %v4568_v53, %v2606_v50  ;;  %v2469_v5 = vmax.f32 %v4566_v25, %v2468_v36  ;;  %v737_v6 = vadd.f32 %v736_v56, %v735_v52  ;;  %v1277_v3 = vrot.slane %v1245_v12, 4 }
  0xf3   : > { %2814 = vst [vmem:[%s4455_s25 + $0x10] sm:$0xf] %v2798_v51  ;;  %v1040_v0 = vrot.slane %v1039_v4, 1  ;;  %v1168_v55 = vrot.slane %v1167_v59, 1  ;;  %v1422_v7 = vsel %vm1416_vm1, 0.0, %v257_v27  ;;  %v258_v11 = vsel %vm215_vm0, %v205_v33, 0.0 }
  0xf4   : > { %v2608_v63 = vrot.slane %v2607_v44, 2  ;;  %v2470_v60 = vrot.slane %v2469_v5, 2  ;;  %v1339_v16 = vsel %vm215_vm0, %v1277_v3, 0.0  ;;  %v1438_v15 = vsel %vm215_vm0, %v1422_v7, %v433_v10  ;;  %v814_v51 = vld [vmem:[%s4221_s18 + $0xd0] sm:$0xf] }
  0xf5   : > { %v1041_v2 = vadd.f32 %v1040_v0, %v1039_v4  ;;  %v1169_v19 = vadd.f32 %v1168_v55, %v1167_v59  ;;  %v1340_v20 = vrot.slane %v1339_v16, 4  ;;  %v1455_v23 = vsel %vm1449_vm2, %v1438_v15, %v561_v48 }
  0xf6   : > { %v2609_v24 = vadd.f32 %v2608_v63, %v2607_v44  ;;  %v2471_v28 = vmax.f32 %v2469_v5, %v2470_v60  ;;  %v1472_v31 = vsel %vm1466_vm3, %v1455_v23, %v737_v6  ;;  %v259_v1 = vrot.slane %v258_v11, 4  ;;  %v942_v5 = vld [vmem:[%s4221_s18 + $0xd0] sm:$0xf0] }
  0xf7   : > { %v1341_v27 = vadd.f32 %v1340_v20, %v1339_v16  ;;  %v1489_v35 = vsel %vm1483_vm4, %v1472_v31, %v865_v57  ;;  %v1506_v34 = vsel %vm1500_vm5, %v1041_v2, %v1169_v19  ;;  %v366_v32 = vrot.slane %v334_v18, 4 }
  0xf8   : > { %v2610_v37 = vrot.slane %v2609_v24, 1  ;;  %v2472_v38 = vrot.slane %v2471_v28, 1  ;;  %v4590_v49 = vmul.f32 %v4269_v8, %v1489_v35  ;;  %v4593_v40 = vmul.f32 %v4272_v9, %v1489_v35 }
  0xf9   : > { %v1342_v45 = vrot.slane %v1341_v27, 2  ;;  %v1725_v61 = vmul.f32 %v4276_v13, %v1489_v35  ;;  %v1871_v46 = vmul.f32 %v4279_v14, %v1489_v35  ;;  %v2017_v47 = vmul.f32 %v4287_v21, %v1489_v35 }
  0xfa   : > { %v2611_v52 = vadd.f32 %v2610_v37, %v2609_v24  ;;  %v2473_v54 = vmax.f32 %v2471_v28, %v2472_v38  ;;  %v1649_v58 = vrot.slane %v4593_v40, 1  ;;  %v2163_v48 = vmul.f32 %v4290_v22, %v1489_v35 }
  0xfb   : > { %v1343_v17 = vadd.f32 %v1342_v45, %v1341_v27  ;;  %v1795_v12 = vrot.slane %v1725_v61, 2  ;;  %v1941_v50 = vrot.slane %v1871_v46, 3  ;;  %v2087_v36 = vrot.slane %v2017_v47, 4 }
  0xfc   : > { %3869 = vrcp.f32 %v2611_v52  ;;  %v2544_v10 = vsub.f32 %v4566_v25, %v2473_v54  ;;  %v2233_v56 = vrot.slane %v2163_v48, 5  ;;  %v2309_v33 = vmul.f32 %v4296_v29, %v1489_v35 }
  0xfd   : > { %v1344_v57 = vrot.slane %v1343_v17, 1  ;;  %v260_v4 = vadd.f32 %v259_v1, %v258_v11  ;;  %v434_v59 = vsel %vm215_vm0, %v366_v32, 0.0  ;;  %v562_v44 = vsel %vm215_vm0, %v510_v62, 0.0 }
  0xfe   : > { %v2564_v6 = vmul.f32 1.442695, %v2544_v10  ;;  %v2379_v3 = vrot.slane %v2309_v33, 6  ;;  %v435_v0 = vrot.slane %v434_v59, 4  ;;  %v563_v55 = vrot.slane %v562_v44, 4 }
  0xff   : > { %v1345_v7 = vadd.f32 %v1344_v57, %v1343_v17  ;;  %v261_v63 = vrot.slane %v260_v4, 2  ;;  %v670_v60 = vrot.slane %v638_v39, 4  ;;  %v866_v25 = vsel %vm215_vm0, %v814_v51, 0.0  ;;  %v1118_v51 = vld [vmem:[%s4221_s18 + $0xf0] sm:$0xf] }
 0x100   : > { %3871 = vpow2.f32 %v2564_v6  ;;  %v436_v16 = vadd.f32 %v435_v0, %v434_v59  ;;  %v564_v15 = vadd.f32 %v563_v55, %v562_v44  ;;  %v867_v18 = vrot.slane %v866_v25, 4 }
 0x101   : > { %v1523_v11 = vsel %vm1517_vm6, %v1506_v34, %v1345_v7  ;;  %v262_v2 = vadd.f32 %v261_v63, %v260_v4  ;;  %v738_v19 = vsel %vm215_vm0, %v670_v60, 0.0  ;;  %v974_v20 = vrot.slane %v942_v5, 4  ;;  %v1246_v7 = vld [vmem:[%s4221_s18 + $0xf0] sm:$0xf0] }
 0x102   : > { %v1539_v23 = vsel %vm1416_vm1, %v1523_v11, 0.0  ;;  %v437_v24 = vrot.slane %v436_v16, 2  ;;  %v565_v28 = vrot.slane %v564_v15, 2  ;;  %v739_v31 = vrot.slane %v738_v19, 4 }
 0x103   : > { %v1583_v1 = vmul.f32 %v4272_v9, %v1539_v23  ;;  %v1729_v27 = vmul.f32 %v4276_v13, %v1539_v23  ;;  %v1875_v35 = vmul.f32 %v4279_v14, %v1539_v23  ;;  %v2021_v32 = vmul.f32 %v4287_v21, %v1539_v23 }
 0x104   : > { %v2167_v37 = vmul.f32 %v4290_v22, %v1539_v23  ;;  %v2313_v34 = vmul.f32 %v4296_v29, %v1539_v23  ;;  %v263_v38 = vrot.slane %v262_v2, 1  ;;  %v438_v40 = vadd.f32 %v437_v24, %v436_v16 }
 0x105   : > { %v1650_v45 = vrot.slane %v1583_v1, 1  ;;  %v1796_v61 = vrot.slane %v1729_v27, 2  ;;  %v1942_v46 = vrot.slane %v1875_v35, 3  ;;  %v2088_v47 = vrot.slane %v2021_v32, 4 }
 0x106   : > { %v2234_v52 = vrot.slane %v2167_v37, 5  ;;  %v2380_v54 = vrot.slane %v2313_v34, 6  ;;  %v264_v48 = vadd.f32 %v263_v38, %v262_v2  ;;  %v439_v62 = vrot.slane %v438_v40, 1  ;;  %v3920_v37 = vld [vmem:[%s4221_s18 + $0x18] sm:$0xf] }
 0x107   : > { %v1651_v17 = vsel %vm1483_vm4, %v1649_v58, %v1650_v45  ;;  %v1797_v10 = vsel %vm1466_vm3, %v1795_v12, %v1796_v61  ;;  %v1943_v33 = vsel %vm1449_vm2, %v1941_v50, %v1942_v46  ;;  %v2089_v39 = vsel %vm215_vm0, %v2087_v36, %v2088_v47  ;;  %v206_v61 = vld [vmem:[%s4221_s18 + $0x98] sm:$0xf] }
 0x108   : > { %v1703_v57 = vadd.f32 %v1651_v17, %v4590_v49  ;;  %v2235_v4 = vsel %vm1416_vm1, %v2233_v56, %v2234_v52  ;;  %v2381_v59 = vsel %vm1517_vm6, %v2379_v3, %v2380_v54  ;;  %v440_v44 = vadd.f32 %v439_v62, %v438_v40 }
 0x109   : > { %v3870_v5 = vpop.eup %3869  ;;  %v566_v6 = vadd.f32 %v565_v28, %v564_v15  ;;  %v740_v0 = vadd.f32 %v739_v31, %v738_v19  ;;  %v868_v55 = vadd.f32 %v867_v18, %v866_v25  ;;  %v1042_v58 = vsel %vm215_vm0, %v974_v20, 0.0 }
 0x10a   : > { %v2691_v12 = vmul.f32 4.0, %v3870_v5  ;;  %v1849_v63 = vadd.f32 %v1797_v10, %v1703_v57  ;;  %v1043_v50 = vrot.slane %v1042_v58, 4  ;;  %v1170_v36 = vsel %vm215_vm0, %v1118_v51, 0.0  ;;  %v335_v5 = vld [vmem:[%s4221_s18 + $0x98] sm:$0xf0] }
 0x10b   : > { %v567_v60 = vrot.slane %v566_v6, 1  ;;  %v741_v16 = vrot.slane %v740_v0, 2  ;;  %v869_v49 = vrot.slane %v868_v55, 2  ;;  %v1171_v11 = vrot.slane %v1170_v36, 4 }
 0x10c   : > { %v4630_v56 = vmul.f32 %v4568_v53, %v2691_v12  ;;  %v1995_v3 = vadd.f32 %v1943_v33, %v1849_v63  ;;  %v1044_v15 = vadd.f32 %v1043_v50, %v1042_v58  ;;  %v1278_v2 = vrot.slane %v1246_v7, 4 }
 0x10d   : > { %v4632_v25 = vpop.eup %3871  ;;  %v568_v18 = vadd.f32 %v567_v60, %v566_v6  ;;  %v742_v19 = vadd.f32 %v741_v16, %v740_v0  ;;  %v870_v20 = vadd.f32 %v869_v49, %v868_v55  ;;  %v1172_v23 = vadd.f32 %v1171_v11, %v1170_v36 }
 0x10e   : > { %v2747_v24 = vrot.slane %v4630_v56, %v4314_v43  ;;  %v2612_v28 = vrot.slane %v4632_v25, 4  ;;  %v2141_v31 = vadd.f32 %v2089_v39, %v1995_v3  ;;  %v1045_v53 = vrot.slane %v1044_v15, 2 }
 0x10f   : > { %v743_v1 = vrot.slane %v742_v19, 1  ;;  %v871_v27 = vrot.slane %v870_v20, 1  ;;  %v1173_v35 = vrot.slane %v1172_v23, 2  ;;  %v1346_v32 = vsel %vm215_vm0, %v1278_v2, 0.0 }
 0x110   : > { %v2799_v34 = vmul.f32 %v3920_v37, %v2747_v24  ;;  %v2613_v38 = vadd.f32 %v4632_v25, %v2612_v28  ;;  %v2287_v40 = vadd.f32 %v2235_v4, %v2141_v31  ;;  %v1046_v45 = vadd.f32 %v1045_v53, %v1044_v15  ;;  %v511_v28 = vld [vmem:[%s4221_s18 + $0xb8] sm:$0xf] }
 0x111   : > { %v744_v46 = vadd.f32 %v743_v1, %v742_v19  ;;  %v872_v47 = vadd.f32 %v871_v27, %v870_v20  ;;  %v1174_v52 = vadd.f32 %v1173_v35, %v1172_v23  ;;  %v1347_v54 = vrot.slane %v1346_v32, 4 }
 0x112   : > { %2815 = vst [vmem:[%s4455_s25 + $0x18] sm:$0xf] %v2799_v34  ;;  %v2614_v62 = vrot.slane %v2613_v38, 2  ;;  %v4642_v17 = vadd.f32 %v2381_v59, %v2287_v40  ;;  %v1047_v10 = vrot.slane %v1046_v45, 1  ;;  %v1423_v33 = vsel %vm1416_vm1, 0.0, %v264_v48 }
 0x113   : > { %v1175_v39 = vrot.slane %v1174_v52, 1  ;;  %v1348_v51 = vadd.f32 %v1347_v54, %v1346_v32  ;;  %v1439_v57 = vsel %vm215_vm0, %v1423_v33, %v440_v44  ;;  %v265_v4 = vsel %vm215_vm0, %v206_v61, 0.0  ;;  %v639_v34 = vld [vmem:[%s4221_s18 + $0xb8] sm:$0xf0] }
 0x114   : > { %v2615_v6 = vadd.f32 %v2614_v62, %v2613_v38  ;;  %v2474_v0 = vrot.slane %v4642_v17, 4  ;;  %v1048_v55 = vadd.f32 %v1047_v10, %v1046_v45  ;;  %v1456_v58 = vsel %vm1449_vm2, %v1439_v57, %v568_v18 }
 0x115   : > { %v1176_v7 = vadd.f32 %v1175_v39, %v1174_v52  ;;  %v1349_v12 = vrot.slane %v1348_v51, 2  ;;  %v1473_v59 = vsel %vm1466_vm3, %v1456_v58, %v744_v46  ;;  %v266_v63 = vrot.slane %v265_v4, 4 }
 0x116   : > { %v2616_v50 = vrot.slane %v2615_v6, 1  ;;  %v2475_v48 = vmax.f32 %v4642_v17, %v2474_v0  ;;  %v1490_v44 = vsel %vm1483_vm4, %v1473_v59, %v872_v47  ;;  %v367_v36 = vrot.slane %v335_v5, 4 }
 0x117   : > { %v1350_v60 = vadd.f32 %v1349_v12, %v1348_v51  ;;  %v1507_v16 = vsel %vm1500_vm5, %v1048_v55, %v1176_v7  ;;  %v1558_v49 = vmul.f32 %v4269_v8, %v1490_v44  ;;  %v1580_v11 = vmul.f32 %v4272_v9, %v1490_v44 }
 0x118   : > { %v2617_v3 = vadd.f32 %v2616_v50, %v2615_v6  ;;  %v2476_v15 = vrot.slane %v2475_v48, 2  ;;  %v1726_v2 = vmul.f32 %v4276_v13, %v1490_v44  ;;  %v1872_v18 = vmul.f32 %v4279_v14, %v1490_v44 }
 0x119   : > { %v1351_v19 = vrot.slane %v1350_v60, 1  ;;  %v1652_v20 = vrot.slane %v1580_v11, 1  ;;  %v2018_v23 = vmul.f32 %v4287_v21, %v1490_v44  ;;  %v2164_v24 = vmul.f32 %v4290_v22, %v1490_v44 }
 0x11a   : > { %3873 = vrcp.f32 %v2617_v3  ;;  %v2477_v31 = vmax.f32 %v2475_v48, %v2476_v15  ;;  %v1798_v53 = vrot.slane %v1726_v2, 2  ;;  %v1944_v1 = vrot.slane %v1872_v18, 3  ;;  %v815_v3 = vld [vmem:[%s4221_s18 + $0xd8] sm:$0xf]  ;;  %v943_v15 = vld [vmem:[%s4221_s18 + $0xd8] sm:$0xf0] }
 0x11b   : > { %v1352_v27 = vadd.f32 %v1351_v19, %v1350_v60  ;;  %v2090_v35 = vrot.slane %v2018_v23, 4  ;;  %v2236_v32 = vrot.slane %v2164_v24, 5  ;;  %v2310_v37 = vmul.f32 %v4296_v29, %v1490_v44  ;;  %v1119_v23 = vld [vmem:[%s4221_s18 + $0xf8] sm:$0xf] }
 0x11c   : > { %v2478_v38 = vrot.slane %v2477_v31, 1  ;;  %v267_v40 = vadd.f32 %v266_v63, %v265_v4  ;;  %v441_v45 = vsel %vm215_vm0, %v367_v36, 0.0  ;;  %v569_v61 = vsel %vm215_vm0, %v511_v28, 0.0 }
 0x11d   : > { %v1524_v46 = vsel %vm1517_vm6, %v1507_v16, %v1352_v27  ;;  %v2382_v47 = vrot.slane %v2310_v37, 6  ;;  %v442_v52 = vrot.slane %v441_v45, 4  ;;  %v570_v54 = vrot.slane %v569_v61, 4 }
 0x11e   : > { %v2479_v62 = vmax.f32 %v2477_v31, %v2478_v38  ;;  %v1540_v10 = vsel %vm1416_vm1, %v1524_v46, 0.0  ;;  %v268_v33 = vrot.slane %v267_v40, 2  ;;  %v671_v39 = vrot.slane %v639_v34, 4 }
 0x11f   : > { %v1584_v51 = vmul.f32 %v4272_v9, %v1540_v10  ;;  %v1730_v57 = vmul.f32 %v4276_v13, %v1540_v10  ;;  %v1876_v4 = vmul.f32 %v4279_v14, %v1540_v10  ;;  %v2022_v5 = vmul.f32 %v4287_v21, %v1540_v10 }
 0x120   : > { %v2545_v6 = vsub.f32 %v4642_v17, %v2479_v62  ;;  %v2168_v0 = vmul.f32 %v4290_v22, %v1540_v10  ;;  %v2314_v55 = vmul.f32 %v4296_v29, %v1540_v10  ;;  %v269_v58 = vadd.f32 %v268_v33, %v267_v40 }
 0x121   : > { %v1653_v7 = vrot.slane %v1584_v51, 1  ;;  %v1799_v12 = vrot.slane %v1730_v57, 2  ;;  %v1945_v59 = vrot.slane %v1876_v4, 3  ;;  %v2091_v63 = vrot.slane %v2022_v5, 4 }
 0x122   : > { %v2566_v50 = vmul.f32 1.442695, %v2545_v6  ;;  %v2237_v48 = vrot.slane %v2168_v0, 5  ;;  %v2383_v44 = vrot.slane %v2314_v55, 6  ;;  %v270_v36 = vrot.slane %v269_v58, 1 }
 0x123   : > { %v1654_v60 = vsel %vm1483_vm4, %v1652_v20, %v1653_v7  ;;  %v1800_v17 = vsel %vm1466_vm3, %v1798_v53, %v1799_v12  ;;  %v1946_v16 = vsel %vm1449_vm2, %v1944_v1, %v1945_v59  ;;  %v2092_v11 = vsel %vm215_vm0, %v2090_v35, %v2091_v63  ;;  %v1247_v12 = vld [vmem:[%s4221_s18 + $0xf8] sm:$0xf0] }
 0x124   : > { %3875 = vpow2.f32 %v2566_v50  ;;  %v1704_v2 = vadd.f32 %v1654_v60, %v1558_v49  ;;  %v2238_v18 = vsel %vm1416_vm1, %v2236_v32, %v2237_v48  ;;  %v2384_v19 = vsel %vm1517_vm6, %v2382_v47, %v2383_v44  ;;  %v3921_v48 = vld [vmem:[%s4221_s18 + $0x80] sm:$0xf] }
 0x125   : > { %v271_v24 = vadd.f32 %v270_v36, %v269_v58  ;;  %v443_v28 = vadd.f32 %v442_v52, %v441_v45  ;;  %v571_v31 = vadd.f32 %v570_v54, %v569_v61  ;;  %v745_v20 = vsel %vm215_vm0, %v671_v39, 0.0 }
 0x126   : > { %v1850_v27 = vadd.f32 %v1800_v17, %v1704_v2  ;;  %v746_v53 = vrot.slane %v745_v20, 4  ;;  %v873_v1 = vsel %vm215_vm0, %v815_v3, 0.0  ;;  %v975_v37 = vrot.slane %v943_v15, 4 }
 0x127   : > { %v3874_v35 = vpop.eup %3873  ;;  %v444_v34 = vrot.slane %v443_v28, 2  ;;  %v572_v38 = vrot.slane %v571_v31, 2  ;;  %v874_v40 = vrot.slane %v873_v1, 4  ;;  %v1177_v49 = vsel %vm215_vm0, %v1119_v23, 0.0 }
 0x128   : > { %v2693_v32 = vmul.f32 4.0, %v3874_v35  ;;  %v1996_v46 = vadd.f32 %v1946_v16, %v1850_v27  ;;  %v747_v47 = vadd.f32 %v746_v53, %v745_v20  ;;  %v1049_v62 = vsel %vm215_vm0, %v975_v37, 0.0  ;;  %v336_v20 = vld [vmem:[%s4221_s18 + $0x100] sm:$0xf0] }
 0x129   : > { %v445_v45 = vadd.f32 %v444_v34, %v443_v28  ;;  %v573_v61 = vadd.f32 %v572_v38, %v571_v31  ;;  %v875_v52 = vadd.f32 %v874_v40, %v873_v1  ;;  %v1050_v54 = vrot.slane %v1049_v62, 4  ;;  %v207_v31 = vld [vmem:[%s4221_s18 + $0x100] sm:$0xf] }
 0x12a   : > { %v4688_v10 = vmul.f32 %v4632_v25, %v2693_v32  ;;  %v2142_v33 = vadd.f32 %v2092_v11, %v1996_v46  ;;  %v748_v39 = vrot.slane %v747_v47, 2  ;;  %v1178_v51 = vrot.slane %v1177_v49, 4  ;;  %v512_v40 = vld [vmem:[%s4221_s18 + $0x120] sm:$0xf] }
 0x12b   : > { %v446_v57 = vrot.slane %v445_v45, 1  ;;  %v574_v4 = vrot.slane %v573_v61, 1  ;;  %v876_v5 = vrot.slane %v875_v52, 2  ;;  %v1051_v6 = vadd.f32 %v1050_v54, %v1049_v62 }
 0x12c   : > { %v2751_v0 = vrot.slane %v4688_v10, %v4314_v43  ;;  %v2288_v55 = vadd.f32 %v2238_v18, %v2142_v33  ;;  %v749_v58 = vadd.f32 %v748_v39, %v747_v47  ;;  %v1179_v7 = vadd.f32 %v1178_v51, %v1177_v49 }
 0x12d   : > { %v447_v59 = vadd.f32 %v446_v57, %v445_v45  ;;  %v575_v63 = vadd.f32 %v574_v4, %v573_v61  ;;  %v877_v25 = vadd.f32 %v876_v5, %v875_v52  ;;  %v1052_v50 = vrot.slane %v1051_v6, 2 }
 0x12e   : > { %v2800_v44 = vmul.f32 %v3921_v48, %v2751_v0  ;;  %v4694_v36 = vadd.f32 %v2384_v19, %v2288_v55  ;;  %v750_v60 = vrot.slane %v749_v58, 1  ;;  %v1180_v17 = vrot.slane %v1179_v7, 2 }
 0x12f   : > { %v878_v16 = vrot.slane %v877_v25, 1  ;;  %v1053_v11 = vadd.f32 %v1052_v50, %v1051_v6  ;;  %v1279_v3 = vrot.slane %v1247_v12, 4  ;;  %v1424_v15 = vsel %vm1416_vm1, 0.0, %v271_v24 }
 0x130   : > { %2816 = vst [vmem:[%s4455_s25 + $0x80] sm:$0xf] %v2800_v44  ;;  %v2480_v2 = vrot.slane %v4694_v36, 4  ;;  %v751_v18 = vadd.f32 %v750_v60, %v749_v58  ;;  %v1181_v23 = vadd.f32 %v1180_v17, %v1179_v7  ;;  %v1440_v28 = vsel %vm215_vm0, %v1424_v15, %v447_v59  ;;  %v640_v15 = vld [vmem:[%s4221_s18 + $0x120] sm:$0xf0] }
 0x131   : > { %v4702_v27 = vpop.eup %3875  ;;  %v879_v19 = vadd.f32 %v878_v16, %v877_v25  ;;  %v1054_v53 = vrot.slane %v1053_v11, 1  ;;  %v1353_v1 = vsel %vm215_vm0, %v1279_v3, 0.0  ;;  %v1457_v37 = vsel %vm1449_vm2, %v1440_v28, %v575_v63 }
 0x132   : > { %v2618_v24 = vrot.slane %v4702_v27, 4  ;;  %v2481_v35 = vmax.f32 %v4694_v36, %v2480_v2  ;;  %v1182_v34 = vrot.slane %v1181_v23, 1  ;;  %v1354_v38 = vrot.slane %v1353_v1, 4 }
 0x133   : > { %v1055_v49 = vadd.f32 %v1054_v53, %v1053_v11  ;;  %v1474_v32 = vsel %vm1466_vm3, %v1457_v37, %v751_v18  ;;  %v272_v46 = vsel %vm215_vm0, %v207_v31, 0.0  ;;  %v368_v47 = vrot.slane %v336_v20, 4 }
 0x134   : > { %v2619_v62 = vadd.f32 %v4702_v27, %v2618_v24  ;;  %v2482_v45 = vrot.slane %v2481_v35, 2  ;;  %v1183_v61 = vadd.f32 %v1182_v34, %v1181_v23  ;;  %v1355_v52 = vadd.f32 %v1354_v38, %v1353_v1 }
 0x135   : > { %v1491_v54 = vsel %vm1483_vm4, %v1474_v32, %v879_v19  ;;  %v273_v33 = vrot.slane %v272_v46, 4  ;;  %v448_v39 = vsel %vm215_vm0, %v368_v47, 0.0  ;;  %v576_v51 = vsel %vm215_vm0, %v512_v40, 0.0 }
 0x136   : > { %v2620_v57 = vrot.slane %v2619_v62, 2  ;;  %v2483_v4 = vmax.f32 %v2481_v35, %v2482_v45  ;;  %v1356_v5 = vrot.slane %v1355_v52, 2  ;;  %v1508_v6 = vsel %vm1500_vm5, %v1055_v49, %v1183_v61 }
 0x137   : > { %v1559_v0 = vmul.f32 %v4269_v8, %v1491_v54  ;;  %v1581_v55 = vmul.f32 %v4272_v9, %v1491_v54  ;;  %v1727_v58 = vmul.f32 %v4276_v13, %v1491_v54  ;;  %v1873_v7 = vmul.f32 %v4279_v14, %v1491_v54 }
 0x138   : > { %v2621_v12 = vadd.f32 %v2620_v57, %v2619_v62  ;;  %v2484_v59 = vrot.slane %v2483_v4, 1  ;;  %v1357_v63 = vadd.f32 %v1356_v5, %v1355_v52  ;;  %v2019_v25 = vmul.f32 %v4287_v21, %v1491_v54 }
 0x139   : > { %v1655_v50 = vrot.slane %v1581_v55, 1  ;;  %v1801_v48 = vrot.slane %v1727_v58, 2  ;;  %v1947_v44 = vrot.slane %v1873_v7, 3  ;;  %v2165_v60 = vmul.f32 %v4290_v22, %v1491_v54  ;;  %v816_v7 = vld [vmem:[%s4221_s18 + $0x140] sm:$0xf] }
 0x13a   : > { %v2622_v17 = vrot.slane %v2621_v12, 1  ;;  %v2485_v16 = vmax.f32 %v2483_v4, %v2484_v59  ;;  %v1358_v11 = vrot.slane %v1357_v63, 1  ;;  %v2093_v3 = vrot.slane %v2019_v25, 4 }
 0x13b   : > { %v2239_v2 = vrot.slane %v2165_v60, 5  ;;  %v2311_v18 = vmul.f32 %v4296_v29, %v1491_v54  ;;  %v274_v23 = vadd.f32 %v273_v33, %v272_v46  ;;  %v449_v28 = vrot.slane %v448_v39, 4  ;;  %v944_v60 = vld [vmem:[%s4221_s18 + $0x140] sm:$0xf0] }
 0x13c   : > { %v2623_v31 = vadd.f32 %v2622_v17, %v2621_v12  ;;  %v2546_v20 = vsub.f32 %v4694_v36, %v2485_v16  ;;  %v1359_v19 = vadd.f32 %v1358_v11, %v1357_v63  ;;  %v577_v53 = vrot.slane %v576_v51, 4  ;;  %v1120_v17 = vld [vmem:[%s4221_s18 + $0x160] sm:$0xf] }
 0x13d   : > { %v2385_v1 = vrot.slane %v2311_v18, 6  ;;  %v275_v37 = vrot.slane %v274_v23, 2  ;;  %v450_v24 = vadd.f32 %v449_v28, %v448_v39  ;;  %v672_v35 = vrot.slane %v640_v15, 4 }
 0x13e   : > { %3877 = vrcp.f32 %v2623_v31  ;;  %v2568_v34 = vmul.f32 1.442695, %v2546_v20  ;;  %v1525_v38 = vsel %vm1517_vm6, %v1508_v6, %v1359_v19  ;;  %v578_v40 = vadd.f32 %v577_v53, %v576_v51 }
 0x13f   : > { %v1541_v49 = vsel %vm1416_vm1, %v1525_v38, 0.0  ;;  %v276_v32 = vadd.f32 %v275_v37, %v274_v23  ;;  %v451_v47 = vrot.slane %v450_v24, 2  ;;  %v752_v46 = vsel %vm215_vm0, %v672_v35, 0.0  ;;  %v1248_v23 = vld [vmem:[%s4221_s18 + $0x160] sm:$0xf0] }
 0x140   : > { %3879 = vpow2.f32 %v2568_v34  ;;  %v1585_v36 = vmul.f32 %v4272_v9, %v1541_v49  ;;  %v1731_v62 = vmul.f32 %v4276_v13, %v1541_v49  ;;  %v1877_v45 = vmul.f32 %v4279_v14, %v1541_v49 }
 0x141   : > { %v2023_v61 = vmul.f32 %v4287_v21, %v1541_v49  ;;  %v2169_v52 = vmul.f32 %v4290_v22, %v1541_v49  ;;  %v2315_v54 = vmul.f32 %v4296_v29, %v1541_v49  ;;  %v277_v33 = vrot.slane %v276_v32, 1 }
 0x142   : > { %v1656_v39 = vrot.slane %v1585_v36, 1  ;;  %v1802_v51 = vrot.slane %v1731_v62, 2  ;;  %v1948_v57 = vrot.slane %v1877_v45, 3  ;;  %v452_v4 = vadd.f32 %v451_v47, %v450_v24 }
 0x143   : > { %v2094_v5 = vrot.slane %v2023_v61, 4  ;;  %v2240_v6 = vrot.slane %v2169_v52, 5  ;;  %v2386_v55 = vrot.slane %v2315_v54, 6  ;;  %v278_v58 = vadd.f32 %v277_v33, %v276_v32 }
 0x144   : > { %v1657_v12 = vsel %vm1483_vm4, %v1655_v50, %v1656_v39  ;;  %v1803_v59 = vsel %vm1466_vm3, %v1801_v48, %v1802_v51  ;;  %v1949_v63 = vsel %vm1449_vm2, %v1947_v44, %v1948_v57  ;;  %v453_v25 = vrot.slane %v452_v4, 1 }
 0x145   : > { %v1705_v16 = vadd.f32 %v1657_v12, %v1559_v0  ;;  %v2095_v11 = vsel %vm215_vm0, %v2093_v3, %v2094_v5  ;;  %v2241_v15 = vsel %vm1416_vm1, %v2239_v2, %v2240_v6  ;;  %v2387_v18 = vsel %vm1517_vm6, %v2385_v1, %v2386_v55 }
 0x146   : > { %v454_v28 = vadd.f32 %v453_v25, %v452_v4  ;;  %v579_v31 = vrot.slane %v578_v40, 2  ;;  %v753_v20 = vrot.slane %v752_v46, 4  ;;  %v880_v50 = vsel %vm215_vm0, %v816_v7, 0.0 }
 0x147   : > { %v1851_v19 = vadd.f32 %v1803_v59, %v1705_v16  ;;  %v881_v48 = vrot.slane %v880_v50, 4  ;;  %v976_v53 = vrot.slane %v944_v60, 4  ;;  %v1184_v44 = vsel %vm215_vm0, %v1120_v17, 0.0 }
 0x148   : > { %v580_v37 = vadd.f32 %v579_v31, %v578_v40  ;;  %v754_v24 = vadd.f32 %v753_v20, %v752_v46  ;;  %v1185_v0 = vrot.slane %v1184_v44, 4  ;;  %v1280_v35 = vrot.slane %v1248_v23, 4  ;;  %v208_v31 = vld [vmem:[%s4221_s18 + $0x108] sm:$0xf] }
 0x149   : > { %v1997_v3 = vadd.f32 %v1949_v63, %v1851_v19  ;;  %v882_v34 = vadd.f32 %v881_v48, %v880_v50  ;;  %v1056_v2 = vsel %vm215_vm0, %v976_v53, 0.0  ;;  %v1425_v1 = vsel %vm1416_vm1, 0.0, %v278_v58  ;;  %v3922_v20 = vld [vmem:[%s4221_s18 + $0x88] sm:$0xf] }
 0x14a   : > { %v581_v38 = vrot.slane %v580_v37, 1  ;;  %v755_v49 = vrot.slane %v754_v24, 2  ;;  %v1057_v32 = vrot.slane %v1056_v2, 4  ;;  %v1186_v47 = vadd.f32 %v1185_v0, %v1184_v44 }
 0x14b   : > { %v3878_v36 = vpop.eup %3877  ;;  %v2143_v62 = vadd.f32 %v2095_v11, %v1997_v3  ;;  %v883_v45 = vrot.slane %v882_v34, 2  ;;  %v1360_v61 = vsel %vm215_vm0, %v1280_v35, 0.0  ;;  %v1441_v40 = vsel %vm215_vm0, %v1425_v1, %v454_v28 }
 0x14c   : > { %v2695_v46 = vmul.f32 4.0, %v3878_v36  ;;  %v582_v52 = vadd.f32 %v581_v38, %v580_v37  ;;  %v756_v54 = vadd.f32 %v755_v49, %v754_v24  ;;  %v1058_v33 = vadd.f32 %v1057_v32, %v1056_v2 }
 0x14d   : > { %v4750_v39 = vpop.eup %3879  ;;  %v2289_v51 = vadd.f32 %v2241_v15, %v2143_v62  ;;  %v884_v57 = vadd.f32 %v883_v45, %v882_v34  ;;  %v1187_v4 = vrot.slane %v1186_v47, 2  ;;  %v1361_v5 = vrot.slane %v1360_v61, 4 }
 0x14e   : > { %v4753_v6 = vmul.f32 %v4702_v27, %v2695_v46  ;;  %v2624_v55 = vrot.slane %v4750_v39, 4  ;;  %v757_v58 = vrot.slane %v756_v54, 1  ;;  %v1059_v7 = vrot.slane %v1058_v33, 2 }
 0x14f   : > { %v4756_v12 = vadd.f32 %v2387_v18, %v2289_v51  ;;  %v885_v59 = vrot.slane %v884_v57, 1  ;;  %v1188_v63 = vadd.f32 %v1187_v4, %v1186_v47  ;;  %v1362_v25 = vadd.f32 %v1361_v5, %v1360_v61 }
 0x150   : > { %v2755_v60 = vrot.slane %v4753_v6, %v4314_v43  ;;  %v2625_v17 = vadd.f32 %v4750_v39, %v2624_v55  ;;  %v758_v16 = vadd.f32 %v757_v58, %v756_v54  ;;  %v1060_v27 = vadd.f32 %v1059_v7, %v1058_v33 }
 0x151   : > { %v2486_v11 = vrot.slane %v4756_v12, 4  ;;  %v886_v15 = vadd.f32 %v885_v59, %v884_v57  ;;  %v1189_v23 = vrot.slane %v1188_v63, 1  ;;  %v1363_v28 = vrot.slane %v1362_v25, 2 }
 0x152   : > { %v2801_v18 = vmul.f32 %v3922_v20, %v2755_v60  ;;  %v2626_v50 = vrot.slane %v2625_v17, 2  ;;  %v1061_v19 = vrot.slane %v1060_v27, 1  ;;  %v1458_v48 = vsel %vm1449_vm2, %v1441_v40, %v582_v52 }
 0x153   : > { %v2487_v53 = vmax.f32 %v4756_v12, %v2486_v11  ;;  %v1190_v44 = vadd.f32 %v1189_v23, %v1188_v63  ;;  %v1364_v37 = vadd.f32 %v1363_v28, %v1362_v25  ;;  %v1475_v24 = vsel %vm1466_vm3, %v1458_v48, %v758_v16 }
 0x154   : > { %2817 = vst [vmem:[%s4455_s25 + $0x88] sm:$0xf] %v2801_v18  ;;  %v2627_v0 = vadd.f32 %v2626_v50, %v2625_v17  ;;  %v1062_v35 = vadd.f32 %v1061_v19, %v1060_v27  ;;  %v1492_v3 = vsel %vm1483_vm4, %v1475_v24, %v886_v15  ;;  %v279_v34 = vsel %vm215_vm0, %v208_v31, 0.0  ;;  %v337_v18 = vld [vmem:[%s4221_s18 + $0x108] sm:$0xf0] }
 0x155   : > { %v2488_v2 = vrot.slane %v2487_v53, 2  ;;  %v1365_v1 = vrot.slane %v1364_v37, 1  ;;  %v1560_v38 = vmul.f32 %v4269_v8, %v1492_v3  ;;  %v1586_v49 = vmul.f32 %v4272_v9, %v1492_v3 }
 0x156   : > { %v2628_v32 = vrot.slane %v2627_v0, 1  ;;  %v1509_v47 = vsel %vm1500_vm5, %v1062_v35, %v1190_v44  ;;  %v1732_v36 = vmul.f32 %v4276_v13, %v1492_v3  ;;  %v1878_v62 = vmul.f32 %v4279_v14, %v1492_v3  ;;  %v513_v44 = vld [vmem:[%s4221_s18 + $0x128] sm:$0xf] }
 0x157   : > { %v2489_v45 = vmax.f32 %v2487_v53, %v2488_v2  ;;  %v1366_v61 = vadd.f32 %v1365_v1, %v1364_v37  ;;  %v1658_v40 = vrot.slane %v1586_v49, 1  ;;  %v2024_v46 = vmul.f32 %v4287_v21, %v1492_v3  ;;  %v817_v2 = vld [vmem:[%s4221_s18 + $0x148] sm:$0xf] }
 0x158   : > { %v2629_v52 = vadd.f32 %v2628_v32, %v2627_v0  ;;  %v1804_v54 = vrot.slane %v1732_v36, 2  ;;  %v1950_v33 = vrot.slane %v1878_v62, 3  ;;  %v2170_v51 = vmul.f32 %v4290_v22, %v1492_v3 }
 0x159   : > { %v2490_v57 = vrot.slane %v2489_v45, 1  ;;  %v1526_v4 = vsel %vm1517_vm6, %v1509_v47, %v1366_v61  ;;  %v2096_v5 = vrot.slane %v2024_v46, 4  ;;  %v2316_v55 = vmul.f32 %v4296_v29, %v1492_v3  ;;  %v641_v3 = vld [vmem:[%s4221_s18 + $0x128] sm:$0xf0] }
 0x15a   : > { %3881 = vrcp.f32 %v2629_v52  ;;  %v1542_v58 = vsel %vm1416_vm1, %v1526_v4, 0.0  ;;  %v2242_v7 = vrot.slane %v2170_v51, 5  ;;  %v280_v59 = vrot.slane %v279_v34, 4  ;;  %v945_v47 = vld [vmem:[%s4221_s18 + $0x148] sm:$0xf0] }
 0x15b   : > { %v2491_v63 = vmax.f32 %v2489_v45, %v2490_v57  ;;  %v1590_v25 = vmul.f32 %v4272_v9, %v1542_v58  ;;  %v1736_v60 = vmul.f32 %v4276_v13, %v1542_v58  ;;  %v1882_v17 = vmul.f32 %v4279_v14, %v1542_v58 }
 0x15c   : > { %v2028_v16 = vmul.f32 %v4287_v21, %v1542_v58  ;;  %v2174_v27 = vmul.f32 %v4290_v22, %v1542_v58  ;;  %v2320_v11 = vmul.f32 %v4296_v29, %v1542_v58  ;;  %v2388_v15 = vrot.slane %v2316_v55, 6  ;;  %v1121_v55 = vld [vmem:[%s4221_s18 + $0x168] sm:$0xf] }
 0x15d   : > { %v2547_v23 = vsub.f32 %v4756_v12, %v2491_v63  ;;  %v1659_v28 = vrot.slane %v1590_v25, 1  ;;  %v1805_v31 = vrot.slane %v1736_v60, 2  ;;  %v1951_v20 = vrot.slane %v1882_v17, 3 }
 0x15e   : > { %v2097_v50 = vrot.slane %v2028_v16, 4  ;;  %v2243_v19 = vrot.slane %v2174_v27, 5  ;;  %v2389_v48 = vrot.slane %v2320_v11, 6  ;;  %v281_v53 = vadd.f32 %v280_v59, %v279_v34 }
 0x15f   : > { %v2570_v37 = vmul.f32 1.442695, %v2547_v23  ;;  %v1660_v24 = vsel %vm1483_vm4, %v1658_v40, %v1659_v28  ;;  %v1806_v0 = vsel %vm1466_vm3, %v1804_v54, %v1805_v31  ;;  %v1952_v35 = vsel %vm1449_vm2, %v1950_v33, %v1951_v20 }
 0x160   : > { %v1706_v12 = vadd.f32 %v1660_v24, %v1560_v38  ;;  %v2098_v1 = vsel %vm215_vm0, %v2096_v5, %v2097_v50  ;;  %v2244_v49 = vsel %vm1416_vm1, %v2242_v7, %v2243_v19  ;;  %v2390_v32 = vsel %vm1517_vm6, %v2388_v15, %v2389_v48 }
 0x161   : > { %3883 = vpow2.f32 %v2570_v37  ;;  %v282_v34 = vrot.slane %v281_v53, 2  ;;  %v369_v36 = vrot.slane %v337_v18, 4  ;;  %v583_v62 = vsel %vm215_vm0, %v513_v44, 0.0 }
 0x162   : > { %v1852_v45 = vadd.f32 %v1806_v0, %v1706_v12  ;;  %v584_v61 = vrot.slane %v583_v62, 4  ;;  %v673_v40 = vrot.slane %v641_v3, 4  ;;  %v887_v46 = vsel %vm215_vm0, %v817_v2, 0.0 }
 0x163   : > { %v283_v52 = vadd.f32 %v282_v34, %v281_v53  ;;  %v455_v38 = vsel %vm215_vm0, %v369_v36, 0.0  ;;  %v888_v54 = vrot.slane %v887_v46, 4  ;;  %v977_v33 = vrot.slane %v945_v47, 4 }
 0x164   : > { %v1998_v51 = vadd.f32 %v1952_v35, %v1852_v45  ;;  %v456_v57 = vrot.slane %v455_v38, 4  ;;  %v585_v4 = vadd.f32 %v584_v61, %v583_v62  ;;  %v759_v5 = vsel %vm215_vm0, %v673_v40, 0.0  ;;  %v209_v40 = vld [vmem:[%s4221_s18 + $0x110] sm:$0xf] }
 0x165   : > { %v284_v58 = vrot.slane %v283_v52, 1  ;;  %v760_v7 = vrot.slane %v759_v5, 4  ;;  %v889_v59 = vadd.f32 %v888_v54, %v887_v46  ;;  %v1063_v63 = vsel %vm215_vm0, %v977_v33, 0.0 }
 0x166   : > { %v2144_v25 = vadd.f32 %v2098_v1, %v1998_v51  ;;  %v457_v60 = vadd.f32 %v456_v57, %v455_v38  ;;  %v586_v17 = vrot.slane %v585_v4, 2  ;;  %v1064_v16 = vrot.slane %v1063_v63, 4 }
 0x167   : > { %v3882_v27 = vpop.eup %3881  ;;  %v285_v11 = vadd.f32 %v284_v58, %v283_v52  ;;  %v761_v15 = vadd.f32 %v760_v7, %v759_v5  ;;  %v890_v23 = vrot.slane %v889_v59, 2  ;;  %v1191_v28 = vsel %vm215_vm0, %v1121_v55, 0.0  ;;  %v3923_v52 = vld [vmem:[%s4221_s18 + $0x90] sm:$0xf]  ;;  %v338_v58 = vld [vmem:[%s4221_s18 + $0x110] sm:$0xf0] }
 0x168   : > { %v2697_v31 = vmul.f32 4.0, %v3882_v27  ;;  %v2290_v20 = vadd.f32 %v2244_v49, %v2144_v25  ;;  %v458_v18 = vrot.slane %v457_v60, 2  ;;  %v587_v50 = vadd.f32 %v586_v17, %v585_v4  ;;  %v1249_v49 = vld [vmem:[%s4221_s18 + $0x168] sm:$0xf0] }
 0x169   : > { %v762_v19 = vrot.slane %v761_v15, 2  ;;  %v891_v48 = vadd.f32 %v890_v23, %v889_v59  ;;  %v1065_v53 = vadd.f32 %v1064_v16, %v1063_v63  ;;  %v1192_v44 = vrot.slane %v1191_v28, 4 }
 0x16a   : > { %v4806_v37 = vmul.f32 %v4750_v39, %v2697_v31  ;;  %v4808_v24 = vadd.f32 %v2390_v32, %v2290_v20  ;;  %v459_v0 = vadd.f32 %v458_v18, %v457_v60  ;;  %v588_v35 = vrot.slane %v587_v50, 1 }
 0x16b   : > { %v763_v3 = vadd.f32 %v762_v19, %v761_v15  ;;  %v892_v2 = vrot.slane %v891_v48, 1  ;;  %v1066_v12 = vrot.slane %v1065_v53, 2  ;;  %v1193_v1 = vadd.f32 %v1192_v44, %v1191_v28 }
 0x16c   : > { %v2759_v47 = vrot.slane %v4806_v37, %v4314_v43  ;;  %v2492_v34 = vrot.slane %v4808_v24, 4  ;;  %v460_v36 = vrot.slane %v459_v0, 1  ;;  %v589_v62 = vadd.f32 %v588_v35, %v587_v50 }
 0x16d   : > { %v764_v39 = vrot.slane %v763_v3, 1  ;;  %v893_v32 = vadd.f32 %v892_v2, %v891_v48  ;;  %v1067_v45 = vadd.f32 %v1066_v12, %v1065_v53  ;;  %v1194_v61 = vrot.slane %v1193_v1, 2 }
 0x16e   : > { %v4815_v46 = vpop.eup %3883  ;;  %v2802_v38 = vmul.f32 %v3923_v52, %v2759_v47  ;;  %v2493_v54 = vmax.f32 %v4808_v24, %v2492_v34  ;;  %v461_v33 = vadd.f32 %v460_v36, %v459_v0  ;;  %v1281_v51 = vrot.slane %v1249_v49, 4  ;;  %v514_v52 = vld [vmem:[%s4221_s18 + $0x130] sm:$0xf] }
 0x16f   : > { %v2630_v57 = vrot.slane %v4815_v46, 4  ;;  %v765_v4 = vadd.f32 %v764_v39, %v763_v3  ;;  %v1068_v5 = vrot.slane %v1067_v45, 1  ;;  %v1195_v55 = vadd.f32 %v1194_v61, %v1193_v1 }
 0x170   : > { %2818 = vst [vmem:[%s4455_s25 + $0x90] sm:$0xf] %v2802_v38  ;;  %v2494_v7 = vrot.slane %v2493_v54, 2  ;;  %v1367_v59 = vsel %vm215_vm0, %v1281_v51, 0.0  ;;  %v1426_v63 = vsel %vm1416_vm1, 0.0, %v285_v11  ;;  %v286_v25 = vsel %vm215_vm0, %v209_v40, 0.0 }
 0x171   : > { %v2631_v60 = vadd.f32 %v4815_v46, %v2630_v57  ;;  %v1069_v17 = vadd.f32 %v1068_v5, %v1067_v45  ;;  %v1196_v16 = vrot.slane %v1195_v55, 1  ;;  %v1368_v27 = vrot.slane %v1367_v59, 4  ;;  %v642_v57 = vld [vmem:[%s4221_s18 + $0x130] sm:$0xf0] }
 0x172   : > { %v2495_v15 = vmax.f32 %v2493_v54, %v2494_v7  ;;  %v1442_v23 = vsel %vm215_vm0, %v1426_v63, %v461_v33  ;;  %v287_v28 = vrot.slane %v286_v25, 4  ;;  %v370_v31 = vrot.slane %v338_v58, 4  ;;  %v818_v7 = vld [vmem:[%s4221_s18 + $0x150] sm:$0xf] }
 0x173   : > { %v2632_v20 = vrot.slane %v2631_v60, 2  ;;  %v1197_v18 = vadd.f32 %v1196_v16, %v1195_v55  ;;  %v1369_v50 = vadd.f32 %v1368_v27, %v1367_v59  ;;  %v1459_v19 = vsel %vm1449_vm2, %v1442_v23, %v589_v62 }
 0x174   : > { %v2496_v48 = vrot.slane %v2495_v15, 1  ;;  %v1476_v11 = vsel %vm1466_vm3, %v1459_v19, %v765_v4  ;;  %v288_v53 = vadd.f32 %v287_v28, %v286_v25  ;;  %v462_v44 = vsel %vm215_vm0, %v370_v31, 0.0 }
 0x175   : > { %v2633_v0 = vadd.f32 %v2632_v20, %v2631_v60  ;;  %v1370_v35 = vrot.slane %v1369_v50, 2  ;;  %v1493_v3 = vsel %vm1483_vm4, %v1476_v11, %v893_v32  ;;  %v1510_v2 = vsel %vm1500_vm5, %v1069_v17, %v1197_v18 }
 0x176   : > { %v2497_v12 = vmax.f32 %v2495_v15, %v2496_v48  ;;  %v1561_v1 = vmul.f32 %v4269_v8, %v1493_v3  ;;  %v1587_v49 = vmul.f32 %v4272_v9, %v1493_v3  ;;  %v1733_v47 = vmul.f32 %v4276_v13, %v1493_v3 }
 0x177   : > { %v2634_v34 = vrot.slane %v2633_v0, 1  ;;  %v1371_v36 = vadd.f32 %v1370_v35, %v1369_v50  ;;  %v1879_v62 = vmul.f32 %v4279_v14, %v1493_v3  ;;  %v2025_v39 = vmul.f32 %v4287_v21, %v1493_v3 }
 0x178   : > { %v2548_v45 = vsub.f32 %v4808_v24, %v2497_v12  ;;  %v1661_v32 = vrot.slane %v1587_v49, 1  ;;  %v1807_v61 = vrot.slane %v1733_v47, 2  ;;  %v2171_v40 = vmul.f32 %v4290_v22, %v1493_v3 }
 0x179   : > { %v2635_v38 = vadd.f32 %v2634_v34, %v2633_v0  ;;  %v1372_v54 = vrot.slane %v1371_v36, 1  ;;  %v1953_v33 = vrot.slane %v1879_v62, 3  ;;  %v2099_v51 = vrot.slane %v2025_v39, 4  ;;  %v946_v39 = vld [vmem:[%s4221_s18 + $0x150] sm:$0xf0] }
 0x17a   : > { %v2572_v4 = vmul.f32 1.442695, %v2548_v45  ;;  %v2245_v5 = vrot.slane %v2171_v40, 5  ;;  %v2317_v55 = vmul.f32 %v4296_v29, %v1493_v3  ;;  %v289_v58 = vrot.slane %v288_v53, 2 }
 0x17b   : > { %3885 = vrcp.f32 %v2635_v38  ;;  %v1373_v59 = vadd.f32 %v1372_v54, %v1371_v36  ;;  %v463_v63 = vrot.slane %v462_v44, 4  ;;  %v590_v24 = vsel %vm215_vm0, %v514_v52, 0.0  ;;  %v1122_v54 = vld [vmem:[%s4221_s18 + $0x170] sm:$0xf] }
 0x17c   : > { %3887 = vpow2.f32 %v2572_v4  ;;  %v2391_v25 = vrot.slane %v2317_v55, 6  ;;  %v290_v60 = vadd.f32 %v289_v58, %v288_v53  ;;  %v591_v17 = vrot.slane %v590_v24, 4 }
 0x17d   : > { %v1527_v16 = vsel %vm1517_vm6, %v1510_v2, %v1373_v59  ;;  %v464_v27 = vadd.f32 %v463_v63, %v462_v44  ;;  %v674_v15 = vrot.slane %v642_v57, 4  ;;  %v894_v23 = vsel %vm215_vm0, %v818_v7, 0.0 }
 0x17e   : > { %v1543_v28 = vsel %vm1416_vm1, %v1527_v16, 0.0  ;;  %v291_v31 = vrot.slane %v290_v60, 1  ;;  %v592_v20 = vadd.f32 %v591_v17, %v590_v24  ;;  %v895_v18 = vrot.slane %v894_v23, 4 }
 0x17f   : > { %v1591_v50 = vmul.f32 %v4272_v9, %v1543_v28  ;;  %v1737_v19 = vmul.f32 %v4276_v13, %v1543_v28  ;;  %v1883_v48 = vmul.f32 %v4279_v14, %v1543_v28  ;;  %v2029_v11 = vmul.f32 %v4287_v21, %v1543_v28 }
 0x180   : > { %v2175_v53 = vmul.f32 %v4290_v22, %v1543_v28  ;;  %v2321_v44 = vmul.f32 %v4296_v29, %v1543_v28  ;;  %v4853_v0 = vadd.f32 %v291_v31, %v290_v60  ;;  %v465_v35 = vrot.slane %v464_v27, 2  ;;  %v1250_v60 = vld [vmem:[%s4221_s18 + $0x170] sm:$0xf0] }
 0x181   : > { %v1662_v3 = vrot.slane %v1591_v50, 1  ;;  %v1808_v2 = vrot.slane %v1737_v19, 2  ;;  %v1954_v12 = vrot.slane %v1883_v48, 3  ;;  %v2100_v49 = vrot.slane %v2029_v11, 4 }
 0x182   : > { %v2246_v47 = vrot.slane %v2175_v53, 5  ;;  %v2392_v34 = vrot.slane %v2321_v44, 6  ;;  %v466_v36 = vadd.f32 %v465_v35, %v464_v27  ;;  %v593_v62 = vrot.slane %v592_v20, 2 }
 0x183   : > { %v1663_v45 = vsel %vm1483_vm4, %v1661_v32, %v1662_v3  ;;  %v1809_v40 = vsel %vm1466_vm3, %v1807_v61, %v1808_v2  ;;  %v1955_v52 = vsel %vm1449_vm2, %v1953_v33, %v1954_v12  ;;  %v2101_v38 = vsel %vm215_vm0, %v2099_v51, %v2100_v49 }
 0x184   : > { %v1707_v57 = vadd.f32 %v1663_v45, %v1561_v1  ;;  %v2247_v4 = vsel %vm1416_vm1, %v2245_v5, %v2246_v47  ;;  %v2393_v55 = vsel %vm1517_vm6, %v2391_v25, %v2392_v34  ;;  %v467_v58 = vrot.slane %v466_v36, 1 }
 0x185   : > { %v594_v7 = vadd.f32 %v593_v62, %v592_v20  ;;  %v766_v59 = vsel %vm215_vm0, %v674_v15, 0.0  ;;  %v896_v63 = vadd.f32 %v895_v18, %v894_v23  ;;  %v978_v24 = vrot.slane %v946_v39, 4 }
 0x186   : > { %v1853_v32 = vadd.f32 %v1809_v40, %v1707_v57  ;;  %v468_v17 = vadd.f32 %v467_v58, %v466_v36  ;;  %v767_v61 = vrot.slane %v766_v59, 4  ;;  %v1198_v33 = vsel %vm215_vm0, %v1122_v54, 0.0  ;;  %v210_v57 = vld [vmem:[%s4221_s18 + $0x118] sm:$0xf] }
 0x187   : > { %v595_v16 = vrot.slane %v594_v7, 1  ;;  %v897_v51 = vrot.slane %v896_v63, 2  ;;  %v1070_v1 = vsel %vm215_vm0, %v978_v24, 0.0  ;;  %v1199_v27 = vrot.slane %v1198_v33, 4  ;;  %v3924_v58 = vld [vmem:[%s4221_s18 + $0x98] sm:$0xf] }
 0x188   : > { %v3886_v5 = vpop.eup %3885  ;;  %v1999_v28 = vadd.f32 %v1955_v52, %v1853_v32  ;;  %v768_v25 = vadd.f32 %v767_v61, %v766_v59  ;;  %v1071_v31 = vrot.slane %v1070_v1, 4  ;;  %v1282_v20 = vrot.slane %v1250_v60, 4 }
 0x189   : > { %v4867_v50 = vpop.eup %3887  ;;  %v2699_v15 = vmul.f32 4.0, %v3886_v5  ;;  %v596_v23 = vadd.f32 %v595_v16, %v594_v7  ;;  %v898_v18 = vadd.f32 %v897_v51, %v896_v63  ;;  %v1200_v19 = vadd.f32 %v1199_v27, %v1198_v33  ;;  %v339_v33 = vld [vmem:[%s4221_s18 + $0x118] sm:$0xf0] }
 0x18a   : > { %v2636_v48 = vrot.slane %v4867_v50, 4  ;;  %v2145_v11 = vadd.f32 %v2101_v38, %v1999_v28  ;;  %v769_v53 = vrot.slane %v768_v25, 2  ;;  %v1072_v44 = vadd.f32 %v1071_v31, %v1070_v1 }
 0x18b   : > { %v4871_v35 = vmul.f32 %v4815_v46, %v2699_v15  ;;  %v899_v3 = vrot.slane %v898_v18, 1  ;;  %v1201_v2 = vrot.slane %v1200_v19, 2  ;;  %v1374_v12 = vsel %vm215_vm0, %v1282_v20, 0.0 }
 0x18c   : > { %v2637_v49 = vadd.f32 %v4867_v50, %v2636_v48  ;;  %v2291_v47 = vadd.f32 %v2247_v4, %v2145_v11  ;;  %v770_v34 = vadd.f32 %v769_v53, %v768_v25  ;;  %v1073_v36 = vrot.slane %v1072_v44, 2 }
 0x18d   : > { %v2763_v62 = vrot.slane %v4871_v35, %v4314_v43  ;;  %v900_v39 = vadd.f32 %v899_v3, %v898_v18  ;;  %v1202_v45 = vadd.f32 %v1201_v2, %v1200_v19  ;;  %v1375_v40 = vrot.slane %v1374_v12, 4 }
 0x18e   : > { %v2638_v46 = vrot.slane %v2637_v49, 2  ;;  %v4877_v52 = vadd.f32 %v2393_v55, %v2291_v47  ;;  %v771_v38 = vrot.slane %v770_v34, 1  ;;  %v1074_v54 = vadd.f32 %v1073_v36, %v1072_v44 }
 0x18f   : > { %v2803_v7 = vmul.f32 %v3924_v58, %v2763_v62  ;;  %v1203_v59 = vrot.slane %v1202_v45, 1  ;;  %v1376_v4 = vadd.f32 %v1375_v40, %v1374_v12  ;;  %v1427_v63 = vsel %vm1416_vm1, 0.0, %v4853_v0 }
 0x190   : > { %v2639_v24 = vadd.f32 %v2638_v46, %v2637_v49  ;;  %v2498_v60 = vrot.slane %v4877_v52, 4  ;;  %v772_v32 = vadd.f32 %v771_v38, %v770_v34  ;;  %v1075_v61 = vrot.slane %v1074_v54, 1 }
 0x191   : > { %2819 = vst [vmem:[%s4455_s25 + $0x98] sm:$0xf] %v2803_v7  ;;  %v1204_v16 = vadd.f32 %v1203_v59, %v1202_v45  ;;  %v1377_v55 = vrot.slane %v1376_v4, 2  ;;  %v1443_v51 = vsel %vm215_vm0, %v1427_v63, %v468_v17  ;;  %v293_v1 = vsel %vm215_vm0, %v210_v57, 0.0 }
 0x192   : > { %v2640_v27 = vrot.slane %v2639_v24, 1  ;;  %v2499_v5 = vmax.f32 %v4877_v52, %v2498_v60  ;;  %v1076_v28 = vadd.f32 %v1075_v61, %v1074_v54  ;;  %v1460_v25 = vsel %vm1449_vm2, %v1443_v51, %v596_v23 }
 0x193   : > { %v1378_v0 = vadd.f32 %v1377_v55, %v1376_v4  ;;  %v1477_v31 = vsel %vm1466_vm3, %v1460_v25, %v772_v32  ;;  %v294_v20 = vrot.slane %v293_v1, 4  ;;  %v371_v15 = vrot.slane %v339_v33, 4 }
 0x194   : > { %v2641_v18 = vadd.f32 %v2640_v27, %v2639_v24  ;;  %v2500_v19 = vrot.slane %v2499_v5, 2  ;;  %v1494_v48 = vsel %vm1483_vm4, %v1477_v31, %v900_v39  ;;  %v1511_v11 = vsel %vm1500_vm5, %v1076_v28, %v1204_v16  ;;  %v515_v28 = vld [vmem:[%s4221_s18 + $0x138] sm:$0xf] }
 0x195   : > { %v1379_v17 = vrot.slane %v1378_v0, 1  ;;  %v1562_v53 = vmul.f32 %v4269_v8, %v1494_v48  ;;  %v1588_v44 = vmul.f32 %v4272_v9, %v1494_v48  ;;  %v1734_v3 = vmul.f32 %v4276_v13, %v1494_v48 }
 0x196   : > { %3889 = vrcp.f32 %v2641_v18  ;;  %v2501_v23 = vmax.f32 %v2499_v5, %v2500_v19  ;;  %v1880_v2 = vmul.f32 %v4279_v14, %v1494_v48  ;;  %v2026_v12 = vmul.f32 %v4287_v21, %v1494_v48 }
 0x197   : > { %v1380_v49 = vadd.f32 %v1379_v17, %v1378_v0  ;;  %v1664_v47 = vrot.slane %v1588_v44, 1  ;;  %v1810_v34 = vrot.slane %v1734_v3, 2  ;;  %v2172_v36 = vmul.f32 %v4290_v22, %v1494_v48  ;;  %v947_v17 = vld [vmem:[%s4221_s18 + $0x158] sm:$0xf0] }
 0x198   : > { %v2502_v62 = vrot.slane %v2501_v23, 1  ;;  %v1956_v39 = vrot.slane %v1880_v2, 3  ;;  %v2102_v45 = vrot.slane %v2026_v12, 4  ;;  %v2318_v40 = vmul.f32 %v4296_v29, %v1494_v48 }
 0x199   : > { %v1528_v46 = vsel %vm1517_vm6, %v1511_v11, %v1380_v49  ;;  %v2248_v38 = vrot.slane %v2172_v36, 5  ;;  %v295_v54 = vadd.f32 %v294_v20, %v293_v1  ;;  %v469_v57 = vsel %vm215_vm0, %v371_v15, 0.0  ;;  %v643_v15 = vld [vmem:[%s4221_s18 + $0x138] sm:$0xf0]  ;;  %v819_v11 = vld [vmem:[%s4221_s18 + $0x158] sm:$0xf] }
 0x19a   : > { %v2503_v58 = vmax.f32 %v2501_v23, %v2502_v62  ;;  %v1544_v7 = vsel %vm1416_vm1, %v1528_v46, 0.0  ;;  %v2394_v59 = vrot.slane %v2318_v40, 6  ;;  %v470_v4 = vrot.slane %v469_v57, 4  ;;  %v1123_v40 = vld [vmem:[%s4221_s18 + $0x178] sm:$0xf] }
 0x19b   : > { %v1592_v63 = vmul.f32 %v4272_v9, %v1544_v7  ;;  %v1738_v24 = vmul.f32 %v4276_v13, %v1544_v7  ;;  %v1884_v60 = vmul.f32 %v4279_v14, %v1544_v7  ;;  %v2030_v32 = vmul.f32 %v4287_v21, %v1544_v7 }
 0x19c   : > { %v2549_v61 = vsub.f32 %v4877_v52, %v2503_v58  ;;  %v2176_v33 = vmul.f32 %v4290_v22, %v1544_v7  ;;  %v2322_v16 = vmul.f32 %v4296_v29, %v1544_v7  ;;  %v296_v55 = vrot.slane %v295_v54, 2 }
 0x19d   : > { %v1665_v51 = vrot.slane %v1592_v63, 1  ;;  %v1811_v1 = vrot.slane %v1738_v24, 2  ;;  %v1957_v27 = vrot.slane %v1884_v60, 3  ;;  %v2103_v5 = vrot.slane %v2030_v32, 4 }
 0x19e   : > { %v2574_v25 = vmul.f32 1.442695, %v2549_v61  ;;  %v2249_v0 = vrot.slane %v2176_v33, 5  ;;  %v2395_v31 = vrot.slane %v2322_v16, 6  ;;  %v297_v20 = vadd.f32 %v296_v55, %v295_v54 }
 0x19f   : > { %v1666_v18 = vsel %vm1483_vm4, %v1664_v47, %v1665_v51  ;;  %v1812_v52 = vsel %vm1466_vm3, %v1810_v34, %v1811_v1  ;;  %v1958_v19 = vsel %vm1449_vm2, %v1956_v39, %v1957_v27  ;;  %v2104_v48 = vsel %vm215_vm0, %v2102_v45, %v2103_v5 }
 0x1a0   : > { %3891 = vpow2.f32 %v2574_v25  ;;  %v1708_v44 = vadd.f32 %v1666_v18, %v1562_v53  ;;  %v2250_v3 = vsel %vm1416_vm1, %v2248_v38, %v2249_v0  ;;  %v2396_v23 = vsel %vm1517_vm6, %v2394_v59, %v2395_v31  ;;  %v1251_v31 = vld [vmem:[%s4221_s18 + $0x178] sm:$0xf0] }
 0x1a1   : > { %v298_v2 = vrot.slane %v297_v20, 1  ;;  %v471_v12 = vadd.f32 %v470_v4, %v469_v57  ;;  %v597_v49 = vsel %vm215_vm0, %v515_v28, 0.0  ;;  %v675_v47 = vrot.slane %v643_v15, 4 }
 0x1a2   : > { %v1854_v36 = vadd.f32 %v1812_v52, %v1708_v44  ;;  %v598_v34 = vrot.slane %v597_v49, 4  ;;  %v901_v62 = vsel %vm215_vm0, %v819_v11, 0.0  ;;  %v979_v39 = vrot.slane %v947_v17, 4  ;;  %v3925_v52 = vld [vmem:[%s4221_s18 + $0x100] sm:$0xf] }
 0x1a3   : > { %v3890_v45 = vpop.eup %3889  ;;  %v299_v46 = vadd.f32 %v298_v2, %v297_v20  ;;  %v472_v54 = vrot.slane %v471_v12, 2  ;;  %v773_v53 = vsel %vm215_vm0, %v675_v47, 0.0  ;;  %v902_v58 = vrot.slane %v901_v62, 4 }
 0x1a4   : > { %v2701_v38 = vmul.f32 4.0, %v3890_v45  ;;  %v2000_v7 = vadd.f32 %v1958_v19, %v1854_v36  ;;  %v599_v59 = vadd.f32 %v598_v34, %v597_v49  ;;  %v774_v63 = vrot.slane %v773_v53, 4 }
 0x1a5   : > { %v473_v57 = vadd.f32 %v472_v54, %v471_v12  ;;  %v903_v4 = vadd.f32 %v902_v58, %v901_v62  ;;  %v1077_v24 = vsel %vm215_vm0, %v979_v39, 0.0  ;;  %v1205_v60 = vsel %vm215_vm0, %v1123_v40, 0.0  ;;  %v211_v62 = vld [vmem:[%s4221_s18 + $0x180] sm:$0xf] }
 0x1a6   : > { %v4927_v32 = vmul.f32 %v4867_v50, %v2701_v38  ;;  %v2146_v61 = vadd.f32 %v2104_v48, %v2000_v7  ;;  %v600_v33 = vrot.slane %v599_v59, 2  ;;  %v775_v16 = vadd.f32 %v774_v63, %v773_v53 }
 0x1a7   : > { %v474_v55 = vrot.slane %v473_v57, 1  ;;  %v904_v51 = vrot.slane %v903_v4, 2  ;;  %v1078_v1 = vrot.slane %v1077_v24, 4  ;;  %v1206_v27 = vrot.slane %v1205_v60, 4 }
 0x1a8   : > { %v2767_v5 = vrot.slane %v4927_v32, %v4314_v43  ;;  %v2292_v28 = vadd.f32 %v2250_v3, %v2146_v61  ;;  %v601_v25 = vadd.f32 %v600_v33, %v599_v59  ;;  %v776_v0 = vrot.slane %v775_v16, 2 }
 0x1a9   : > { %v475_v20 = vadd.f32 %v474_v55, %v473_v57  ;;  %v905_v15 = vadd.f32 %v904_v51, %v903_v4  ;;  %v1079_v50 = vadd.f32 %v1078_v1, %v1077_v24  ;;  %v1207_v18 = vadd.f32 %v1206_v27, %v1205_v60 }
 0x1aa   : > { %v2804_v19 = vmul.f32 %v3925_v52, %v2767_v5  ;;  %v4933_v48 = vadd.f32 %v2396_v23, %v2292_v28  ;;  %v602_v11 = vrot.slane %v601_v25, 1  ;;  %v777_v17 = vadd.f32 %v776_v0, %v775_v16 }
 0x1ab   : > { %v906_v44 = vrot.slane %v905_v15, 1  ;;  %v1080_v2 = vrot.slane %v1079_v50, 2  ;;  %v1208_v12 = vrot.slane %v1207_v18, 2  ;;  %v1283_v49 = vrot.slane %v1251_v31, 4 }
 0x1ac   : > { %2820 = vst [vmem:[%s4455_s25 + $0x100] sm:$0xf] %v2804_v19  ;;  %v2504_v3 = vrot.slane %v4933_v48, 4  ;;  %v603_v47 = vadd.f32 %v602_v11, %v601_v25  ;;  %v778_v36 = vrot.slane %v777_v17, 1  ;;  %v1428_v34 = vsel %vm1416_vm1, 0.0, %v299_v46 }
 0x1ad   : > { %v4939_v39 = vpop.eup %3891  ;;  %v907_v40 = vadd.f32 %v906_v44, %v905_v15  ;;  %v1081_v45 = vadd.f32 %v1080_v2, %v1079_v50  ;;  %v1209_v23 = vadd.f32 %v1208_v12, %v1207_v18  ;;  %v1381_v54 = vsel %vm215_vm0, %v1283_v49, 0.0  ;;  %v340_v2 = vld [vmem:[%s4221_s18 + $0x180] sm:$0xf0]  ;;  %v516_v12 = vld [vmem:[%s4221_s18 + $0x1a0] sm:$0xf] }
 0x1ae   : > { %v2642_v53 = vrot.slane %v4939_v39, 4  ;;  %v2505_v58 = vmax.f32 %v4933_v48, %v2504_v3  ;;  %v779_v38 = vadd.f32 %v778_v36, %v777_v17  ;;  %v1382_v7 = vrot.slane %v1381_v54, 4 }
 0x1af   : > { %v1082_v59 = vrot.slane %v1081_v45, 1  ;;  %v1210_v63 = vrot.slane %v1209_v23, 1  ;;  %v1444_v57 = vsel %vm215_vm0, %v1428_v34, %v475_v20  ;;  %v300_v46 = vsel %vm215_vm0, %v211_v62, 0.0  ;;  %v644_v34 = vld [vmem:[%s4221_s18 + $0x1a0] sm:$0xf0] }
 0x1b0   : > { %v2643_v4 = vadd.f32 %v4939_v39, %v2642_v53  ;;  %v2506_v24 = vrot.slane %v2505_v58, 2  ;;  %v1383_v60 = vadd.f32 %v1382_v7, %v1381_v54  ;;  %v1461_v61 = vsel %vm1449_vm2, %v1444_v57, %v603_v47 }
 0x1b1   : > { %v1083_v33 = vadd.f32 %v1082_v59, %v1081_v45  ;;  %v1211_v16 = vadd.f32 %v1210_v63, %v1209_v23  ;;  %v1478_v55 = vsel %vm1466_vm3, %v1461_v61, %v779_v38  ;;  %v301_v51 = vrot.slane %v300_v46, 4 }
 0x1b2   : > { %v2644_v1 = vrot.slane %v2643_v4, 2  ;;  %v2507_v27 = vmax.f32 %v2505_v58, %v2506_v24  ;;  %v1384_v5 = vrot.slane %v1383_v60, 2  ;;  %v1495_v28 = vsel %vm1483_vm4, %v1478_v55, %v907_v40 }
 0x1b3   : > { %v1512_v25 = vsel %vm1500_vm5, %v1083_v33, %v1211_v16  ;;  %v1563_v0 = vmul.f32 %v4269_v8, %v1495_v28  ;;  %v1589_v31 = vmul.f32 %v4272_v9, %v1495_v28  ;;  %v1735_v20 = vmul.f32 %v4276_v13, %v1495_v28 }
 0x1b4   : > { %v2645_v15 = vadd.f32 %v2644_v1, %v2643_v4  ;;  %v2508_v50 = vrot.slane %v2507_v27, 1  ;;  %v1385_v18 = vadd.f32 %v1384_v5, %v1383_v60  ;;  %v1881_v52 = vmul.f32 %v4279_v14, %v1495_v28 }
 0x1b5   : > { %v1667_v19 = vrot.slane %v1589_v31, 1  ;;  %v1813_v11 = vrot.slane %v1735_v20, 2  ;;  %v2027_v17 = vmul.f32 %v4287_v21, %v1495_v28  ;;  %v2173_v44 = vmul.f32 %v4290_v22, %v1495_v28 }
 0x1b6   : > { %v2646_v49 = vrot.slane %v2645_v15, 1  ;;  %v2509_v3 = vmax.f32 %v2507_v27, %v2508_v50  ;;  %v1386_v47 = vrot.slane %v1385_v18, 1  ;;  %v1959_v36 = vrot.slane %v1881_v52, 3 }
 0x1b7   : > { %v2105_v62 = vrot.slane %v2027_v17, 4  ;;  %v2251_v40 = vrot.slane %v2173_v44, 5  ;;  %v2319_v45 = vmul.f32 %v4296_v29, %v1495_v28  ;;  %v302_v23 = vadd.f32 %v301_v51, %v300_v46  ;;  %v820_v44 = vld [vmem:[%s4221_s18 + $0x1c0] sm:$0xf] }
 0x1b8   : > { %v2647_v54 = vadd.f32 %v2646_v49, %v2645_v15  ;;  %v2550_v53 = vsub.f32 %v4933_v48, %v2509_v3  ;;  %v1387_v58 = vadd.f32 %v1386_v47, %v1385_v18  ;;  %v372_v38 = vrot.slane %v340_v2, 4  ;;  %v948_v47 = vld [vmem:[%s4221_s18 + $0x1c0] sm:$0xf0] }
 0x1b9   : > { %v2397_v7 = vrot.slane %v2319_v45, 6  ;;  %v303_v59 = vrot.slane %v302_v23, 2  ;;  %v604_v63 = vsel %vm215_vm0, %v516_v12, 0.0  ;;  %v676_v57 = vrot.slane %v644_v34, 4 }
 0x1ba   : > { %3893 = vrcp.f32 %v2647_v54  ;;  %v2576_v4 = vmul.f32 1.442695, %v2550_v53  ;;  %v1529_v24 = vsel %vm1517_vm6, %v1512_v25, %v1387_v58  ;;  %v476_v60 = vsel %vm215_vm0, %v372_v38, 0.0  ;;  %v1124_v53 = vld [vmem:[%s4221_s18 + $0x1e0] sm:$0xf] }
 0x1bb   : > { %v1545_v61 = vsel %vm1416_vm1, %v1529_v24, 0.0  ;;  %v304_v33 = vadd.f32 %v303_v59, %v302_v23  ;;  %v477_v46 = vrot.slane %v476_v60, 4  ;;  %v605_v16 = vrot.slane %v604_v63, 4  ;;  %v1252_v58 = vld [vmem:[%s4221_s18 + $0x1e0] sm:$0xf0] }
 0x1bc   : > { %3895 = vpow2.f32 %v2576_v4  ;;  %v1593_v48 = vmul.f32 %v4272_v9, %v1545_v61  ;;  %v1739_v55 = vmul.f32 %v4276_v13, %v1545_v61  ;;  %v1885_v51 = vmul.f32 %v4279_v14, %v1545_v61 }
 0x1bd   : > { %v2031_v1 = vmul.f32 %v4287_v21, %v1545_v61  ;;  %v2177_v27 = vmul.f32 %v4290_v22, %v1545_v61  ;;  %v2323_v5 = vmul.f32 %v4296_v29, %v1545_v61  ;;  %v305_v28 = vrot.slane %v304_v33, 1 }
 0x1be   : > { %v1668_v25 = vrot.slane %v1593_v48, 1  ;;  %v1814_v31 = vrot.slane %v1739_v55, 2  ;;  %v1960_v20 = vrot.slane %v1885_v51, 3  ;;  %v478_v15 = vadd.f32 %v477_v46, %v476_v60 }
 0x1bf   : > { %v2106_v50 = vrot.slane %v2031_v1, 4  ;;  %v2252_v18 = vrot.slane %v2177_v27, 5  ;;  %v2398_v52 = vrot.slane %v2323_v5, 6  ;;  %v4972_v17 = vadd.f32 %v305_v28, %v304_v33 }
 0x1c0   : > { %v1669_v2 = vsel %vm1483_vm4, %v1667_v19, %v1668_v25  ;;  %v1815_v12 = vsel %vm1466_vm3, %v1813_v11, %v1814_v31  ;;  %v1961_v49 = vsel %vm1449_vm2, %v1959_v36, %v1960_v20  ;;  %v479_v3 = vrot.slane %v478_v15, 2 }
 0x1c1   : > { %v1709_v34 = vadd.f32 %v1669_v2, %v1563_v0  ;;  %v2107_v45 = vsel %vm215_vm0, %v2105_v62, %v2106_v50  ;;  %v2253_v23 = vsel %vm1416_vm1, %v2251_v40, %v2252_v18  ;;  %v2399_v54 = vsel %vm1517_vm6, %v2397_v7, %v2398_v52 }
 0x1c2   : > { %v480_v38 = vadd.f32 %v479_v3, %v478_v15  ;;  %v606_v59 = vadd.f32 %v605_v16, %v604_v63  ;;  %v780_v4 = vsel %vm215_vm0, %v676_v57, 0.0  ;;  %v908_v19 = vsel %vm215_vm0, %v820_v44, 0.0 }
 0x1c3   : > { %v1855_v11 = vadd.f32 %v1815_v12, %v1709_v34  ;;  %v781_v24 = vrot.slane %v780_v4, 4  ;;  %v909_v36 = vrot.slane %v908_v19, 4  ;;  %v980_v60 = vrot.slane %v948_v47, 4 }
 0x1c4   : > { %v481_v61 = vrot.slane %v480_v38, 1  ;;  %v607_v0 = vrot.slane %v606_v59, 2  ;;  %v1212_v62 = vsel %vm215_vm0, %v1124_v53, 0.0  ;;  %v1284_v33 = vrot.slane %v1252_v58, 4 }
 0x1c5   : > { %v2001_v40 = vadd.f32 %v1961_v49, %v1855_v11  ;;  %v782_v46 = vadd.f32 %v781_v24, %v780_v4  ;;  %v910_v7 = vadd.f32 %v909_v36, %v908_v19  ;;  %v1084_v48 = vsel %vm215_vm0, %v980_v60, 0.0 }
 0x1c6   : > { %v482_v55 = vadd.f32 %v481_v61, %v480_v38  ;;  %v608_v63 = vadd.f32 %v607_v0, %v606_v59  ;;  %v1085_v16 = vrot.slane %v1084_v48, 4  ;;  %v1213_v57 = vrot.slane %v1212_v62, 4 }
 0x1c7   : > { %v3894_v51 = vpop.eup %3893  ;;  %v2147_v1 = vadd.f32 %v2107_v45, %v2001_v40  ;;  %v783_v27 = vrot.slane %v782_v46, 2  ;;  %v911_v5 = vrot.slane %v910_v7, 2  ;;  %v1388_v28 = vsel %vm215_vm0, %v1284_v33, 0.0 }
 0x1c8   : > { %v2703_v25 = vmul.f32 4.0, %v3894_v51  ;;  %v609_v31 = vrot.slane %v608_v63, 1  ;;  %v1086_v20 = vadd.f32 %v1085_v16, %v1084_v48  ;;  %v1214_v15 = vadd.f32 %v1213_v57, %v1212_v62  ;;  %v5008_v48 = vld [vmem:[%s4221_s18 + $0x188] sm:$0xf0] }
 0x1c9   : > { %v4989_v50 = vpop.eup %3895  ;;  %v2293_v18 = vadd.f32 %v2253_v23, %v2147_v1  ;;  %v784_v52 = vadd.f32 %v783_v27, %v782_v46  ;;  %v912_v44 = vadd.f32 %v911_v5, %v910_v7  ;;  %v1389_v2 = vrot.slane %v1388_v28, 4 }
 0x1ca   : > { %v4992_v12 = vmul.f32 %v4939_v39, %v2703_v25  ;;  %v2648_v49 = vrot.slane %v4989_v50, 4  ;;  %v610_v3 = vadd.f32 %v609_v31, %v608_v63  ;;  %v1087_v47 = vrot.slane %v1086_v20, 2  ;;  %v212_v39 = vld [vmem:[%s4221_s18 + $0x188] sm:$0xf] }
 0x1cb   : > { %v4995_v34 = vadd.f32 %v2399_v54, %v2293_v18  ;;  %v785_v45 = vrot.slane %v784_v52, 1  ;;  %v913_v53 = vrot.slane %v912_v44, 1  ;;  %v1215_v58 = vrot.slane %v1214_v15, 2  ;;  %v3926_v54 = vld [vmem:[%s4221_s18 + $0x108] sm:$0xf] }
 0x1cc   : > { %v2771_v23 = vrot.slane %v4992_v12, %v4314_v43  ;;  %v2649_v38 = vadd.f32 %v4989_v50, %v2648_v49  ;;  %v1088_v59 = vadd.f32 %v1087_v47, %v1086_v20  ;;  %v1390_v4 = vadd.f32 %v1389_v2, %v1388_v28 }
 0x1cd   : > { %v2510_v19 = vrot.slane %v4995_v34, 4  ;;  %v786_v11 = vadd.f32 %v785_v45, %v784_v52  ;;  %v914_v24 = vadd.f32 %v913_v53, %v912_v44  ;;  %v1216_v36 = vadd.f32 %v1215_v58, %v1214_v15 }
 0x1ce   : > { %v2805_v60 = vmul.f32 %v3926_v54, %v2771_v23  ;;  %v2650_v61 = vrot.slane %v2649_v38, 2  ;;  %v1089_v0 = vrot.slane %v1088_v59, 1  ;;  %v1391_v62 = vrot.slane %v1390_v4, 2 }
 0x1cf   : > { %v2511_v33 = vmax.f32 %v4995_v34, %v2510_v19  ;;  %v1217_v40 = vrot.slane %v1216_v36, 1  ;;  %v1429_v46 = vsel %vm1416_vm1, 0.0, %v4972_v17  ;;  %v307_v7 = vsel %vm215_vm0, %v212_v39, 0.0 }
 0x1d0   : > { %2821 = vst [vmem:[%s4455_s25 + $0x108] sm:$0xf] %v2805_v60  ;;  %v2651_v63 = vadd.f32 %v2650_v61, %v2649_v38  ;;  %v1090_v16 = vadd.f32 %v1089_v0, %v1088_v59  ;;  %v1392_v57 = vadd.f32 %v1391_v62, %v1390_v4  ;;  %v1445_v51 = vsel %vm215_vm0, %v1429_v46, %v482_v55 }
 0x1d1   : > { %v2512_v1 = vrot.slane %v2511_v33, 2  ;;  %v1218_v27 = vadd.f32 %v1217_v40, %v1216_v36  ;;  %v1462_v5 = vsel %vm1449_vm2, %v1445_v51, %v610_v3  ;;  %v308_v28 = vrot.slane %v307_v7, 4 }
 0x1d2   : > { %v2652_v25 = vrot.slane %v2651_v63, 1  ;;  %v1393_v31 = vrot.slane %v1392_v57, 1  ;;  %v1479_v20 = vsel %vm1466_vm3, %v1462_v5, %v786_v11  ;;  %v373_v17 = vrot.slane %v5008_v48, 4 }
 0x1d3   : > { %v2513_v15 = vmax.f32 %v2511_v33, %v2512_v1  ;;  %v1496_v18 = vsel %vm1483_vm4, %v1479_v20, %v914_v24  ;;  %v1513_v52 = vsel %vm1500_vm5, %v1090_v16, %v1218_v27  ;;  %v309_v44 = vadd.f32 %v308_v28, %v307_v7  ;;  %v517_v1 = vld [vmem:[%s4221_s18 + $0x1a8] sm:$0xf] }
 0x1d4   : > { %v2653_v2 = vadd.f32 %v2652_v25, %v2651_v63  ;;  %v1394_v49 = vadd.f32 %v1393_v31, %v1392_v57  ;;  %v1564_v55 = vmul.f32 %v4269_v8, %v1496_v18  ;;  %v1594_v47 = vmul.f32 %v4272_v9, %v1496_v18  ;;  %v645_v25 = vld [vmem:[%s4221_s18 + $0x1a8] sm:$0xf0] }
 0x1d5   : > { %v2514_v3 = vrot.slane %v2513_v15, 1  ;;  %v1740_v45 = vmul.f32 %v4276_v13, %v1496_v18  ;;  %v1886_v53 = vmul.f32 %v4279_v14, %v1496_v18  ;;  %v2032_v58 = vmul.f32 %v4287_v21, %v1496_v18 }
 0x1d6   : > { %3897 = vrcp.f32 %v2653_v2  ;;  %v1530_v23 = vsel %vm1517_vm6, %v1513_v52, %v1394_v49  ;;  %v1670_v38 = vrot.slane %v1594_v47, 1  ;;  %v2178_v59 = vmul.f32 %v4290_v22, %v1496_v18  ;;  %v821_v52 = vld [vmem:[%s4221_s18 + $0x1c8] sm:$0xf]  ;;  %v949_v2 = vld [vmem:[%s4221_s18 + $0x1c8] sm:$0xf0] }
 0x1d7   : > { %v2515_v4 = vmax.f32 %v2513_v15, %v2514_v3  ;;  %v1546_v39 = vsel %vm1416_vm1, %v1530_v23, 0.0  ;;  %v1816_v19 = vrot.slane %v1740_v45, 2  ;;  %v1962_v11 = vrot.slane %v1886_v53, 3 }
 0x1d8   : > { %v1598_v24 = vmul.f32 %v4272_v9, %v1546_v39  ;;  %v1744_v36 = vmul.f32 %v4276_v13, %v1546_v39  ;;  %v1890_v54 = vmul.f32 %v4279_v14, %v1546_v39  ;;  %v2036_v60 = vmul.f32 %v4287_v21, %v1546_v39 }
 0x1d9   : > { %v2551_v61 = vsub.f32 %v4995_v34, %v2515_v4  ;;  %v2108_v0 = vrot.slane %v2032_v58, 4  ;;  %v2182_v62 = vmul.f32 %v4290_v22, %v1546_v39  ;;  %v2254_v33 = vrot.slane %v2178_v59, 5 }
 0x1da   : > { %v1671_v40 = vrot.slane %v1598_v24, 1  ;;  %v1817_v46 = vrot.slane %v1744_v36, 2  ;;  %v1963_v7 = vrot.slane %v1890_v54, 3  ;;  %v2109_v48 = vrot.slane %v2036_v60, 4 }
 0x1db   : > { %v2578_v63 = vmul.f32 1.442695, %v2551_v61  ;;  %v2255_v16 = vrot.slane %v2182_v62, 5  ;;  %v2324_v57 = vmul.f32 %v4296_v29, %v1496_v18  ;;  %v2328_v51 = vmul.f32 %v4296_v29, %v1546_v39 }
 0x1dc   : > { %v1672_v34 = vsel %vm1483_vm4, %v1670_v38, %v1671_v40  ;;  %v1818_v27 = vsel %vm1466_vm3, %v1816_v19, %v1817_v46  ;;  %v1964_v5 = vsel %vm1449_vm2, %v1962_v11, %v1963_v7  ;;  %v2110_v28 = vsel %vm215_vm0, %v2108_v0, %v2109_v48 }
 0x1dd   : > { %3899 = vpow2.f32 %v2578_v63  ;;  %v1710_v31 = vadd.f32 %v1672_v34, %v1564_v55  ;;  %v2256_v20 = vsel %vm1416_vm1, %v2254_v33, %v2255_v16  ;;  %v2400_v15 = vrot.slane %v2324_v57, 6 }
 0x1de   : > { %v2401_v18 = vrot.slane %v2328_v51, 6  ;;  %v310_v49 = vrot.slane %v309_v44, 2  ;;  %v483_v47 = vsel %vm215_vm0, %v373_v17, 0.0  ;;  %v611_v3 = vsel %vm215_vm0, %v517_v1, 0.0 }
 0x1df   : > { %v1856_v45 = vadd.f32 %v1818_v27, %v1710_v31  ;;  %v484_v53 = vrot.slane %v483_v47, 4  ;;  %v612_v58 = vrot.slane %v611_v3, 4  ;;  %v677_v23 = vrot.slane %v645_v25, 4 }
 0x1e0   : > { %v2402_v38 = vsel %vm1517_vm6, %v2400_v15, %v2401_v18  ;;  %v311_v59 = vadd.f32 %v310_v49, %v309_v44  ;;  %v915_v55 = vsel %vm215_vm0, %v821_v52, 0.0  ;;  %v981_v4 = vrot.slane %v949_v2, 4  ;;  %v1125_v44 = vld [vmem:[%s4221_s18 + $0x1e8] sm:$0xf] }
 0x1e1   : > { %v2002_v39 = vadd.f32 %v1964_v5, %v1856_v45  ;;  %v485_v19 = vadd.f32 %v484_v53, %v483_v47  ;;  %v613_v11 = vadd.f32 %v612_v58, %v611_v3  ;;  %v787_v24 = vsel %vm215_vm0, %v677_v23, 0.0  ;;  %v1253_v47 = vld [vmem:[%s4221_s18 + $0x1e8] sm:$0xf0]  ;;  %v3927_v23 = vld [vmem:[%s4221_s18 + $0x110] sm:$0xf] }
 0x1e2   : > { %v312_v36 = vrot.slane %v311_v59, 1  ;;  %v788_v17 = vrot.slane %v787_v24, 4  ;;  %v916_v54 = vrot.slane %v915_v55, 4  ;;  %v1091_v60 = vsel %vm215_vm0, %v981_v4, 0.0 }
 0x1e3   : > { %v3898_v61 = vpop.eup %3897  ;;  %v2148_v0 = vadd.f32 %v2110_v28, %v2002_v39  ;;  %v486_v62 = vrot.slane %v485_v19, 2  ;;  %v614_v33 = vrot.slane %v613_v11, 2  ;;  %v1092_v40 = vrot.slane %v1091_v60, 4 }
 0x1e4   : > { %v2705_v46 = vmul.f32 4.0, %v3898_v61  ;;  %v313_v7 = vadd.f32 %v312_v36, %v311_v59  ;;  %v789_v48 = vadd.f32 %v788_v17, %v787_v24  ;;  %v917_v63 = vadd.f32 %v916_v54, %v915_v55  ;;  %v213_v36 = vld [vmem:[%s4221_s18 + $0x190] sm:$0xf] }
 0x1e5   : > { %v2294_v16 = vadd.f32 %v2256_v20, %v2148_v0  ;;  %v487_v57 = vadd.f32 %v486_v62, %v485_v19  ;;  %v615_v51 = vadd.f32 %v614_v33, %v613_v11  ;;  %v1093_v1 = vadd.f32 %v1092_v40, %v1091_v60 }
 0x1e6   : > { %v5050_v34 = vmul.f32 %v4989_v50, %v2705_v46  ;;  %v790_v27 = vrot.slane %v789_v48, 2  ;;  %v918_v5 = vrot.slane %v917_v63, 2  ;;  %v1219_v28 = vsel %vm215_vm0, %v1125_v44, 0.0  ;;  %v342_v44 = vld [vmem:[%s4221_s18 + $0x190] sm:$0xf0] }
 0x1e7   : > { %v5053_v25 = vadd.f32 %v2402_v38, %v2294_v16  ;;  %v488_v31 = vrot.slane %v487_v57, 1  ;;  %v616_v15 = vrot.slane %v615_v51, 1  ;;  %v1094_v52 = vrot.slane %v1093_v1, 2 }
 0x1e8   : > { %v2775_v20 = vrot.slane %v5050_v34, %v4314_v43  ;;  %v791_v2 = vadd.f32 %v790_v27, %v789_v48  ;;  %v919_v18 = vadd.f32 %v918_v5, %v917_v63  ;;  %v1220_v49 = vrot.slane %v1219_v28, 4 }
 0x1e9   : > { %v2516_v50 = vrot.slane %v5053_v25, 4  ;;  %v489_v3 = vadd.f32 %v488_v31, %v487_v57  ;;  %v617_v45 = vadd.f32 %v616_v15, %v615_v51  ;;  %v1095_v53 = vadd.f32 %v1094_v52, %v1093_v1 }
 0x1ea   : > { %v5059_v58 = vpop.eup %3899  ;;  %v2806_v38 = vmul.f32 %v3927_v23, %v2775_v20  ;;  %v792_v59 = vrot.slane %v791_v2, 1  ;;  %v920_v55 = vrot.slane %v919_v18, 1  ;;  %v1221_v4 = vadd.f32 %v1220_v49, %v1219_v28 }
 0x1eb   : > { %v2654_v39 = vrot.slane %v5059_v58, 4  ;;  %v2517_v19 = vmax.f32 %v5053_v25, %v2516_v50  ;;  %v1096_v11 = vrot.slane %v1095_v53, 1  ;;  %v1285_v24 = vrot.slane %v1253_v47, 4 }
 0x1ec   : > { %2822 = vst [vmem:[%s4455_s25 + $0x110] sm:$0xf] %v2806_v38  ;;  %v793_v17 = vadd.f32 %v792_v59, %v791_v2  ;;  %v921_v54 = vadd.f32 %v920_v55, %v919_v18  ;;  %v1222_v60 = vrot.slane %v1221_v4, 2  ;;  %v1430_v61 = vsel %vm1416_vm1, 0.0, %v313_v7 }
 0x1ed   : > { %v2655_v0 = vadd.f32 %v5059_v58, %v2654_v39  ;;  %v2518_v62 = vrot.slane %v2517_v19, 2  ;;  %v1097_v33 = vadd.f32 %v1096_v11, %v1095_v53  ;;  %v1395_v40 = vsel %vm215_vm0, %v1285_v24, 0.0 }
 0x1ee   : > { %v1223_v46 = vadd.f32 %v1222_v60, %v1221_v4  ;;  %v1396_v48 = vrot.slane %v1395_v40, 4  ;;  %v1446_v63 = vsel %vm215_vm0, %v1430_v61, %v489_v3  ;;  %v314_v16 = vsel %vm215_vm0, %v213_v36, 0.0  ;;  %v518_v61 = vld [vmem:[%s4221_s18 + $0x1b0] sm:$0xf] }
 0x1ef   : > { %v2656_v57 = vrot.slane %v2655_v0, 2  ;;  %v2519_v51 = vmax.f32 %v2517_v19, %v2518_v62  ;;  %v1463_v1 = vsel %vm1449_vm2, %v1446_v63, %v617_v45  ;;  %v315_v27 = vrot.slane %v314_v16, 4 }
 0x1f0   : > { %v1224_v5 = vrot.slane %v1223_v46, 1  ;;  %v1397_v7 = vadd.f32 %v1396_v48, %v1395_v40  ;;  %v1480_v28 = vsel %vm1466_vm3, %v1463_v1, %v793_v17  ;;  %v374_v31 = vrot.slane %v342_v44, 4  ;;  %v822_v44 = vld [vmem:[%s4221_s18 + $0x1d0] sm:$0xf] }
 0x1f1   : > { %v2657_v15 = vadd.f32 %v2656_v57, %v2655_v0  ;;  %v2520_v52 = vrot.slane %v2519_v51, 1  ;;  %v1497_v20 = vsel %vm1483_vm4, %v1480_v28, %v921_v54  ;;  %v316_v2 = vadd.f32 %v315_v27, %v314_v16  ;;  %v646_v0 = vld [vmem:[%s4221_s18 + $0x1b0] sm:$0xf0] }
 0x1f2   : > { %v1225_v18 = vadd.f32 %v1224_v5, %v1223_v46  ;;  %v1398_v49 = vrot.slane %v1397_v7, 2  ;;  %v5076_v47 = vmul.f32 %v4269_v8, %v1497_v20  ;;  %v1595_v50 = vmul.f32 %v4272_v9, %v1497_v20 }
 0x1f3   : > { %v2658_v3 = vrot.slane %v2657_v15, 1  ;;  %v2521_v45 = vmax.f32 %v2519_v51, %v2520_v52  ;;  %v1741_v53 = vmul.f32 %v4276_v13, %v1497_v20  ;;  %v1887_v23 = vmul.f32 %v4279_v14, %v1497_v20 }
 0x1f4   : > { %v1399_v38 = vadd.f32 %v1398_v49, %v1397_v7  ;;  %v1514_v59 = vsel %vm1500_vm5, %v1097_v33, %v1225_v18  ;;  %v1673_v55 = vrot.slane %v1595_v50, 1  ;;  %v2033_v4 = vmul.f32 %v4287_v21, %v1497_v20 }
 0x1f5   : > { %v2659_v39 = vadd.f32 %v2658_v3, %v2657_v15  ;;  %v2552_v19 = vsub.f32 %v5053_v25, %v2521_v45  ;;  %v1819_v11 = vrot.slane %v1741_v53, 2  ;;  %v1965_v24 = vrot.slane %v1887_v23, 3 }
 0x1f6   : > { %v1400_v36 = vrot.slane %v1399_v38, 1  ;;  %v2111_v17 = vrot.slane %v2033_v4, 4  ;;  %v2179_v54 = vmul.f32 %v4290_v22, %v1497_v20  ;;  %v2325_v60 = vmul.f32 %v4296_v29, %v1497_v20 }
 0x1f7   : > { %3901 = vrcp.f32 %v2659_v39  ;;  %v2580_v62 = vmul.f32 1.442695, %v2552_v19  ;;  %v317_v33 = vrot.slane %v316_v2, 2  ;;  %v490_v40 = vsel %vm215_vm0, %v374_v31, 0.0 }
 0x1f8   : > { %v1401_v46 = vadd.f32 %v1400_v36, %v1399_v38  ;;  %v2257_v48 = vrot.slane %v2179_v54, 5  ;;  %v2403_v63 = vrot.slane %v2325_v60, 6  ;;  %v491_v25 = vrot.slane %v490_v40, 4  ;;  %v950_v60 = vld [vmem:[%s4221_s18 + $0x1d0] sm:$0xf0] }
 0x1f9   : > { %3903 = vpow2.f32 %v2580_v62  ;;  %v318_v16 = vadd.f32 %v317_v33, %v316_v2  ;;  %v618_v57 = vsel %vm215_vm0, %v518_v61, 0.0  ;;  %v678_v51 = vrot.slane %v646_v0, 4 }
 0x1fa   : > { %v1531_v1 = vsel %vm1517_vm6, %v1514_v59, %v1401_v46  ;;  %v492_v27 = vadd.f32 %v491_v25, %v490_v40  ;;  %v619_v5 = vrot.slane %v618_v57, 4  ;;  %v922_v7 = vsel %vm215_vm0, %v822_v44, 0.0  ;;  %v1126_v40 = vld [vmem:[%s4221_s18 + $0x1f0] sm:$0xf]  ;;  %v1254_v44 = vld [vmem:[%s4221_s18 + $0x1f0] sm:$0xf0] }
 0x1fb   : > { %v1547_v28 = vsel %vm1416_vm1, %v1531_v1, 0.0  ;;  %v319_v15 = vrot.slane %v318_v16, 1  ;;  %v794_v31 = vsel %vm215_vm0, %v678_v51, 0.0  ;;  %v923_v52 = vrot.slane %v922_v7, 4 }
 0x1fc   : > { %v1599_v20 = vmul.f32 %v4272_v9, %v1547_v28  ;;  %v1745_v2 = vmul.f32 %v4276_v13, %v1547_v28  ;;  %v1891_v18 = vmul.f32 %v4279_v14, %v1547_v28  ;;  %v2037_v49 = vmul.f32 %v4287_v21, %v1547_v28 }
 0x1fd   : > { %v2183_v50 = vmul.f32 %v4290_v22, %v1547_v28  ;;  %v2329_v3 = vmul.f32 %v4296_v29, %v1547_v28  ;;  %v5101_v45 = vadd.f32 %v319_v15, %v318_v16  ;;  %v493_v53 = vrot.slane %v492_v27, 2 }
 0x1fe   : > { %v1674_v23 = vrot.slane %v1599_v20, 1  ;;  %v1820_v38 = vrot.slane %v1745_v2, 2  ;;  %v1966_v59 = vrot.slane %v1891_v18, 3  ;;  %v2112_v4 = vrot.slane %v2037_v49, 4 }
 0x1ff   : > { %v2258_v39 = vrot.slane %v2183_v50, 5  ;;  %v2404_v19 = vrot.slane %v2329_v3, 6  ;;  %v494_v36 = vadd.f32 %v493_v53, %v492_v27  ;;  %v620_v54 = vadd.f32 %v619_v5, %v618_v57 }
 0x200   : > { %v1675_v61 = vsel %vm1483_vm4, %v1673_v55, %v1674_v23  ;;  %v1821_v0 = vsel %vm1466_vm3, %v1819_v11, %v1820_v38  ;;  %v1967_v62 = vsel %vm1449_vm2, %v1965_v24, %v1966_v59  ;;  %v2113_v33 = vsel %vm215_vm0, %v2111_v17, %v2112_v4 }
 0x201   : > { %v1711_v46 = vadd.f32 %v1675_v61, %v5076_v47  ;;  %v2259_v25 = vsel %vm1416_vm1, %v2257_v48, %v2258_v39  ;;  %v2405_v16 = vsel %vm1517_vm6, %v2403_v63, %v2404_v19  ;;  %v495_v51 = vrot.slane %v494_v36, 1 }
 0x202   : > { %v621_v1 = vrot.slane %v620_v54, 2  ;;  %v795_v57 = vrot.slane %v794_v31, 4  ;;  %v924_v27 = vadd.f32 %v923_v52, %v922_v7  ;;  %v982_v5 = vrot.slane %v950_v60, 4 }
 0x203   : > { %v1857_v55 = vadd.f32 %v1821_v0, %v1711_v46  ;;  %v496_v28 = vadd.f32 %v495_v51, %v494_v36  ;;  %v1226_v11 = vsel %vm215_vm0, %v1126_v40, 0.0  ;;  %v1286_v24 = vrot.slane %v1254_v44, 4  ;;  %v3928_v46 = vld [vmem:[%s4221_s18 + $0x118] sm:$0xf] }
 0x204   : > { %v3902_v15 = vpop.eup %3901  ;;  %v622_v17 = vadd.f32 %v621_v1, %v620_v54  ;;  %v796_v20 = vadd.f32 %v795_v57, %v794_v31  ;;  %v925_v2 = vrot.slane %v924_v27, 2  ;;  %v1098_v47 = vsel %vm215_vm0, %v982_v5, 0.0 }
 0x205   : > { %v2707_v18 = vmul.f32 4.0, %v3902_v15  ;;  %v2003_v48 = vadd.f32 %v1967_v62, %v1857_v55  ;;  %v1099_v49 = vrot.slane %v1098_v47, 4  ;;  %v1227_v63 = vrot.slane %v1226_v11, 4 }
 0x206   : > { %v5115_v50 = vpop.eup %3903  ;;  %v623_v3 = vrot.slane %v622_v17, 1  ;;  %v797_v7 = vrot.slane %v796_v20, 2  ;;  %v926_v52 = vadd.f32 %v925_v2, %v924_v27  ;;  %v1402_v53 = vsel %vm215_vm0, %v1286_v24, 0.0  ;;  %v214_v27 = vld [vmem:[%s4221_s18 + $0x198] sm:$0xf] }
 0x207   : > { %v5119_v23 = vmul.f32 %v5059_v58, %v2707_v18  ;;  %v2660_v31 = vrot.slane %v5115_v50, 4  ;;  %v2149_v38 = vadd.f32 %v2113_v33, %v2003_v48  ;;  %v1100_v59 = vadd.f32 %v1099_v49, %v1098_v47 }
 0x208   : > { %v624_v4 = vadd.f32 %v623_v3, %v622_v17  ;;  %v798_v39 = vadd.f32 %v797_v7, %v796_v20  ;;  %v927_v19 = vrot.slane %v926_v52, 1  ;;  %v1228_v36 = vadd.f32 %v1227_v63, %v1226_v11 }
 0x209   : > { %v2779_v54 = vrot.slane %v5119_v23, %v4314_v43  ;;  %v2661_v60 = vadd.f32 %v5115_v50, %v2660_v31  ;;  %v2295_v61 = vadd.f32 %v2259_v25, %v2149_v38  ;;  %v1101_v0 = vrot.slane %v1100_v59, 2 }
 0x20a   : > { %v799_v58 = vrot.slane %v798_v39, 1  ;;  %v928_v62 = vadd.f32 %v927_v19, %v926_v52  ;;  %v1229_v40 = vrot.slane %v1228_v36, 2  ;;  %v1403_v44 = vrot.slane %v1402_v53, 4 }
 0x20b   : > { %v2807_v33 = vmul.f32 %v3928_v46, %v2779_v54  ;;  %v2662_v51 = vrot.slane %v2661_v60, 2  ;;  %v5126_v1 = vadd.f32 %v2405_v16, %v2295_v61  ;;  %v1102_v57 = vadd.f32 %v1101_v0, %v1100_v59  ;;  %v343_v0 = vld [vmem:[%s4221_s18 + $0x198] sm:$0xf0] }
 0x20c   : > { %v800_v5 = vadd.f32 %v799_v58, %v798_v39  ;;  %v1230_v55 = vadd.f32 %v1229_v40, %v1228_v36  ;;  %v1404_v11 = vadd.f32 %v1403_v44, %v1402_v53  ;;  %v1431_v24 = vsel %vm1416_vm1, 0.0, %v5101_v45  ;;  %v519_v58 = vld [vmem:[%s4221_s18 + $0x1b8] sm:$0xf] }
 0x20d   : > { %2823 = vst [vmem:[%s4455_s25 + $0x118] sm:$0xf] %v2807_v33  ;;  %v2663_v25 = vadd.f32 %v2662_v51, %v2661_v60  ;;  %v2522_v15 = vrot.slane %v5126_v1, 4  ;;  %v1103_v17 = vrot.slane %v1102_v57, 1  ;;  %v1447_v20 = vsel %vm215_vm0, %v1431_v24, %v496_v28 }
 0x20e   : > { %v1231_v2 = vrot.slane %v1230_v55, 1  ;;  %v1405_v47 = vrot.slane %v1404_v11, 2  ;;  %v1464_v16 = vsel %vm1449_vm2, %v1447_v20, %v624_v4  ;;  %v321_v18 = vsel %vm215_vm0, %v214_v27, 0.0 }
 0x20f   : > { %v2664_v48 = vrot.slane %v2663_v25, 1  ;;  %v2523_v49 = vmax.f32 %v5126_v1, %v2522_v15  ;;  %v1104_v63 = vadd.f32 %v1103_v17, %v1102_v57  ;;  %v1481_v3 = vsel %vm1466_vm3, %v1464_v16, %v800_v5 }
 0x210   : > { %v1232_v45 = vadd.f32 %v1231_v2, %v1230_v55  ;;  %v1406_v7 = vadd.f32 %v1405_v47, %v1404_v11  ;;  %v1498_v52 = vsel %vm1483_vm4, %v1481_v3, %v928_v62  ;;  %v322_v53 = vrot.slane %v321_v18, 4 }
 0x211   : > { %v2665_v28 = vadd.f32 %v2664_v48, %v2663_v25  ;;  %v2524_v31 = vrot.slane %v2523_v49, 2  ;;  %v1566_v38 = vmul.f32 %v4269_v8, %v1498_v52  ;;  %v1596_v59 = vmul.f32 %v4272_v9, %v1498_v52 }
 0x212   : > { %v1407_v4 = vrot.slane %v1406_v7, 1  ;;  %v1515_v39 = vsel %vm1500_vm5, %v1104_v63, %v1232_v45  ;;  %v1742_v19 = vmul.f32 %v4276_v13, %v1498_v52  ;;  %v1888_v36 = vmul.f32 %v4279_v14, %v1498_v52 }
 0x213   : > { %3905 = vrcp.f32 %v2665_v28  ;;  %v2525_v54 = vmax.f32 %v2523_v49, %v2524_v31  ;;  %v1676_v60 = vrot.slane %v1596_v59, 1  ;;  %v2034_v61 = vmul.f32 %v4287_v21, %v1498_v52  ;;  %v647_v28 = vld [vmem:[%s4221_s18 + $0x1b8] sm:$0xf0] }
 0x214   : > { %v1408_v62 = vadd.f32 %v1407_v4, %v1406_v7  ;;  %v1822_v40 = vrot.slane %v1742_v19, 2  ;;  %v1968_v44 = vrot.slane %v1888_v36, 3  ;;  %v2180_v46 = vmul.f32 %v4290_v22, %v1498_v52 }
 0x215   : > { %v2526_v33 = vrot.slane %v2525_v54, 1  ;;  %v2114_v51 = vrot.slane %v2034_v61, 4  ;;  %v2326_v57 = vmul.f32 %v4296_v29, %v1498_v52  ;;  %v323_v27 = vadd.f32 %v322_v53, %v321_v18  ;;  %v823_v61 = vld [vmem:[%s4221_s18 + $0x1d8] sm:$0xf] }
 0x216   : > { %v1532_v5 = vsel %vm1517_vm6, %v1515_v39, %v1408_v62  ;;  %v2260_v55 = vrot.slane %v2180_v46, 5  ;;  %v375_v11 = vrot.slane %v343_v0, 4  ;;  %v625_v24 = vsel %vm215_vm0, %v519_v58, 0.0  ;;  %v951_v0 = vld [vmem:[%s4221_s18 + $0x1d8] sm:$0xf0] }
 0x217   : > { %v2527_v25 = vmax.f32 %v2525_v54, %v2526_v33  ;;  %v1548_v15 = vsel %vm1416_vm1, %v1532_v5, 0.0  ;;  %v2406_v17 = vrot.slane %v2326_v57, 6  ;;  %v324_v20 = vrot.slane %v323_v27, 2  ;;  %v1127_v33 = vld [vmem:[%s4221_s18 + $0x1f8] sm:$0xf] }
 0x218   : > { %v1600_v2 = vmul.f32 %v4272_v9, %v1548_v15  ;;  %v1746_v47 = vmul.f32 %v4276_v13, %v1548_v15  ;;  %v1892_v16 = vmul.f32 %v4279_v14, %v1548_v15  ;;  %v2038_v18 = vmul.f32 %v4287_v21, %v1548_v15 }
 0x219   : > { %v2553_v48 = vsub.f32 %v5126_v1, %v2527_v25  ;;  %v2184_v49 = vmul.f32 %v4290_v22, %v1548_v15  ;;  %v2330_v63 = vmul.f32 %v4296_v29, %v1548_v15  ;;  %v325_v3 = vadd.f32 %v324_v20, %v323_v27 }
 0x21a   : > { %v1677_v45 = vrot.slane %v1600_v2, 1  ;;  %v1823_v7 = vrot.slane %v1746_v47, 2  ;;  %v1969_v52 = vrot.slane %v1892_v16, 3  ;;  %v2115_v53 = vrot.slane %v2038_v18, 4 }
 0x21b   : > { %v2582_v31 = vmul.f32 1.442695, %v2553_v48  ;;  %v2261_v59 = vrot.slane %v2184_v49, 5  ;;  %v2407_v4 = vrot.slane %v2330_v63, 6  ;;  %v326_v39 = vrot.slane %v325_v3, 1 }
 0x21c   : > { %v1678_v19 = vsel %vm1483_vm4, %v1676_v60, %v1677_v45  ;;  %v1824_v1 = vsel %vm1466_vm3, %v1822_v40, %v1823_v7  ;;  %v1970_v36 = vsel %vm1449_vm2, %v1968_v44, %v1969_v52  ;;  %v2116_v54 = vsel %vm215_vm0, %v2114_v51, %v2115_v53 }
 0x21d   : > { %3907 = vpow2.f32 %v2582_v31  ;;  %v1712_v58 = vadd.f32 %v1678_v19, %v1566_v38  ;;  %v2262_v62 = vsel %vm1416_vm1, %v2260_v55, %v2261_v59  ;;  %v2408_v46 = vsel %vm1517_vm6, %v2406_v17, %v2407_v4 }
 0x21e   : > { %v327_v57 = vadd.f32 %v326_v39, %v325_v3  ;;  %v497_v27 = vsel %vm215_vm0, %v375_v11, 0.0  ;;  %v626_v5 = vrot.slane %v625_v24, 4  ;;  %v679_v60 = vrot.slane %v647_v28, 4 }
 0x21f   : > { %v1858_v25 = vadd.f32 %v1824_v1, %v1712_v58  ;;  %v498_v40 = vrot.slane %v497_v27, 4  ;;  %v929_v44 = vsel %vm215_vm0, %v823_v61, 0.0  ;;  %v983_v15 = vrot.slane %v951_v0, 4  ;;  %v1255_v0 = vld [vmem:[%s4221_s18 + $0x1f8] sm:$0xf0] }
 0x220   : > { %v3906_v51 = vpop.eup %3905  ;;  %v627_v20 = vadd.f32 %v626_v5, %v625_v24  ;;  %v801_v2 = vsel %vm215_vm0, %v679_v60, 0.0  ;;  %v930_v38 = vrot.slane %v929_v44, 4  ;;  %v1233_v55 = vsel %vm215_vm0, %v1127_v33, 0.0 }
 0x221   : > { %v2709_v47 = vmul.f32 4.0, %v3906_v51  ;;  %v2004_v17 = vadd.f32 %v1970_v36, %v1858_v25  ;;  %v499_v16 = vadd.f32 %v498_v40, %v497_v27  ;;  %v802_v18 = vrot.slane %v801_v2, 4 }
 0x222   : > { %v628_v48 = vrot.slane %v627_v20, 2  ;;  %v931_v11 = vadd.f32 %v930_v38, %v929_v44  ;;  %v1105_v49 = vsel %vm215_vm0, %v983_v15, 0.0  ;;  %v1234_v63 = vrot.slane %v1233_v55, 4 }
 0x223   : > { %v5175_v3 = vmul.f32 %v5115_v50, %v2709_v47  ;;  %v2150_v45 = vadd.f32 %v2116_v54, %v2004_v17  ;;  %v500_v24 = vrot.slane %v499_v16, 2  ;;  %v803_v7 = vadd.f32 %v802_v18, %v801_v2  ;;  %v3929_v54 = vld [vmem:[%s4221_s18 + $0x180] sm:$0xf] }
 0x224   : > { %v629_v52 = vadd.f32 %v628_v48, %v627_v20  ;;  %v932_v53 = vrot.slane %v931_v11, 2  ;;  %v1106_v28 = vrot.slane %v1105_v49, 4  ;;  %v1235_v31 = vadd.f32 %v1234_v63, %v1233_v55 }
 0x225   : > { %v2783_v59 = vrot.slane %v5175_v3, %v4314_v43  ;;  %v2296_v4 = vadd.f32 %v2262_v62, %v2150_v45  ;;  %v501_v39 = vadd.f32 %v500_v24, %v499_v16  ;;  %v804_v19 = vrot.slane %v803_v7, 2 }
 0x226   : > { %v630_v1 = vrot.slane %v629_v52, 1  ;;  %v933_v36 = vadd.f32 %v932_v53, %v931_v11  ;;  %v1107_v50 = vadd.f32 %v1106_v28, %v1105_v49  ;;  %v1236_v61 = vrot.slane %v1235_v31, 2 }
 0x227   : > { %v2808_v58 = vmul.f32 %v3929_v54, %v2783_v59  ;;  %v5181_v33 = vadd.f32 %v2408_v46, %v2296_v4  ;;  %v502_v27 = vrot.slane %v501_v39, 1  ;;  %v805_v5 = vadd.f32 %v804_v19, %v803_v7 }
 0x228   : > { %v631_v60 = vadd.f32 %v630_v1, %v629_v52  ;;  %v934_v25 = vrot.slane %v933_v36, 1  ;;  %v1108_v40 = vrot.slane %v1107_v50, 2  ;;  %v1237_v44 = vadd.f32 %v1236_v61, %v1235_v31 }
 0x229   : > { %2824 = vst [vmem:[%s4455_s25 + $0x180] sm:$0xf] %v2808_v58  ;;  %v2528_v62 = vrot.slane %v5181_v33, 4  ;;  %v503_v15 = vadd.f32 %v502_v27, %v501_v39  ;;  %v806_v51 = vrot.slane %v805_v5, 1  ;;  %v1287_v20 = vrot.slane %v1255_v0, 4 }
 0x22a   : > { %v5185_v2 = vpop.eup %3907  ;;  %v935_v38 = vadd.f32 %v934_v25, %v933_v36  ;;  %v1109_v55 = vadd.f32 %v1108_v40, %v1107_v50  ;;  %v1238_v47 = vrot.slane %v1237_v44, 1  ;;  %v1432_v46 = vsel %vm1416_vm1, 0.0, %v327_v57 }
 0x22b   : > { %v2666_v17 = vrot.slane %v5185_v2, 4  ;;  %v2529_v16 = vmax.f32 %v5181_v33, %v2528_v62  ;;  %v807_v18 = vadd.f32 %v806_v51, %v805_v5  ;;  %v1409_v48 = vsel %vm215_vm0, %v1287_v20, 0.0 }
 0x22c   : > { %v1110_v11 = vrot.slane %v1109_v55, 1  ;;  %v1239_v49 = vadd.f32 %v1238_v47, %v1237_v44  ;;  %v1410_v63 = vrot.slane %v1409_v48, 4  ;;  %v1448_v45 = vsel %vm215_vm0, %v1432_v46, %v503_v15  ;;  %v2828_v44 = vld [vmem:[%s4221_s18] sm:$0xf0] }
 0x22d   : > { %v2667_v24 = vadd.f32 %v5185_v2, %v2666_v17  ;;  %v2530_v7 = vrot.slane %v2529_v16, 2  ;;  %v1465_v52 = vsel %vm1449_vm2, %v1448_v45, %v631_v60  ;;  %v5195_v53 = vsub.s32 1, %v4299_v30  ;;  %v2829_v17 = vld [vmem:[%s4221_s18 + $0x8] sm:$0xf0] }
 0x22e   : > { %v1111_v57 = vadd.f32 %v1110_v11, %v1109_v55  ;;  %v1411_v28 = vadd.f32 %v1410_v63, %v1409_v48  ;;  %v1482_v31 = vsel %vm1466_vm3, %v1465_v52, %v807_v18  ;;  %v5199_v59 = vsub.s32 2, %v4299_v30  ;;  %v2831_v63 = vld [vmem:[%s4221_s18 + $0x18] sm:$0xf0] }
 0x22f   : > { %v2668_v4 = vrot.slane %v2667_v24, 2  ;;  %v2531_v39 = vmax.f32 %v2529_v16, %v2530_v7  ;;  %v1499_v19 = vsel %vm1483_vm4, %v1482_v31, %v935_v38  ;;  %v2847_v1 = vrot.slane %v4437_v42, %v5195_v53 }
 0x230   : > { %v1412_v36 = vrot.slane %v1411_v28, 2  ;;  %v1516_v50 = vsel %vm1500_vm5, %v1111_v57, %v1239_v49  ;;  %v5206_v61 = vmul.f32 %v4269_v8, %v1499_v19  ;;  %v5209_v0 = vmul.f32 %v4272_v9, %v1499_v19  ;;  %v2830_v49 = vld [vmem:[%s4221_s18 + $0x10] sm:$0xf0]  ;;  %v2832_v57 = vld [vmem:[%s4221_s18 + $0x80] sm:$0xf0] }
 0x231   : > { %v2669_v54 = vadd.f32 %v2668_v4, %v2667_v24  ;;  %v2532_v58 = vrot.slane %v2531_v39, 1  ;;  %v5212_v27 = vmul.f32 %v4276_v13, %v1499_v19  ;;  %v5215_v5 = vmul.f32 %v4279_v14, %v1499_v19 }
 0x232   : > { %v1413_v60 = vadd.f32 %v1412_v36, %v1411_v28  ;;  %v1679_v25 = vrot.slane %v5209_v0, 1  ;;  %v5219_v40 = vmul.f32 %v4287_v21, %v1499_v19  ;;  %v5222_v8 = vmul.f32 %v4290_v22, %v1499_v19 }
 0x233   : > { %v2670_v62 = vrot.slane %v2669_v54, 1  ;;  %v2533_v15 = vmax.f32 %v2531_v39, %v2532_v58  ;;  %v1825_v51 = vrot.slane %v5212_v27, 2  ;;  %v1971_v20 = vrot.slane %v5215_v5, 3 }
 0x234   : > { %v1414_v38 = vrot.slane %v1413_v60, 1  ;;  %v2117_v55 = vrot.slane %v5219_v40, 4  ;;  %v2263_v47 = vrot.slane %v5222_v8, 5  ;;  %v2327_v46 = vmul.f32 %v4296_v29, %v1499_v19 }
 0x235   : > { %v2671_v16 = vadd.f32 %v2670_v62, %v2669_v54  ;;  %v2554_v18 = vsub.f32 %v5181_v33, %v2533_v15  ;;  %v2908_v48 = vmul.f32 %v2847_v1, %v2828_v44  ;;  %v2851_v11 = vrot.slane %v4508_v26, %v5195_v53  ;;  %v2833_v1 = vld [vmem:[%s4221_s18 + $0x88] sm:$0xf0]  ;;  %v2834_v54 = vld [vmem:[%s4221_s18 + $0x90] sm:$0xf0] }
 0x236   : > { %v1415_v45 = vadd.f32 %v1414_v38, %v1413_v60  ;;  %v2409_v24 = vrot.slane %v2327_v46, 6  ;;  %v2855_v7 = vrot.slane %v4564_v41, %v5195_v53  ;;  %v2859_v52 = vrot.slane %v4630_v56, %v5195_v53 }
 0x237   : > { %3909 = vrcp.f32 %v2671_v16  ;;  %v2584_v33 = vmul.f32 1.442695, %v2554_v18  ;;  %2924 = vst [vmem:[%s4455_s25] sm:$0xf0] %v2908_v48  ;;  %v2909_v28 = vmul.f32 %v2851_v11, %v2829_v17  ;;  %v2863_v31 = vrot.slane %v4688_v10, %v5195_v53  ;;  %v2835_v16 = vld [vmem:[%s4221_s18 + $0x98] sm:$0xf0] }
 0x238   : > { %v1533_v4 = vsel %vm1517_vm6, %v1516_v50, %v1415_v45  ;;  %v2910_v39 = vmul.f32 %v2855_v7, %v2830_v49  ;;  %v2911_v19 = vmul.f32 %v2859_v52, %v2831_v63  ;;  %v2867_v36 = vrot.slane %v4753_v6, %v5195_v53  ;;  %v2836_v18 = vld [vmem:[%s4221_s18 + $0x100] sm:$0xf0] }
 0x239   : > { %3911 = vpow2.f32 %v2584_v33  ;;  %v1549_v58 = vsel %vm1416_vm1, %v1533_v4, 0.0  ;;  %2925 = vst [vmem:[%s4455_s25 + $0x8] sm:$0xf0] %v2909_v28  ;;  %v2912_v27 = vmul.f32 %v2863_v31, %v2832_v57  ;;  %v2871_v5 = vrot.slane %v4806_v37, %v5195_v53  ;;  %v2837_v57 = vld [vmem:[%s4221_s18 + $0x108] sm:$0xf0] }
 0x23a   : > { %v1601_v50 = vmul.f32 %v4272_v9, %v1549_v58  ;;  %v1747_v60 = vmul.f32 %v4276_v13, %v1549_v58  ;;  %v1893_v40 = vmul.f32 %v4279_v14, %v1549_v58  ;;  %v2039_v8 = vmul.f32 %v4287_v21, %v1549_v58  ;;  %2926 = vst [vmem:[%s4455_s25 + $0x10] sm:$0xf0] %v2910_v39  ;;  %v2839_v33 = vld [vmem:[%s4221_s18 + $0x118] sm:$0xf0]  ;;  %v2940_v28 = vld [vmem:[%s4221_s18 + $0x20] sm:$0xf] }
 0x23b   : > { %2927 = vst [vmem:[%s4455_s25 + $0x18] sm:$0xf0] %v2911_v19  ;;  %v2185_v44 = vmul.f32 %v4290_v22, %v1549_v58  ;;  %v2331_v62 = vmul.f32 %v4296_v29, %v1549_v58  ;;  %2928 = vst [vmem:[%s4455_s25 + $0x80] sm:$0xf0] %v2912_v27  ;;  %v2913_v15 = vmul.f32 %v2867_v36, %v2833_v1  ;;  %v2942_v1 = vld [vmem:[%s4221_s18 + $0x30] sm:$0xf] }
 0x23c   : > { %v2914_v38 = vmul.f32 %v2871_v5, %v2834_v54  ;;  %v1680_v46 = vrot.slane %v1601_v50, 1  ;;  %v1826_v9 = vrot.slane %v1747_v60, 2  ;;  %v1972_v17 = vrot.slane %v1893_v40, 3 }
 0x23d   : > { %v2118_v13 = vrot.slane %v2039_v8, 4  ;;  %v2264_v14 = vrot.slane %v2185_v44, 5  ;;  %v2410_v21 = vrot.slane %v2331_v62, 6  ;;  %2929 = vst [vmem:[%s4455_s25 + $0x88] sm:$0xf0] %v2913_v15  ;;  %v2875_v22 = vrot.slane %v4871_v35, %v5195_v53 }
 0x23e   : > { %2930 = vst [vmem:[%s4455_s25 + $0x90] sm:$0xf0] %v2914_v38  ;;  %v2879_v29 = vrot.slane %v4927_v32, %v5195_v53  ;;  %v1681_v48 = vsel %vm1483_vm4, %v1679_v25, %v1680_v46  ;;  %v1827_v11 = vsel %vm1466_vm3, %v1825_v51, %v1826_v9  ;;  %v1973_v49 = vsel %vm1449_vm2, %v1971_v20, %v1972_v17  ;;  %v2838_v25 = vld [vmem:[%s4221_s18 + $0x110] sm:$0xf0]  ;;  %v2943_v8 = vld [vmem:[%s4221_s18 + $0x38] sm:$0xf] }
 0x23f   : > { %v2119_v63 = vsel %vm215_vm0, %v2117_v55, %v2118_v13  ;;  %v1713_v45 = vadd.f32 %v1681_v48, %v5206_v61  ;;  %v2265_v7 = vsel %vm1416_vm1, %v2263_v47, %v2264_v14  ;;  %v5279_v52 = vsel %vm1517_vm6, %v2409_v24, %v2410_v21  ;;  %v2840_v47 = vld [vmem:[%s4221_s18 + $0x180] sm:$0xf0]  ;;  %v2941_v24 = vld [vmem:[%s4221_s18 + $0x28] sm:$0xf]  ;;  %v2944_v44 = vld [vmem:[%s4221_s18 + $0xa0] sm:$0xf] }
 0x240   : > { %v2915_v0 = vmul.f32 %v2875_v22, %v2835_v16  ;;  %v2916_v51 = vmul.f32 %v2879_v29, %v2836_v18  ;;  %v2883_v20 = vrot.slane %v4992_v12, %v5195_v53  ;;  %v2887_v55 = vrot.slane %v5050_v34, %v5195_v53  ;;  %v2945_v62 = vld [vmem:[%s4221_s18 + $0xa8] sm:$0xf]  ;;  %v2946_v13 = vld [vmem:[%s4221_s18 + $0xb0] sm:$0xf]  ;;  %v2947_v22 = vld [vmem:[%s4221_s18 + $0xb8] sm:$0xf] }
 0x241   : > { %v2891_v61 = vrot.slane %v5119_v23, %v5195_v53  ;;  %v1859_v31 = vadd.f32 %v1827_v11, %v1713_v45  ;;  %v2895_v4 = vrot.slane %v5175_v3, %v5195_v53  ;;  %v2959_v39 = vrot.slane %v4437_v42, %v5199_v59  ;;  %v2948_v29 = vld [vmem:[%s4221_s18 + $0x120] sm:$0xf] }
 0x242   : > { %2931 = vst [vmem:[%s4455_s25 + $0x98] sm:$0xf0] %v2915_v0  ;;  %v2963_v19 = vrot.slane %v4508_v26, %v5199_v59  ;;  %2932 = vst [vmem:[%s4455_s25 + $0x100] sm:$0xf0] %v2916_v51  ;;  %v2917_v36 = vmul.f32 %v2883_v20, %v2837_v57  ;;  %v2918_v54 = vmul.f32 %v2887_v55, %v2838_v25  ;;  %v2949_v51 = vld [vmem:[%s4221_s18 + $0x128] sm:$0xf] }
 0x243   : > { %v2919_v58 = vmul.f32 %v2891_v61, %v2839_v33  ;;  %v2967_v27 = vrot.slane %v4564_v41, %v5199_v59  ;;  %v2005_v5 = vadd.f32 %v1973_v49, %v1859_v31  ;;  %v2920_v50 = vmul.f32 %v2895_v4, %v2840_v47  ;;  %v2950_v20 = vld [vmem:[%s4221_s18 + $0x130] sm:$0xf]  ;;  %v2841_v55 = vld [vmem:[%s4221_s18 + $0x188] sm:$0xf0] }
 0x244   : > { %v3020_v60 = vmul.f32 %v2959_v39, %v2940_v28  ;;  %v3021_v40 = vmul.f32 %v2963_v19, %v2941_v24  ;;  %v3910_v15 = vpop.eup %3909  ;;  %2933 = vst [vmem:[%s4455_s25 + $0x108] sm:$0xf0] %v2917_v36  ;;  %2934 = vst [vmem:[%s4455_s25 + $0x110] sm:$0xf0] %v2918_v54  ;;  %v2971_v46 = vrot.slane %v4630_v56, %v5199_v59  ;;  %v2951_v39 = vld [vmem:[%s4221_s18 + $0x138] sm:$0xf] }
 0x245   : > { %2935 = vst [vmem:[%s4455_s25 + $0x118] sm:$0xf0] %v2919_v58  ;;  %v3022_v38 = vmul.f32 %v2967_v27, %v2942_v1  ;;  %v2975_v9 = vrot.slane %v4688_v10, %v5199_v59  ;;  %v2979_v17 = vrot.slane %v4753_v6, %v5199_v59  ;;  %v2711_v16 = vmul.f32 4.0, %v3910_v15  ;;  %2936 = vst [vmem:[%s4455_s25 + $0x180] sm:$0xf0] %v2920_v50 }
 0x246   : > { %v2151_v14 = vadd.f32 %v2119_v63, %v2005_v5  ;;  %3036 = vst [vmem:[%s4455_s25 + $0x20] sm:$0xf] %v3020_v60  ;;  %3037 = vst [vmem:[%s4455_s25 + $0x28] sm:$0xf] %v3021_v40  ;;  %v2983_v21 = vrot.slane %v4806_v37, %v5199_v59  ;;  %v2987_v18 = vrot.slane %v4871_v35, %v5199_v59  ;;  %v5326_v48 = vpop.eup %3911  ;;  %v2952_v19 = vld [vmem:[%s4221_s18 + $0x1a0] sm:$0xf] }
 0x247   : > { %3038 = vst [vmem:[%s4455_s25 + $0x30] sm:$0xf] %v3022_v38  ;;  %v3023_v11 = vmul.f32 %v2971_v46, %v2943_v8  ;;  %v3024_v49 = vmul.f32 %v2975_v9, %v2944_v44  ;;  %v3025_v63 = vmul.f32 %v2979_v17, %v2945_v62  ;;  %v2991_v45 = vrot.slane %v4927_v32, %v5199_v59  ;;  %v3930_v58 = vld [vmem:[%s4221_s18 + $0x188] sm:$0xf]  ;;  %v3052_v15 = vld [vmem:[%s4221_s18 + $0x20] sm:$0xf0] }
 0x248   : > { %v5332_v0 = vmul.f32 %v5185_v2, %v2711_v16  ;;  %v2672_v57 = vrot.slane %v5326_v48, 4  ;;  %v2297_v25 = vadd.f32 %v2265_v7, %v2151_v14  ;;  %v3026_v33 = vmul.f32 %v2983_v21, %v2946_v13  ;;  %v2953_v40 = vld [vmem:[%s4221_s18 + $0x1a8] sm:$0xf]  ;;  %v3053_v17 = vld [vmem:[%s4221_s18 + $0x28] sm:$0xf0] }
 0x249   : > { %3039 = vst [vmem:[%s4455_s25 + $0x38] sm:$0xf] %v3023_v11  ;;  %3040 = vst [vmem:[%s4455_s25 + $0xa0] sm:$0xf] %v3024_v49  ;;  %v3027_v61 = vmul.f32 %v2987_v18, %v2947_v22  ;;  %v3028_v47 = vmul.f32 %v2991_v45, %v2948_v29  ;;  %v2995_v2 = vrot.slane %v4992_v12, %v5199_v59  ;;  %v5371_v38 = vsub.s32 3, %v4299_v30 }
 0x24a   : > { %3041 = vst [vmem:[%s4455_s25 + $0xa8] sm:$0xf] %v3025_v63  ;;  %v2999_v7 = vrot.slane %v5050_v34, %v5199_v59  ;;  %v2787_v28 = vrot.slane %v5332_v0, %v4314_v43  ;;  %v2673_v24 = vadd.f32 %v5326_v48, %v2672_v57  ;;  %v5349_v31 = vadd.f32 %v5279_v52, %v2297_v25  ;;  %v3054_v13 = vld [vmem:[%s4221_s18 + $0x30] sm:$0xf0]  ;;  %v3055_v11 = vld [vmem:[%s4221_s18 + $0x38] sm:$0xf0] }
 0x24b   : > { %v2899_v4 = vrot.slane %v5332_v0, %v5195_v53  ;;  %3042 = vst [vmem:[%s4455_s25 + $0xb0] sm:$0xf] %v3026_v33  ;;  %3043 = vst [vmem:[%s4455_s25 + $0xb8] sm:$0xf] %v3027_v61  ;;  %v3029_v1 = vmul.f32 %v2995_v2, %v2949_v51  ;;  %v3003_v54 = vrot.slane %v5119_v23, %v5199_v59  ;;  %v5379_v16 = vsub.s32 4, %v4299_v30 }
 0x24c   : > { %3044 = vst [vmem:[%s4455_s25 + $0x120] sm:$0xf] %v3028_v47  ;;  %v3030_v36 = vmul.f32 %v2999_v7, %v2950_v20  ;;  %v3007_v52 = vrot.slane %v5175_v3, %v5199_v59  ;;  %v2809_v27 = vmul.f32 %v3930_v58, %v2787_v28  ;;  %v2674_v5 = vrot.slane %v2673_v24, 2  ;;  %v3056_v49 = vld [vmem:[%s4221_s18 + $0xa0] sm:$0xf0] }
 0x24d   : > { %v2534_v50 = vrot.slane %v5349_v31, 4  ;;  %v2921_v60 = vmul.f32 %v2899_v4, %v2841_v55  ;;  %3045 = vst [vmem:[%s4455_s25 + $0x128] sm:$0xf] %v3029_v1  ;;  %v3031_v8 = vmul.f32 %v3003_v54, %v2951_v39  ;;  %v3011_v62 = vrot.slane %v5332_v0, %v5199_v59  ;;  %v3057_v33 = vld [vmem:[%s4221_s18 + $0xa8] sm:$0xf0] }
 0x24e   : > { %3046 = vst [vmem:[%s4455_s25 + $0x130] sm:$0xf] %v3030_v36  ;;  %v3032_v44 = vmul.f32 %v3007_v52, %v2952_v19  ;;  %2825 = vst [vmem:[%s4455_s25 + $0x188] sm:$0xf] %v2809_v27  ;;  %v2675_v46 = vadd.f32 %v2674_v5, %v2673_v24  ;;  %v5382_v14 = vsub.s32 5, %v4299_v30  ;;  %v3071_v22 = vrot.slane %v4437_v42, %v5371_v38 }
 0x24f   : > { %v2535_v9 = vmax.f32 %v5349_v31, %v2534_v50  ;;  %2937 = vst [vmem:[%s4455_s25 + $0x188] sm:$0xf0] %v2921_v60  ;;  %3047 = vst [vmem:[%s4455_s25 + $0x138] sm:$0xf] %v3031_v8  ;;  %v3033_v21 = vmul.f32 %v3011_v62, %v2953_v40  ;;  %v3075_v18 = vrot.slane %v4508_v26, %v5371_v38  ;;  %v3058_v24 = vld [vmem:[%s4221_s18 + $0xb0] sm:$0xf0] }
 0x250   : > { %3048 = vst [vmem:[%s4455_s25 + $0x1a0] sm:$0xf] %v3032_v44  ;;  %v3079_v29 = vrot.slane %v4564_v41, %v5371_v38  ;;  %v2676_v63 = vrot.slane %v2675_v46, 1  ;;  %v3083_v57 = vrot.slane %v4630_v56, %v5371_v38  ;;  %v3087_v25 = vrot.slane %v4688_v10, %v5371_v38  ;;  %v3059_v4 = vld [vmem:[%s4221_s18 + $0xb8] sm:$0xf0] }
 0x251   : > { %v2536_v45 = vrot.slane %v2535_v9, 2  ;;  %3049 = vst [vmem:[%s4455_s25 + $0x1a8] sm:$0xf] %v3033_v21  ;;  %v3132_v51 = vmul.f32 %v3071_v22, %v3052_v15  ;;  %v3133_v20 = vmul.f32 %v3075_v18, %v3053_v17  ;;  %v3091_v61 = vrot.slane %v4753_v6, %v5371_v38  ;;  %v3060_v39 = vld [vmem:[%s4221_s18 + $0x120] sm:$0xf0] }
 0x252   : > { %v3134_v55 = vmul.f32 %v3079_v29, %v3054_v13  ;;  %v2677_v47 = vadd.f32 %v2676_v63, %v2675_v46  ;;  %v3135_v7 = vmul.f32 %v3083_v57, %v3055_v11  ;;  %v3136_v28 = vmul.f32 %v3087_v25, %v3056_v49  ;;  %v3061_v52 = vld [vmem:[%s4221_s18 + $0x128] sm:$0xf0]  ;;  %v3062_v58 = vld [vmem:[%s4221_s18 + $0x130] sm:$0xf0]  ;;  %v3063_v60 = vld [vmem:[%s4221_s18 + $0x138] sm:$0xf0] }
 0x253   : > { %v2537_v2 = vmax.f32 %v2535_v9, %v2536_v45  ;;  %3148 = vst [vmem:[%s4455_s25 + $0x20] sm:$0xf0] %v3132_v51  ;;  %3149 = vst [vmem:[%s4455_s25 + $0x28] sm:$0xf0] %v3133_v20  ;;  %v3137_v19 = vmul.f32 %v3091_v61, %v3057_v33  ;;  %v3095_v1 = vrot.slane %v4806_v37, %v5371_v38  ;;  %v3064_v15 = vld [vmem:[%s4221_s18 + $0x1a0] sm:$0xf0] }
 0x254   : > { %3150 = vst [vmem:[%s4455_s25 + $0x30] sm:$0xf0] %v3134_v55  ;;  %v3099_v36 = vrot.slane %v4871_v35, %v5371_v38  ;;  %v3103_v54 = vrot.slane %v4927_v32, %v5371_v38  ;;  %3913 = vrcp.f32 %v2677_v47  ;;  %3151 = vst [vmem:[%s4455_s25 + $0x38] sm:$0xf0] %v3135_v7  ;;  %v3107_v5 = vrot.slane %v4992_v12, %v5371_v38  ;;  %v3065_v21 = vld [vmem:[%s4221_s18 + $0x1a8] sm:$0xf0] }
 0x255   : > { %v2538_v27 = vrot.slane %v2537_v2, 1  ;;  %3152 = vst [vmem:[%s4455_s25 + $0xa0] sm:$0xf0] %v3136_v28  ;;  %v3111_v50 = vrot.slane %v5050_v34, %v5371_v38  ;;  %3153 = vst [vmem:[%s4455_s25 + $0xa8] sm:$0xf0] %v3137_v19  ;;  %v3138_v40 = vmul.f32 %v3095_v1, %v3058_v24  ;;  %v3115_v62 = vrot.slane %v5119_v23, %v5371_v38 }
 0x256   : > { %v3139_v8 = vmul.f32 %v3099_v36, %v3059_v4  ;;  %v3140_v44 = vmul.f32 %v3103_v54, %v3060_v39  ;;  %v3141_v9 = vmul.f32 %v3107_v5, %v3061_v52  ;;  %v3119_v13 = vrot.slane %v5175_v3, %v5371_v38  ;;  %v3164_v22 = vld [vmem:[%s4221_s18 + $0x40] sm:$0xf]  ;;  %v3165_v18 = vld [vmem:[%s4221_s18 + $0x48] sm:$0xf]  ;;  %v3166_v45 = vld [vmem:[%s4221_s18 + $0x50] sm:$0xf] }
 0x257   : > { %v2539_v46 = vmax.f32 %v2537_v2, %v2538_v27  ;;  %v3142_v17 = vmul.f32 %v3111_v50, %v3062_v58  ;;  %3154 = vst [vmem:[%s4455_s25 + $0xb0] sm:$0xf0] %v3138_v40  ;;  %v3143_v29 = vmul.f32 %v3115_v62, %v3063_v60  ;;  %v3123_v11 = vrot.slane %v5332_v0, %v5371_v38  ;;  %v3167_v57 = vld [vmem:[%s4221_s18 + $0x58] sm:$0xf]  ;;  %v3168_v55 = vld [vmem:[%s4221_s18 + $0xc0] sm:$0xf] }
 0x258   : > { %3155 = vst [vmem:[%s4455_s25 + $0xb8] sm:$0xf0] %v3139_v8  ;;  %3156 = vst [vmem:[%s4455_s25 + $0x120] sm:$0xf0] %v3140_v44  ;;  %v3183_v49 = vrot.slane %v4437_v42, %v5379_v16  ;;  %v3187_v63 = vrot.slane %v4508_v26, %v5379_v16  ;;  %v3144_v33 = vmul.f32 %v3119_v13, %v3064_v15  ;;  %v3169_v7 = vld [vmem:[%s4221_s18 + $0xc8] sm:$0xf] }
 0x259   : > { %v2555_v25 = vsub.f32 %v5349_v31, %v2539_v46  ;;  %3157 = vst [vmem:[%s4455_s25 + $0x128] sm:$0xf0] %v3141_v9  ;;  %3158 = vst [vmem:[%s4455_s25 + $0x130] sm:$0xf0] %v3142_v17  ;;  %v3191_v51 = vrot.slane %v4564_v41, %v5379_v16  ;;  %v3195_v20 = vrot.slane %v4630_v56, %v5379_v16  ;;  %v3170_v28 = vld [vmem:[%s4221_s18 + $0xd0] sm:$0xf] }
 0x25a   : > { %3159 = vst [vmem:[%s4455_s25 + $0x138] sm:$0xf0] %v3143_v29  ;;  %v3145_v61 = vmul.f32 %v3123_v11, %v3065_v21  ;;  %v3244_v47 = vmul.f32 %v3183_v49, %v3164_v22  ;;  %v3245_v2 = vmul.f32 %v3187_v63, %v3165_v18  ;;  %v3199_v31 = vrot.slane %v4688_v10, %v5379_v16  ;;  %v3171_v1 = vld [vmem:[%s4221_s18 + $0xd8] sm:$0xf]  ;;  %v3172_v36 = vld [vmem:[%s4221_s18 + $0x140] sm:$0xf] }
 0x25b   : > { %v2586_v24 = vmul.f32 1.442695, %v2555_v25  ;;  %3160 = vst [vmem:[%s4455_s25 + $0x1a0] sm:$0xf0] %v3144_v33  ;;  %v3246_v4 = vmul.f32 %v3191_v51, %v3166_v45  ;;  %v3247_v39 = vmul.f32 %v3195_v20, %v3167_v57  ;;  %v3203_v19 = vrot.slane %v4753_v6, %v5379_v16  ;;  %v3173_v5 = vld [vmem:[%s4221_s18 + $0x148] sm:$0xf] }
 0x25c   : > { %3161 = vst [vmem:[%s4455_s25 + $0x1a8] sm:$0xf0] %v3145_v61  ;;  %3260 = vst [vmem:[%s4455_s25 + $0x40] sm:$0xf] %v3244_v47  ;;  %v3248_v54 = vmul.f32 %v3199_v31, %v3168_v55  ;;  %v3207_v52 = vrot.slane %v4806_v37, %v5379_v16  ;;  %v3211_v58 = vrot.slane %v4871_v35, %v5379_v16  ;;  %v3174_v50 = vld [vmem:[%s4221_s18 + $0x150] sm:$0xf] }
 0x25d   : > { %3261 = vst [vmem:[%s4455_s25 + $0x48] sm:$0xf] %v3245_v2  ;;  %v3215_v27 = vrot.slane %v4927_v32, %v5379_v16  ;;  %3915 = vpow2.f32 %v2586_v24  ;;  %3262 = vst [vmem:[%s4455_s25 + $0x50] sm:$0xf] %v3246_v4  ;;  %v3249_v60 = vmul.f32 %v3203_v19, %v3169_v7  ;;  %v3219_v40 = vrot.slane %v4992_v12, %v5379_v16  ;;  %v3175_v44 = vld [vmem:[%s4221_s18 + $0x158] sm:$0xf] }
 0x25e   : > { %3263 = vst [vmem:[%s4455_s25 + $0x58] sm:$0xf] %v3247_v39  ;;  %v3223_v8 = vrot.slane %v5050_v34, %v5379_v16  ;;  %3264 = vst [vmem:[%s4455_s25 + $0xc0] sm:$0xf] %v3248_v54  ;;  %v3250_v62 = vmul.f32 %v3207_v52, %v3170_v28  ;;  %v3251_v15 = vmul.f32 %v3211_v58, %v3171_v1  ;;  %v3176_v17 = vld [vmem:[%s4221_s18 + $0x1c0] sm:$0xf] }
 0x25f   : > { %v3252_v46 = vmul.f32 %v3215_v27, %v3172_v36  ;;  %v3227_v9 = vrot.slane %v5119_v23, %v5379_v16  ;;  %v3177_v13 = vld [vmem:[%s4221_s18 + $0x1c8] sm:$0xf]  ;;  %3265 = vst [vmem:[%s4455_s25 + $0xc8] sm:$0xf] %v3249_v60  ;;  %v3253_v21 = vmul.f32 %v3219_v40, %v3173_v5  ;;  %v3231_v18 = vrot.slane %v5175_v3, %v5379_v16  ;;  %v3276_v11 = vld [vmem:[%s4221_s18 + $0x40] sm:$0xf0] }
 0x260   : > { %v3254_v22 = vmul.f32 %v3223_v8, %v3174_v50  ;;  %v3235_v29 = vrot.slane %v5332_v0, %v5379_v16  ;;  %v3277_v49 = vld [vmem:[%s4221_s18 + $0x48] sm:$0xf0]  ;;  %v3278_v63 = vld [vmem:[%s4221_s18 + $0x50] sm:$0xf0]  ;;  %3266 = vst [vmem:[%s4455_s25 + $0xd0] sm:$0xf] %v3250_v62  ;;  %v3295_v57 = vrot.slane %v4437_v42, %v5382_v14  ;;  %v3299_v25 = vrot.slane %v4508_v26, %v5382_v14 }
 0x261   : > { %3267 = vst [vmem:[%s4455_s25 + $0xd8] sm:$0xf] %v3251_v15  ;;  %3268 = vst [vmem:[%s4455_s25 + $0x140] sm:$0xf] %v3252_v46  ;;  %v3255_v45 = vmul.f32 %v3227_v9, %v3175_v44  ;;  %v3303_v33 = vrot.slane %v4564_v41, %v5382_v14  ;;  %v3279_v51 = vld [vmem:[%s4221_s18 + $0x58] sm:$0xf0]  ;;  %v3256_v55 = vmul.f32 %v3231_v18, %v3176_v17  ;;  %v3914_v7 = vpop.eup %3913 }
 0x262   : > { %v3280_v20 = vld [vmem:[%s4221_s18 + $0xc0] sm:$0xf0]  ;;  %3269 = vst [vmem:[%s4455_s25 + $0x148] sm:$0xf] %v3253_v21  ;;  %3270 = vst [vmem:[%s4455_s25 + $0x150] sm:$0xf] %v3254_v22  ;;  %v3257_v61 = vmul.f32 %v3235_v29, %v3177_v13  ;;  %v3307_v47 = vrot.slane %v4630_v56, %v5382_v14  ;;  %v3311_v2 = vrot.slane %v4688_v10, %v5382_v14 }
 0x263   : > { %v3281_v31 = vld [vmem:[%s4221_s18 + $0xc8] sm:$0xf0]  ;;  %3271 = vst [vmem:[%s4455_s25 + $0x158] sm:$0xf] %v3255_v45  ;;  %v3356_v28 = vmul.f32 %v3295_v57, %v3276_v11  ;;  %v3357_v24 = vmul.f32 %v3299_v25, %v3277_v49  ;;  %v3358_v4 = vmul.f32 %v3303_v33, %v3278_v63  ;;  %v3315_v39 = vrot.slane %v4753_v6, %v5382_v14  ;;  %v3282_v19 = vld [vmem:[%s4221_s18 + $0xd0] sm:$0xf0] }
 0x264   : > { %v3283_v1 = vld [vmem:[%s4221_s18 + $0xd8] sm:$0xf0]  ;;  %v2713_v36 = vmul.f32 4.0, %v3914_v7  ;;  %3272 = vst [vmem:[%s4455_s25 + $0x1c0] sm:$0xf] %v3256_v55  ;;  %v3359_v54 = vmul.f32 %v3307_v47, %v3279_v51  ;;  %v3360_v52 = vmul.f32 %v3311_v2, %v3280_v20  ;;  %v3319_v58 = vrot.slane %v4806_v37, %v5382_v14 }
 0x265   : > { %3273 = vst [vmem:[%s4455_s25 + $0x1c8] sm:$0xf] %v3257_v61  ;;  %v3284_v27 = vld [vmem:[%s4221_s18 + $0x140] sm:$0xf0]  ;;  %v3285_v5 = vld [vmem:[%s4221_s18 + $0x148] sm:$0xf0]  ;;  %v3361_v50 = vmul.f32 %v3315_v39, %v3281_v31  ;;  %v3323_v60 = vrot.slane %v4871_v35, %v5382_v14  ;;  %v3327_v40 = vrot.slane %v4927_v32, %v5382_v14  ;;  %v3331_v8 = vrot.slane %v4992_v12, %v5382_v14 }
 0x266   : > { %3372 = vst [vmem:[%s4455_s25 + $0x40] sm:$0xf0] %v3356_v28  ;;  %3373 = vst [vmem:[%s4455_s25 + $0x48] sm:$0xf0] %v3357_v24  ;;  %v5531_v44 = vmul.f32 %v5326_v48, %v2713_v36  ;;  %v3362_v62 = vmul.f32 %v3319_v58, %v3282_v19  ;;  %v3286_v15 = vld [vmem:[%s4221_s18 + $0x150] sm:$0xf0]  ;;  %v3335_v46 = vrot.slane %v5050_v34, %v5382_v14 }
 0x267   : > { %3374 = vst [vmem:[%s4455_s25 + $0x50] sm:$0xf0] %v3358_v4  ;;  %3375 = vst [vmem:[%s4455_s25 + $0x58] sm:$0xf0] %v3359_v54  ;;  %v3287_v9 = vld [vmem:[%s4221_s18 + $0x158] sm:$0xf0]  ;;  %v3339_v17 = vrot.slane %v5119_v23, %v5382_v14  ;;  %v3363_v18 = vmul.f32 %v3323_v60, %v3283_v1  ;;  %v3364_v29 = vmul.f32 %v3327_v40, %v3284_v27 }
 0x268   : > { %3376 = vst [vmem:[%s4455_s25 + $0xc0] sm:$0xf0] %v3360_v52  ;;  %v3288_v13 = vld [vmem:[%s4221_s18 + $0x1c0] sm:$0xf0]  ;;  %v2842_v21 = vld [vmem:[%s4221_s18 + $0x190] sm:$0xf0]  ;;  %v3365_v11 = vmul.f32 %v3331_v8, %v3285_v5  ;;  %v3343_v49 = vrot.slane %v5175_v3, %v5382_v14  ;;  %v2791_v63 = vrot.slane %v5531_v44, %v4314_v43  ;;  %v2903_v45 = vrot.slane %v5531_v44, %v5195_v53 }
 0x269   : > { %v2954_v22 = vld [vmem:[%s4221_s18 + $0x1b0] sm:$0xf]  ;;  %v3066_v48 = vld [vmem:[%s4221_s18 + $0x1b0] sm:$0xf0]  ;;  %3377 = vst [vmem:[%s4455_s25 + $0xc8] sm:$0xf0] %v3361_v50  ;;  %v3015_v57 = vrot.slane %v5531_v44, %v5199_v59  ;;  %v3127_v25 = vrot.slane %v5531_v44, %v5371_v38  ;;  %v3239_v51 = vrot.slane %v5531_v44, %v5379_v16  ;;  %v3366_v20 = vmul.f32 %v3335_v46, %v3286_v15 }
 0x26a   : > { %v3178_v33 = vld [vmem:[%s4221_s18 + $0x1d0] sm:$0xf]  ;;  %3378 = vst [vmem:[%s4455_s25 + $0xd0] sm:$0xf0] %v3362_v62  ;;  %3379 = vst [vmem:[%s4455_s25 + $0xd8] sm:$0xf0] %v3363_v18  ;;  %v3367_v55 = vmul.f32 %v3339_v17, %v3287_v9  ;;  %v3368_v61 = vmul.f32 %v3343_v49, %v3288_v13  ;;  %v2922_v31 = vmul.f32 %v2903_v45, %v2842_v21  ;;  %v5566_v39 = vpop.eup %3915 }
 0x26b   : > { %3380 = vst [vmem:[%s4455_s25 + $0x140] sm:$0xf0] %v3364_v29  ;;  %3381 = vst [vmem:[%s4455_s25 + $0x148] sm:$0xf0] %v3365_v11  ;;  %v3931_v47 = vld [vmem:[%s4221_s18 + $0x190] sm:$0xf]  ;;  %v3034_v7 = vmul.f32 %v3015_v57, %v2954_v22  ;;  %v3146_v28 = vmul.f32 %v3127_v25, %v3066_v48  ;;  %v3258_v19 = vmul.f32 %v3239_v51, %v3178_v33 }
 0x26c   : > { %v2810_v2 = vmul.f32 %v3931_v47, %v2791_v63  ;;  %v3289_v24 = vld [vmem:[%s4221_s18 + $0x1c8] sm:$0xf0]  ;;  %v3290_v4 = vld [vmem:[%s4221_s18 + $0x1d0] sm:$0xf0]  ;;  %3382 = vst [vmem:[%s4455_s25 + $0x150] sm:$0xf0] %v3366_v20  ;;  %v3347_v1 = vrot.slane %v5332_v0, %v5382_v14  ;;  %v3351_v36 = vrot.slane %v5531_v44, %v5382_v14 }
 0x26d   : > { %3383 = vst [vmem:[%s4455_s25 + $0x158] sm:$0xf0] %v3367_v55  ;;  %3384 = vst [vmem:[%s4455_s25 + $0x1c0] sm:$0xf0] %v3368_v61  ;;  %v5576_v54 = vsub.s32 6, %v4299_v30  ;;  %v2678_v52 = vrot.slane %v5566_v39, 4 }
 0x26e   : > { %2826 = vst [vmem:[%s4455_s25 + $0x190] sm:$0xf] %v2810_v2  ;;  %2938 = vst [vmem:[%s4455_s25 + $0x190] sm:$0xf0] %v2922_v31  ;;  %v3388_v58 = vld [vmem:[%s4221_s18 + $0x60] sm:$0xf]  ;;  %v3369_v50 = vmul.f32 %v3347_v1, %v3289_v24  ;;  %v3370_v60 = vmul.f32 %v3351_v36, %v3290_v4 }
 0x26f   : > { %3050 = vst [vmem:[%s4455_s25 + $0x1b0] sm:$0xf] %v3034_v7  ;;  %3162 = vst [vmem:[%s4455_s25 + $0x1b0] sm:$0xf0] %v3146_v28  ;;  %v3389_v27 = vld [vmem:[%s4221_s18 + $0x68] sm:$0xf]  ;;  %v3407_v40 = vrot.slane %v4437_v42, %v5576_v54  ;;  %v3411_v8 = vrot.slane %v4508_v26, %v5576_v54  ;;  %v2679_v9 = vadd.f32 %v5566_v39, %v2678_v52 }
 0x270   : > { %v5586_v5 = vsub.s32 7, %v4299_v30  ;;  %3274 = vst [vmem:[%s4455_s25 + $0x1d0] sm:$0xf] %v3258_v19  ;;  %v3390_v62 = vld [vmem:[%s4221_s18 + $0x70] sm:$0xf]  ;;  %v3415_v30 = vrot.slane %v4564_v41, %v5576_v54  ;;  %v3419_v17 = vrot.slane %v4630_v56, %v5576_v54  ;;  %v3423_v13 = vrot.slane %v4688_v10, %v5576_v54 }
 0x271   : > { %v3391_v15 = vld [vmem:[%s4221_s18 + $0x78] sm:$0xf]  ;;  %v3392_v46 = vld [vmem:[%s4221_s18 + $0xe0] sm:$0xf]  ;;  %v3393_v21 = vld [vmem:[%s4221_s18 + $0xe8] sm:$0xf]  ;;  %v3468_v48 = vmul.f32 %v3407_v40, %v3388_v58  ;;  %v3469_v18 = vmul.f32 %v3411_v8, %v3389_v27  ;;  %v3427_v29 = vrot.slane %v4753_v6, %v5576_v54  ;;  %v3431_v11 = vrot.slane %v4806_v37, %v5576_v54 }
 0x272   : > { %v3394_v22 = vld [vmem:[%s4221_s18 + $0xf0] sm:$0xf]  ;;  %3385 = vst [vmem:[%s4455_s25 + $0x1c8] sm:$0xf0] %v3369_v50  ;;  %3386 = vst [vmem:[%s4455_s25 + $0x1d0] sm:$0xf0] %v3370_v60  ;;  %v3470_v63 = vmul.f32 %v3415_v30, %v3390_v62  ;;  %v3471_v45 = vmul.f32 %v3419_v17, %v3391_v15  ;;  %v3472_v57 = vmul.f32 %v3423_v13, %v3392_v46 }
 0x273   : > { %v2680_v49 = vrot.slane %v2679_v9, 2  ;;  %v3395_v25 = vld [vmem:[%s4221_s18 + $0xf8] sm:$0xf]  ;;  %v3396_v33 = vld [vmem:[%s4221_s18 + $0x160] sm:$0xf]  ;;  %v3473_v51 = vmul.f32 %v3427_v29, %v3393_v21  ;;  %v3474_v20 = vmul.f32 %v3431_v11, %v3394_v22  ;;  %v3435_v55 = vrot.slane %v4871_v35, %v5576_v54 }
 0x274   : > { %3484 = vst [vmem:[%s4455_s25 + $0x60] sm:$0xf] %v3468_v48  ;;  %3485 = vst [vmem:[%s4455_s25 + $0x68] sm:$0xf] %v3469_v18  ;;  %v3439_v61 = vrot.slane %v4927_v32, %v5576_v54  ;;  %v3397_v47 = vld [vmem:[%s4221_s18 + $0x168] sm:$0xf]  ;;  %v3443_v28 = vrot.slane %v4992_v12, %v5576_v54  ;;  %v3447_v24 = vrot.slane %v5050_v34, %v5576_v54 }
 0x275   : > { %v3398_v2 = vld [vmem:[%s4221_s18 + $0x170] sm:$0xf]  ;;  %v3399_v31 = vld [vmem:[%s4221_s18 + $0x178] sm:$0xf]  ;;  %v2681_v7 = vadd.f32 %v2680_v49, %v2679_v9  ;;  %3486 = vst [vmem:[%s4455_s25 + $0x70] sm:$0xf] %v3470_v63  ;;  %v3451_v4 = vrot.slane %v5119_v23, %v5576_v54  ;;  %v3475_v36 = vmul.f32 %v3435_v55, %v3395_v25  ;;  %v3455_v58 = vrot.slane %v5175_v3, %v5576_v54 }
 0x276   : > { %3487 = vst [vmem:[%s4455_s25 + $0x78] sm:$0xf] %v3471_v45  ;;  %3488 = vst [vmem:[%s4455_s25 + $0xe0] sm:$0xf] %v3472_v57  ;;  %v3400_v19 = vld [vmem:[%s4221_s18 + $0x1e0] sm:$0xf]  ;;  %v3476_v52 = vmul.f32 %v3439_v61, %v3396_v33  ;;  %v3459_v27 = vrot.slane %v5332_v0, %v5576_v54  ;;  %v3477_v60 = vmul.f32 %v3443_v28, %v3397_v47 }
 0x277   : > { %v3401_v1 = vld [vmem:[%s4221_s18 + $0x1e8] sm:$0xf]  ;;  %3489 = vst [vmem:[%s4455_s25 + $0xe8] sm:$0xf] %v3473_v51  ;;  %3490 = vst [vmem:[%s4455_s25 + $0xf0] sm:$0xf] %v3474_v20  ;;  %v3478_v40 = vmul.f32 %v3447_v24, %v3398_v2  ;;  %v3479_v8 = vmul.f32 %v3451_v4, %v3399_v31  ;;  %v3480_v46 = vmul.f32 %v3455_v58, %v3400_v19 }
 0x278   : > { %v2682_v50 = vrot.slane %v2681_v7, 1  ;;  %v3402_v62 = vld [vmem:[%s4221_s18 + $0x1f0] sm:$0xf]  ;;  %v3500_v15 = vld [vmem:[%s4221_s18 + $0x60] sm:$0xf0]  ;;  %v3481_v9 = vmul.f32 %v3459_v27, %v3401_v1  ;;  %v3463_v30 = vrot.slane %v5531_v44, %v5576_v54  ;;  %v3519_v17 = vrot.slane %v4437_v42, %v5586_v5 }
 0x279   : > { %3491 = vst [vmem:[%s4455_s25 + $0xf8] sm:$0xf] %v3475_v36  ;;  %3492 = vst [vmem:[%s4455_s25 + $0x160] sm:$0xf] %v3476_v52  ;;  %v3501_v13 = vld [vmem:[%s4221_s18 + $0x68] sm:$0xf0]  ;;  %v3523_v18 = vrot.slane %v4508_v26, %v5586_v5  ;;  %v3527_v29 = vrot.slane %v4564_v41, %v5586_v5  ;;  %v3531_v11 = vrot.slane %v4630_v56, %v5586_v5 }
 0x27a   : > { %v3502_v21 = vld [vmem:[%s4221_s18 + $0x70] sm:$0xf0]  ;;  %v3503_v22 = vld [vmem:[%s4221_s18 + $0x78] sm:$0xf0]  ;;  %v2683_v48 = vadd.f32 %v2682_v50, %v2681_v7  ;;  %3493 = vst [vmem:[%s4455_s25 + $0x168] sm:$0xf] %v3477_v60  ;;  %v3482_v63 = vmul.f32 %v3463_v30, %v3402_v62  ;;  %v3580_v45 = vmul.f32 %v3519_v17, %v3500_v15  ;;  %v3535_v26 = vrot.slane %v4688_v10, %v5586_v5 }
 0x27b   : > { %3494 = vst [vmem:[%s4455_s25 + $0x170] sm:$0xf] %v3478_v40  ;;  %3495 = vst [vmem:[%s4455_s25 + $0x178] sm:$0xf] %v3479_v8  ;;  %v3504_v42 = vld [vmem:[%s4221_s18 + $0xe0] sm:$0xf0]  ;;  %v3539_v41 = vrot.slane %v4753_v6, %v5586_v5  ;;  %v3581_v56 = vmul.f32 %v3523_v18, %v3501_v13  ;;  %v3582_v57 = vmul.f32 %v3527_v29, %v3502_v21 }
 0x27c   : > { %v3505_v49 = vld [vmem:[%s4221_s18 + $0xe8] sm:$0xf0]  ;;  %3496 = vst [vmem:[%s4455_s25 + $0x1e0] sm:$0xf] %v3480_v46  ;;  %3497 = vst [vmem:[%s4455_s25 + $0x1e8] sm:$0xf] %v3481_v9  ;;  %3917 = vrcp.f32 %v2683_v48  ;;  %v3583_v25 = vmul.f32 %v3531_v11, %v3503_v22  ;;  %v3584_v10 = vmul.f32 %v3535_v26, %v3504_v42  ;;  %v3543_v6 = vrot.slane %v4806_v37, %v5586_v5 }
 0x27d   : > { %v3506_v33 = vld [vmem:[%s4221_s18 + $0xf0] sm:$0xf0]  ;;  %v3507_v51 = vld [vmem:[%s4221_s18 + $0xf8] sm:$0xf0]  ;;  %v3508_v20 = vld [vmem:[%s4221_s18 + $0x160] sm:$0xf0]  ;;  %v3585_v55 = vmul.f32 %v3539_v41, %v3505_v49  ;;  %v3547_v61 = vrot.slane %v4871_v35, %v5586_v5  ;;  %v3551_v7 = vrot.slane %v4927_v32, %v5586_v5  ;;  %v3555_v28 = vrot.slane %v4992_v12, %v5586_v5 }
 0x27e   : > { %3498 = vst [vmem:[%s4455_s25 + $0x1f0] sm:$0xf] %v3482_v63  ;;  %3596 = vst [vmem:[%s4455_s25 + $0x60] sm:$0xf0] %v3580_v45  ;;  %v3509_v47 = vld [vmem:[%s4221_s18 + $0x168] sm:$0xf0]  ;;  %v3559_v37 = vrot.slane %v5050_v34, %v5586_v5  ;;  %v3563_v35 = vrot.slane %v5119_v23, %v5586_v5  ;;  %v3586_v19 = vmul.f32 %v3543_v6, %v3506_v33 }
 0x27f   : > { %v3510_v2 = vld [vmem:[%s4221_s18 + $0x170] sm:$0xf0]  ;;  %v3511_v31 = vld [vmem:[%s4221_s18 + $0x178] sm:$0xf0]  ;;  %3597 = vst [vmem:[%s4455_s25 + $0x68] sm:$0xf0] %v3581_v56  ;;  %v3587_v32 = vmul.f32 %v3547_v61, %v3507_v51  ;;  %v3567_v12 = vrot.slane %v5175_v3, %v5586_v5  ;;  %v3571_v34 = vrot.slane %v5332_v0, %v5586_v5  ;;  %v3588_v1 = vmul.f32 %v3551_v7, %v3508_v20 }
 0x280   : > { %3598 = vst [vmem:[%s4455_s25 + $0x70] sm:$0xf0] %v3582_v57  ;;  %3599 = vst [vmem:[%s4455_s25 + $0x78] sm:$0xf0] %v3583_v25  ;;  %v3512_v24 = vld [vmem:[%s4221_s18 + $0x1e0] sm:$0xf0]  ;;  %v3589_v23 = vmul.f32 %v3555_v28, %v3509_v47  ;;  %v3590_v36 = vmul.f32 %v3559_v37, %v3510_v2  ;;  %v3591_v52 = vmul.f32 %v3563_v35, %v3511_v31 }
 0x281   : > { %v3513_v4 = vld [vmem:[%s4221_s18 + $0x1e8] sm:$0xf0]  ;;  %3600 = vst [vmem:[%s4455_s25 + $0xe0] sm:$0xf0] %v3584_v10  ;;  %3601 = vst [vmem:[%s4455_s25 + $0xe8] sm:$0xf0] %v3585_v55  ;;  %v3592_v27 = vmul.f32 %v3567_v12, %v3512_v24  ;;  %v3575_v3 = vrot.slane %v5531_v44, %v5586_v5 }
 0x282   : > { %v3514_v58 = vld [vmem:[%s4221_s18 + $0x1f0] sm:$0xf0]  ;;  %3602 = vst [vmem:[%s4455_s25 + $0xf0] sm:$0xf0] %v3586_v19  ;;  %3603 = vst [vmem:[%s4455_s25 + $0xf8] sm:$0xf0] %v3587_v32  ;;  %v3593_v50 = vmul.f32 %v3571_v34, %v3513_v4 }
 0x283   : > { %3604 = vst [vmem:[%s4455_s25 + $0x160] sm:$0xf0] %v3588_v1  ;;  %3605 = vst [vmem:[%s4455_s25 + $0x168] sm:$0xf0] %v3589_v23  ;;  %v3594_v0 = vmul.f32 %v3575_v3, %v3514_v58  ;;  %v2843_v8 = vld [vmem:[%s4221_s18 + $0x198] sm:$0xf0] }
 0x284   : > { %3606 = vst [vmem:[%s4455_s25 + $0x170] sm:$0xf0] %v3590_v36  ;;  %3607 = vst [vmem:[%s4455_s25 + $0x178] sm:$0xf0] %v3591_v52  ;;  %v2955_v62 = vld [vmem:[%s4221_s18 + $0x1b8] sm:$0xf] }
 0x285   : > { %3608 = vst [vmem:[%s4455_s25 + $0x1e0] sm:$0xf0] %v3592_v27  ;;  %3609 = vst [vmem:[%s4455_s25 + $0x1e8] sm:$0xf0] %v3593_v50  ;;  %v3067_v15 = vld [vmem:[%s4221_s18 + $0x1b8] sm:$0xf0] }
 0x286   : > { %3610 = vst [vmem:[%s4455_s25 + $0x1f0] sm:$0xf0] %v3594_v0  ;;  %v3179_v46 = vld [vmem:[%s4221_s18 + $0x1d8] sm:$0xf]  ;;  %v3291_v21 = vld [vmem:[%s4221_s18 + $0x1d8] sm:$0xf0] }
 0x287   : > { %v3403_v22 = vld [vmem:[%s4221_s18 + $0x1f8] sm:$0xf]  ;;  %v3515_v48 = vld [vmem:[%s4221_s18 + $0x1f8] sm:$0xf0] }
 0x289   : > { %v3918_v60 = vpop.eup %3917 }
 0x28a   : > { %v2715_v44 = vmul.f32 4.0, %v3918_v60 }
 0x28c   : > { %v2731_v40 = vmul.f32 %v5566_v39, %v2715_v44 }
 0x28e   : > { %v2795_v9 = vrot.slane %v2731_v40, %v4314_v43  ;;  %v2907_v30 = vrot.slane %v2731_v40, %v5195_v53  ;;  %v3019_v17 = vrot.slane %v2731_v40, %v5199_v59  ;;  %v3131_v13 = vrot.slane %v2731_v40, %v5371_v38  ;;  %v3932_v53 = vld [vmem:[%s4221_s18 + $0x198] sm:$0xf] }
 0x28f   : > { %v3243_v39 = vrot.slane %v2731_v40, %v5379_v16  ;;  %v3355_v18 = vrot.slane %v2731_v40, %v5382_v14  ;;  %v3467_v29 = vrot.slane %v2731_v40, %v5576_v54  ;;  %v3579_v43 = vrot.slane %v2731_v40, %v5586_v5 }
 0x290   : > { %v2811_v59 = vmul.f32 %v3932_v53, %v2795_v9  ;;  %v2923_v38 = vmul.f32 %v2907_v30, %v2843_v8  ;;  %v3035_v16 = vmul.f32 %v3019_v17, %v2955_v62  ;;  %v3147_v11 = vmul.f32 %v3131_v13, %v3067_v15 }
 0x291   : > { %v3259_v14 = vmul.f32 %v3243_v39, %v3179_v46  ;;  %v3371_v54 = vmul.f32 %v3355_v18, %v3291_v21  ;;  %v3483_v5 = vmul.f32 %v3467_v29, %v3403_v22  ;;  %v3595_v42 = vmul.f32 %v3579_v43, %v3515_v48 }
 0x292   : > { %2827 = vst [vmem:[%s4455_s25 + $0x198] sm:$0xf] %v2811_v59  ;;  %2939 = vst [vmem:[%s4455_s25 + $0x198] sm:$0xf0] %v2923_v38 }
 0x293   : > { %3051 = vst [vmem:[%s4455_s25 + $0x1b8] sm:$0xf] %v3035_v16  ;;  %3163 = vst [vmem:[%s4455_s25 + $0x1b8] sm:$0xf0] %v3147_v11 }
 0x294   : > { %3275 = vst [vmem:[%s4455_s25 + $0x1d8] sm:$0xf] %v3259_v14  ;;  %3387 = vst [vmem:[%s4455_s25 + $0x1d8] sm:$0xf0] %v3371_v54 }
 0x295   : > { %3499 = vst [vmem:[%s4455_s25 + $0x1f8] sm:$0xf] %v3483_v5  ;;  %3611 = vst [vmem:[%s4455_s25 + $0x1f8] sm:$0xf0] %v3595_v42 }
 0x296   : > { %3989 = shalt.err (!%p3986_p0)
}
 0x297   : > { %s3990_s18 = scalar_lea.hbm %s5735_s7, 8192  ;;  %s3994_s21 = scalar_lea.hbm %s5798_s2, 32768 }
 0x298   : > { %p3991_p2 = scmp.ne.s32.totalorder %s5735_s7, %s3990_s18  ;;  %p3995_p10 = scmp.lt.s32.totalorder %s5735_s7, %s5798_s2 }
 0x299   : > { %p3996_p11 = scmp.lt.s32.totalorder %s3994_s21, %s3990_s18 }
 0x29a   : > { %p3992_p4 = pnand %p3991_p2, %p5824_p1 }
 0x29b   : > { %p3997_p5 = por %p3996_p11, %p3995_p10 }
 0x29c   : > { %p3993_p6 = pneg %p3992_p4 }
 0x29e   : > { %p3998_p3 = pnand %p3997_p5, %p3993_p6 }
 0x2a0   : > { %4001 = shalt.err (!%p3998_p3)
}
 0x2a1   : > { %s4084_s28 = smov 512   ;;  %s4085_s24 = smov 1024  }
 0x2a2   : > { %s4086_s25 = smov 32  }
 0x2a3   : > { %3766 = dma.vmem_to_hbm [thread:$0]  (%p5824_p1), %s5729_s8, 8192, %s5735_s7, %s3613_s1, %s4084_s28, %s4085_s24, %s4086_s25  }
 0x2a4 PF: > { %s5825_s26 = sld [smem:[#allocation13_spill]] }
 0x2a5   : > { %s5826_s30 = sld [smem:[#allocation11_spill]] }
 0x2a6   : > { %s5827_s3 = sld [smem:[#allocation14_spill]] }
 0x2aa   : > { %p3783_p7 = scmp.ge.s32.totalorder %s5825_s26, 2 }
 0x2ab   : > { %s3644_s6 = sand.u32 1, %s5826_s30  }
 0x2ac   : > { %p5828_p8 = scmp.ne.s32.totalorder %s5827_s3, 0  ;;  %s3645_s12 = scalar_lea.sflag [#allocation4], %s3644_s6 }
 0x2ae   : > { %p3777_p9 = pnand %p3783_p7, %p5828_p8 }
 0x2b0   : > { %p3778_p12 = pneg %p3777_p9 }
 0x2b2   : > { %4043 = dma.done.wait (%p3778_p12), %s3645_s12, 8192  }
 0x2b3   : > { %4045 = vsyncadd (%p3778_p12), %s3645_s12, 4294959104  ;;  %s19_s16 = sadd.s32 1, %s5825_s26   ;;  %s5829_s12 = sld [smem:[#allocation12_spill]] }
 0x2b4   : > { %p16_p13 = scmp.ge.s32.totalorder %s19_s16, 6   ;;  %s5830_s22 = sld [smem:[#allocation15_spill]] }
 0x2b5   : > { %s5831_s9 = smov %s4052_s10  ;;  %s5832_s10 = smov %s4056_s11 }
 0x2b6   : > { %s5833_s11 = smov %s4206_s14  ;;  %s5834_s13 = smov %s4072_s15 }
 0x2b7   : > { %s5836_s15 = smov %s5842_s4  ;;  %18 = sbr.rel (!%p16_p13) target bundleno = 10 (0xa), region = 78 }
 0x2ba   : > { %s5835_s14 = smov %s5830_s22 }
 0x2bc   :  { %3650 = vsyncpa [#allocation3], 1 }
 0x2bd   :  { %3652 = vsyncpa [#allocation3 + $0x1], 1 }
 0x2be   :  { %3653 = vsyncpa [#allocation4], 1 }
 0x2bf   :  { %3655 = vsyncpa [#allocation4 + $0x1], 1 }
 0x2c0   :  { %3656 = vsyncpa [#allocation5], 1 }
 0x2c1   :  { %3658 = vsyncpa [#allocation5 + $0x1], 1 }

</bundles_post_ra>
